<compile_context>
chip_gen: v5e
topology: v5e:2x2
jax: 0.10.0
libtpu: 0.0.40
codegen_flags: <defaults>
</compile_context>

<pallas_src>
import math

import jax
import jax.numpy as jnp
from jax.experimental import pallas as pl
from jax.experimental.pallas import tpu as pltpu

# ----------------------------- model hyper-parameters -----------------------------
B = 2          # batch
S = 8          # source sequence length
T = 8          # target sequence length
H = 32         # hidden size
V = 64         # vocab size
NH = 4         # attention heads
DH = H // NH   # head dim
FF = 64        # feed-forward size
MAX_POS = 64

MM_DTYPE = jnp.bfloat16            # MXU operand dtype (accumulate in f32)
SCALE = 1.0 / math.sqrt(DH)

PARAM_NAMES = (
    "word_emb", "pos_emb", "emb_ln_g", "emb_ln_b",
    "enc_wqkv", "enc_bqkv", "enc_wo", "enc_bo", "enc_ln1_g", "enc_ln1_b",
    "enc_ff1_w", "enc_ff1_b", "enc_ff2_w", "enc_ff2_b", "enc_ln2_g", "enc_ln2_b",
    "dec_self_wqkv", "dec_self_bqkv", "dec_self_wo", "dec_self_bo",
    "dec_ln1_g", "dec_ln1_b",
    "dec_cross_wq", "dec_cross_bq", "dec_cross_wkv", "dec_cross_bkv",
    "dec_cross_wo", "dec_cross_bo", "dec_ln2_g", "dec_ln2_b",
    "dec_ff1_w", "dec_ff1_b", "dec_ff2_w", "dec_ff2_b", "dec_ln3_g", "dec_ln3_b",
    "dense_w", "dense_b",
)


# ================================ in-kernel helpers ================================

def _layer_norm(x, g, b, eps=1e-5):
    mu = jnp.mean(x, axis=-1, keepdims=True)
    var = jnp.mean((x - mu) ** 2, axis=-1, keepdims=True)
    return (x - mu) * jax.lax.rsqrt(var + eps) * g + b


def _mm(a, w):
    """MXU matmul: bf16 operands, f32 accumulate."""
    return jnp.dot(a.astype(MM_DTYPE), w.astype(MM_DTYPE),
                   preferred_element_type=jnp.float32)


def _split_heads(x):
    """(L, H) -> (NH, L, DH): one relayout (lane slices stacked on the leading dim)."""
    return jnp.stack([x[:, h * DH:(h + 1) * DH] for h in range(NH)], axis=0)


def _merge_heads(o):
    """(NH, L, DH) -> (L, H): concat heads back along lanes."""
    return jnp.concatenate([o[h] for h in range(NH)], axis=-1)


def _attn_core(q, k, v, bias):
    """All heads in one batched einsum pair; softmax in f32; returns (Lq, H)."""
    qh = _split_heads(q).astype(MM_DTYPE)
    kh = _split_heads(k).astype(MM_DTYPE)
    vh = _split_heads(v).astype(MM_DTYPE)
    s = jnp.einsum("hqd,hkd->hqk", qh, kh,
                   preferred_element_type=jnp.float32) * SCALE + bias
    m = jnp.max(s, axis=-1, keepdims=True)
    e = jnp.exp(s - m)
    p = e * pl.reciprocal(jnp.sum(e, axis=-1, keepdims=True), approx=True)
    o = jnp.einsum("hqk,hkd->hqd", p.astype(MM_DTYPE), vh,
                   preferred_element_type=jnp.float32)
    return _merge_heads(o)


# ================================ fused kernel =====================================

def _seq2seq_kernel(src_ids_ref, tgt_ids_ref, tgt_mask_ref, src_mask_ref, *refs):
    p = {name: refs[i][...] for i, name in enumerate(PARAM_NAMES)}
    lsum_ref, cnt_ref = refs[-2], refs[-1]

    b = pl.program_id(0)                 # one batch item per grid step ("parallel")
    we = p["word_emb"]                   # (V, H) f32, tied embedding / lm_head
    lane_v = jax.lax.broadcasted_iota(jnp.int32, (1, V), 1)

    # ---- embedding: one-hot gather (MXU) + positional + LayerNorm -----------------
    def onehot(idx):
        return jnp.where(lane_v == idx, 1.0, 0.0).astype(jnp.float32)

    def embed(ids_ref, length):
        oh = jnp.concatenate([onehot(ids_ref[b, t]) for t in range(length)], axis=0)
        x = jnp.dot(oh, we, preferred_element_type=jnp.float32) + p["pos_emb"][:length]
        return _layer_norm(x, p["emb_ln_g"], p["emb_ln_b"])

    # ---- attention biases built in-kernel (no HBM bias tensors) -------------------
    src_key = src_mask_ref[pl.ds(b, 1), :]                          # (1, S), 1 = real
    enc_bias = ((1.0 - src_key) * -10000.0)[:, None, :]             # (1, 1, S)
    mem_bias = ((1.0 - src_key) * -1e9)[:, None, :]                 # (1, 1, S)
    row = jax.lax.broadcasted_iota(jnp.int32, (T, T), 0)
    col = jax.lax.broadcasted_iota(jnp.int32, (T, T), 1)
    causal_bias = jnp.where(col > row, -10000.0, 0.0)[None, :, :]   # (1, T, T)

    # ---- fused blocks --------------------------------------------------------------
    def self_attn(x, wqkv, bqkv, wo, bo, g, be, bias):
        qkv = _mm(x, wqkv) + bqkv                                   # one (H,3H) GEMM
        y = _attn_core(qkv[:, :H], qkv[:, H:2 * H], qkv[:, 2 * H:], bias)
        y = _mm(y, wo) + bo                                         # one (H,H) GEMM
        return _layer_norm(x + y, g, be)

    def cross_attn(x, mem, wq, bq, wkv, bkv, wo, bo, g, be, bias):
        q = _mm(x, wq) + bq
        kv = _mm(mem, wkv) + bkv                                    # one (H,2H) GEMM
        y = _attn_core(q, kv[:, :H], kv[:, H:], bias)
        y = _mm(y, wo) + bo
        return _layer_norm(x + y, g, be)

    def ffn(x, w1, b1, w2, b2, g, be):
        h1 = jnp.maximum(_mm(x, w1) + b1, 0.0)
        y = _mm(h1, w2) + b2
        return _layer_norm(x + y, g, be)

    # ----------------------------- encoder ------------------------------------------
    x = embed(src_ids_ref, S)                                        # (S, H)
    x = self_attn(x, p["enc_wqkv"], p["enc_bqkv"], p["enc_wo"], p["enc_bo"],
                  p["enc_ln1_g"], p["enc_ln1_b"], enc_bias)
    memory = ffn(x, p["enc_ff1_w"], p["enc_ff1_b"], p["enc_ff2_w"], p["enc_ff2_b"],
                 p["enc_ln2_g"], p["enc_ln2_b"])                     # (S, H)

    # ----------------------------- decoder ------------------------------------------
    y = embed(tgt_ids_ref, T)                                        # (T, H)
    y = self_attn(y, p["dec_self_wqkv"], p["dec_self_bqkv"], p["dec_self_wo"],
                  p["dec_self_bo"], p["dec_ln1_g"], p["dec_ln1_b"], causal_bias)
    y = cross_attn(y, memory, p["dec_cross_wq"], p["dec_cross_bq"],
                   p["dec_cross_wkv"], p["dec_cross_bkv"], p["dec_cross_wo"],
                   p["dec_cross_bo"], p["dec_ln2_g"], p["dec_ln2_b"], mem_bias)
    y = ffn(y, p["dec_ff1_w"], p["dec_ff1_b"], p["dec_ff2_w"], p["dec_ff2_b"],
            p["dec_ln3_g"], p["dec_ln3_b"])                          # (T, H)

    # ----------------------- head + shifted masked cross-entropy --------------------
    hid = jnp.tanh(_mm(y, p["dense_w"]) + p["dense_b"])              # (T, H)
    # tied lm_head: contract hidden dim of word_emb directly (A @ E^T, no transpose)
    logits = jax.lax.dot_general(hid.astype(MM_DTYPE), we.astype(MM_DTYPE),
                                 (((1,), (1,)), ((), ())),
                                 preferred_element_type=jnp.float32)  # (T, V)
    m = jnp.max(logits, axis=-1, keepdims=True)
    lse = m + jnp.log(jnp.sum(jnp.exp(logits - m), axis=-1, keepdims=True))  # (T, 1)

    # shifted label one-hots with the active mask folded in, built from SMEM ids/mask
    def lab_row(t):
        if t < T - 1:
            active = tgt_mask_ref[b, t + 1] != 0
            hit = jnp.logical_and(lane_v == tgt_ids_ref[b, t + 1], active)
            return jnp.where(hit, 1.0, 0.0).astype(jnp.float32)
        return jnp.zeros((1, V), jnp.float32)

    lab_oh = jnp.concatenate([lab_row(t) for t in range(T)], axis=0)  # (T, V)
    mask_col = jnp.sum(lab_oh, axis=-1, keepdims=True)                # (T, 1) 0/1
    picked = jnp.sum(logits * lab_oh, axis=-1, keepdims=True)         # masked picked logits
    lsum = jnp.sum(lse * mask_col - picked)
    cnt = jnp.sum(mask_col)

    # lane-dense (1,8,128) slabs -> unmasked full-vreg stores; reduced outside
    lsum_ref[...] = jnp.broadcast_to(lsum.reshape(1, 1, 1), (1, 8, 128))
    cnt_ref[...] = jnp.broadcast_to(cnt.reshape(1, 1, 1), (1, 8, 128))


# ================================ wrapper / glue ===================================

def _full_spec(shape):
    nd = len(shape)
    return pl.BlockSpec(shape, lambda b: (0,) * nd)


def seq2seq_forward(params, source_ids, source_mask, target_ids, target_mask):
    """Mirrors Seq2Seq.forward() with target_ids present (training branch)."""
    param_list = [params[name] for name in PARAM_NAMES]
    smem_spec = pl.BlockSpec(memory_space=pltpu.MemorySpace.SMEM)
    out_spec = pl.BlockSpec((1, 8, 128), lambda b: (b, 0, 0))

    lsum, cnt = pl.pallas_call(
        _seq2seq_kernel,
        grid=(B,),
        in_specs=[smem_spec, smem_spec, smem_spec, _full_spec((B, S))]
                 + [_full_spec(a.shape) for a in param_list],
        out_specs=(out_spec, out_spec),
        out_shape=(jax.ShapeDtypeStruct((B, 8, 128), jnp.float32),
                   jax.ShapeDtypeStruct((B, 8, 128), jnp.float32)),
        compiler_params=pltpu.CompilerParams(dimension_semantics=("parallel",)),
    )(source_ids.astype(jnp.int32), target_ids.astype(jnp.int32),
      target_mask.astype(jnp.int32), source_mask.astype(jnp.float32),
      *param_list)

    loss_sum = jnp.sum(lsum[:, 0, 0])
    count = jnp.sum(cnt[:, 0, 0])
    loss = loss_sum / jnp.maximum(count, 1.0)          # guard count == 0
    return loss, loss * count, count


# ================================== param init =====================================

def init_params(key):
    keys = iter(jax.random.split(key, 32))

    def w(shape, scale=0.02):
        return jax.random.normal(next(keys), shape, jnp.float32) * scale

    ones = lambda n: jnp.ones((1, n), jnp.float32)
    zeros = lambda n: jnp.zeros((1, n), jnp.float32)

    return dict(
        word_emb=w((V, H)), pos_emb=w((MAX_POS, H)),
        emb_ln_g=ones(H), emb_ln_b=zeros(H),
        enc_wqkv=w((H, 3 * H)), enc_bqkv=zeros(3 * H),
        enc_wo=w((H, H)), enc_bo=zeros(H),
        enc_ln1_g=ones(H), enc_ln1_b=zeros(H),
        enc_ff1_w=w((H, FF)), enc_ff1_b=zeros(FF),
        enc_ff2_w=w((FF, H)), enc_ff2_b=zeros(H),
        enc_ln2_g=ones(H), enc_ln2_b=zeros(H),
        dec_self_wqkv=w((H, 3 * H)), dec_self_bqkv=zeros(3 * H),
        dec_self_wo=w((H, H)), dec_self_bo=zeros(H),
        dec_ln1_g=ones(H), dec_ln1_b=zeros(H),
        dec_cross_wq=w((H, H)), dec_cross_bq=zeros(H),
        dec_cross_wkv=w((H, 2 * H)), dec_cross_bkv=zeros(2 * H),
        dec_cross_wo=w((H, H)), dec_cross_bo=zeros(H),
        dec_ln2_g=ones(H), dec_ln2_b=zeros(H),
        dec_ff1_w=w((H, FF)), dec_ff1_b=zeros(FF),
        dec_ff2_w=w((FF, H)), dec_ff2_b=zeros(H),
        dec_ln3_g=ones(H), dec_ln3_b=zeros(H),
        dense_w=w((H, H)), dense_b=zeros(H),
    )


# ===================================== main =========================================

if __name__ == "__main__":
    key = jax.random.PRNGKey(0)
    kp, k1, k2 = jax.random.split(key, 3)
    params = init_params(kp)

    source_ids = jax.random.randint(k1, (B, S), 0, V, dtype=jnp.int32)
    target_ids = jax.random.randint(k2, (B, T), 0, V, dtype=jnp.int32)
    # masks: 1 = real token, 0 = padding
    source_mask = jnp.concatenate(
        [jnp.ones((B, S - 2), jnp.int32), jnp.array([[1, 1], [0, 0]], jnp.int32)], axis=1)
    target_mask = jnp.concatenate(
        [jnp.ones((B, T - 2), jnp.int32), jnp.array([[1, 0], [0, 0]], jnp.int32)], axis=1)

    fwd = jax.jit(seq2seq_forward)
    loss, weighted_loss, active_count = fwd(params, source_ids, source_mask,
                                            target_ids, target_mask)
    jax.block_until_ready((loss, weighted_loss, active_count))
    print("KERNEL_OK")
</pallas_src>

<mosaic_0001>
module attributes {stable_mosaic.version = 11 : i64} {
  func.func @_seq2seq_kernel(%arg0: i32, %arg1: memref<2x8xi32, #tpu.memory_space<smem>>, %arg2: memref<2x8xi32, #tpu.memory_space<smem>>, %arg3: memref<2x8xi32, #tpu.memory_space<smem>>, %arg4: memref<2x8xf32, #tpu.memory_space<vmem>>, %arg5: memref<64x32xf32, #tpu.memory_space<vmem>>, %arg6: memref<64x32xf32, #tpu.memory_space<vmem>>, %arg7: memref<1x32xf32, #tpu.memory_space<vmem>>, %arg8: memref<1x32xf32, #tpu.memory_space<vmem>>, %arg9: memref<32x96xf32, #tpu.memory_space<vmem>>, %arg10: memref<1x96xf32, #tpu.memory_space<vmem>>, %arg11: memref<32x32xf32, #tpu.memory_space<vmem>>, %arg12: memref<1x32xf32, #tpu.memory_space<vmem>>, %arg13: memref<1x32xf32, #tpu.memory_space<vmem>>, %arg14: memref<1x32xf32, #tpu.memory_space<vmem>>, %arg15: memref<32x64xf32, #tpu.memory_space<vmem>>, %arg16: memref<1x64xf32, #tpu.memory_space<vmem>>, %arg17: memref<64x32xf32, #tpu.memory_space<vmem>>, %arg18: memref<1x32xf32, #tpu.memory_space<vmem>>, %arg19: memref<1x32xf32, #tpu.memory_space<vmem>>, %arg20: memref<1x32xf32, #tpu.memory_space<vmem>>, %arg21: memref<32x96xf32, #tpu.memory_space<vmem>>, %arg22: memref<1x96xf32, #tpu.memory_space<vmem>>, %arg23: memref<32x32xf32, #tpu.memory_space<vmem>>, %arg24: memref<1x32xf32, #tpu.memory_space<vmem>>, %arg25: memref<1x32xf32, #tpu.memory_space<vmem>>, %arg26: memref<1x32xf32, #tpu.memory_space<vmem>>, %arg27: memref<32x32xf32, #tpu.memory_space<vmem>>, %arg28: memref<1x32xf32, #tpu.memory_space<vmem>>, %arg29: memref<32x64xf32, #tpu.memory_space<vmem>>, %arg30: memref<1x64xf32, #tpu.memory_space<vmem>>, %arg31: memref<32x32xf32, #tpu.memory_space<vmem>>, %arg32: memref<1x32xf32, #tpu.memory_space<vmem>>, %arg33: memref<1x32xf32, #tpu.memory_space<vmem>>, %arg34: memref<1x32xf32, #tpu.memory_space<vmem>>, %arg35: memref<32x64xf32, #tpu.memory_space<vmem>>, %arg36: memref<1x64xf32, #tpu.memory_space<vmem>>, %arg37: memref<64x32xf32, #tpu.memory_space<vmem>>, %arg38: memref<1x32xf32, #tpu.memory_space<vmem>>, %arg39: memref<1x32xf32, #tpu.memory_space<vmem>>, %arg40: memref<1x32xf32, #tpu.memory_space<vmem>>, %arg41: memref<32x32xf32, #tpu.memory_space<vmem>>, %arg42: memref<1x32xf32, #tpu.memory_space<vmem>>, %arg43: memref<1x8x128xf32, #tpu.memory_space<vmem>>, %arg44: memref<1x8x128xf32, #tpu.memory_space<vmem>>) attributes {dimension_semantics = [#tpu.dimension_semantics<parallel>], iteration_bounds = array<i64: 2>, scalar_prefetch = 0 : i64, scratch_operands = 0 : i64, tpu.core_type = #tpu.core_type<tc>, window_params = [{transform_indices = @transform_0, window_bounds = array<i64: 2, 8>}, {transform_indices = @transform_1, window_bounds = array<i64: 2, 8>}, {transform_indices = @transform_2, window_bounds = array<i64: 2, 8>}, {pipeline_mode = #tpu.pipeline_mode<synchronous>, transform_indices = @transform_3, window_bounds = array<i64: 2, 8>}, {pipeline_mode = #tpu.pipeline_mode<synchronous>, transform_indices = @transform_4, window_bounds = array<i64: 64, 32>}, {pipeline_mode = #tpu.pipeline_mode<synchronous>, transform_indices = @transform_5, window_bounds = array<i64: 64, 32>}, {pipeline_mode = #tpu.pipeline_mode<synchronous>, transform_indices = @transform_6, window_bounds = array<i64: 1, 32>}, {pipeline_mode = #tpu.pipeline_mode<synchronous>, transform_indices = @transform_7, window_bounds = array<i64: 1, 32>}, {pipeline_mode = #tpu.pipeline_mode<synchronous>, transform_indices = @transform_8, window_bounds = array<i64: 32, 96>}, {pipeline_mode = #tpu.pipeline_mode<synchronous>, transform_indices = @transform_9, window_bounds = array<i64: 1, 96>}, {pipeline_mode = #tpu.pipeline_mode<synchronous>, transform_indices = @transform_10, window_bounds = array<i64: 32, 32>}, {pipeline_mode = #tpu.pipeline_mode<synchronous>, transform_indices = @transform_11, window_bounds = array<i64: 1, 32>}, {pipeline_mode = #tpu.pipeline_mode<synchronous>, transform_indices = @transform_12, window_bounds = array<i64: 1, 32>}, {pipeline_mode = #tpu.pipeline_mode<synchronous>, transform_indices = @transform_13, window_bounds = array<i64: 1, 32>}, {pipeline_mode = #tpu.pipeline_mode<synchronous>, transform_indices = @transform_14, window_bounds = array<i64: 32, 64>}, {pipeline_mode = #tpu.pipeline_mode<synchronous>, transform_indices = @transform_15, window_bounds = array<i64: 1, 64>}, {pipeline_mode = #tpu.pipeline_mode<synchronous>, transform_indices = @transform_16, window_bounds = array<i64: 64, 32>}, {pipeline_mode = #tpu.pipeline_mode<synchronous>, transform_indices = @transform_17, window_bounds = array<i64: 1, 32>}, {pipeline_mode = #tpu.pipeline_mode<synchronous>, transform_indices = @transform_18, window_bounds = array<i64: 1, 32>}, {pipeline_mode = #tpu.pipeline_mode<synchronous>, transform_indices = @transform_19, window_bounds = array<i64: 1, 32>}, {pipeline_mode = #tpu.pipeline_mode<synchronous>, transform_indices = @transform_20, window_bounds = array<i64: 32, 96>}, {pipeline_mode = #tpu.pipeline_mode<synchronous>, transform_indices = @transform_21, window_bounds = array<i64: 1, 96>}, {pipeline_mode = #tpu.pipeline_mode<synchronous>, transform_indices = @transform_22, window_bounds = array<i64: 32, 32>}, {pipeline_mode = #tpu.pipeline_mode<synchronous>, transform_indices = @transform_23, window_bounds = array<i64: 1, 32>}, {pipeline_mode = #tpu.pipeline_mode<synchronous>, transform_indices = @transform_24, window_bounds = array<i64: 1, 32>}, {pipeline_mode = #tpu.pipeline_mode<synchronous>, transform_indices = @transform_25, window_bounds = array<i64: 1, 32>}, {pipeline_mode = #tpu.pipeline_mode<synchronous>, transform_indices = @transform_26, window_bounds = array<i64: 32, 32>}, {pipeline_mode = #tpu.pipeline_mode<synchronous>, transform_indices = @transform_27, window_bounds = array<i64: 1, 32>}, {pipeline_mode = #tpu.pipeline_mode<synchronous>, transform_indices = @transform_28, window_bounds = array<i64: 32, 64>}, {pipeline_mode = #tpu.pipeline_mode<synchronous>, transform_indices = @transform_29, window_bounds = array<i64: 1, 64>}, {pipeline_mode = #tpu.pipeline_mode<synchronous>, transform_indices = @transform_30, window_bounds = array<i64: 32, 32>}, {pipeline_mode = #tpu.pipeline_mode<synchronous>, transform_indices = @transform_31, window_bounds = array<i64: 1, 32>}, {pipeline_mode = #tpu.pipeline_mode<synchronous>, transform_indices = @transform_32, window_bounds = array<i64: 1, 32>}, {pipeline_mode = #tpu.pipeline_mode<synchronous>, transform_indices = @transform_33, window_bounds = array<i64: 1, 32>}, {pipeline_mode = #tpu.pipeline_mode<synchronous>, transform_indices = @transform_34, window_bounds = array<i64: 32, 64>}, {pipeline_mode = #tpu.pipeline_mode<synchronous>, transform_indices = @transform_35, window_bounds = array<i64: 1, 64>}, {pipeline_mode = #tpu.pipeline_mode<synchronous>, transform_indices = @transform_36, window_bounds = array<i64: 64, 32>}, {pipeline_mode = #tpu.pipeline_mode<synchronous>, transform_indices = @transform_37, window_bounds = array<i64: 1, 32>}, {pipeline_mode = #tpu.pipeline_mode<synchronous>, transform_indices = @transform_38, window_bounds = array<i64: 1, 32>}, {pipeline_mode = #tpu.pipeline_mode<synchronous>, transform_indices = @transform_39, window_bounds = array<i64: 1, 32>}, {pipeline_mode = #tpu.pipeline_mode<synchronous>, transform_indices = @transform_40, window_bounds = array<i64: 32, 32>}, {pipeline_mode = #tpu.pipeline_mode<synchronous>, transform_indices = @transform_41, window_bounds = array<i64: 1, 32>}, {transform_indices = @transform_42, window_bounds = array<i64: 1, 8, 128>}, {transform_indices = @transform_43, window_bounds = array<i64: 1, 8, 128>}]} {
    %c0 = arith.constant 0 : index
    %c0_0 = arith.constant 0 : index
    %0 = vector.load %arg5[%c0, %c0_0] : memref<64x32xf32, #tpu.memory_space<vmem>>, vector<64x32xf32>
    %c0_1 = arith.constant 0 : index
    %c0_2 = arith.constant 0 : index
    %1 = vector.load %arg6[%c0_1, %c0_2] : memref<64x32xf32, #tpu.memory_space<vmem>>, vector<64x32xf32>
    %c0_3 = arith.constant 0 : index
    %c0_4 = arith.constant 0 : index
    %2 = vector.load %arg7[%c0_3, %c0_4] : memref<1x32xf32, #tpu.memory_space<vmem>>, vector<1x32xf32>
    %c0_5 = arith.constant 0 : index
    %c0_6 = arith.constant 0 : index
    %3 = vector.load %arg8[%c0_5, %c0_6] : memref<1x32xf32, #tpu.memory_space<vmem>>, vector<1x32xf32>
    %c0_7 = arith.constant 0 : index
    %c0_8 = arith.constant 0 : index
    %4 = vector.load %arg9[%c0_7, %c0_8] : memref<32x96xf32, #tpu.memory_space<vmem>>, vector<32x96xf32>
    %c0_9 = arith.constant 0 : index
    %c0_10 = arith.constant 0 : index
    %5 = vector.load %arg10[%c0_9, %c0_10] : memref<1x96xf32, #tpu.memory_space<vmem>>, vector<1x96xf32>
    %c0_11 = arith.constant 0 : index
    %c0_12 = arith.constant 0 : index
    %6 = vector.load %arg11[%c0_11, %c0_12] : memref<32x32xf32, #tpu.memory_space<vmem>>, vector<32x32xf32>
    %c0_13 = arith.constant 0 : index
    %c0_14 = arith.constant 0 : index
    %7 = vector.load %arg12[%c0_13, %c0_14] : memref<1x32xf32, #tpu.memory_space<vmem>>, vector<1x32xf32>
    %c0_15 = arith.constant 0 : index
    %c0_16 = arith.constant 0 : index
    %8 = vector.load %arg13[%c0_15, %c0_16] : memref<1x32xf32, #tpu.memory_space<vmem>>, vector<1x32xf32>
    %c0_17 = arith.constant 0 : index
    %c0_18 = arith.constant 0 : index
    %9 = vector.load %arg14[%c0_17, %c0_18] : memref<1x32xf32, #tpu.memory_space<vmem>>, vector<1x32xf32>
    %c0_19 = arith.constant 0 : index
    %c0_20 = arith.constant 0 : index
    %10 = vector.load %arg15[%c0_19, %c0_20] : memref<32x64xf32, #tpu.memory_space<vmem>>, vector<32x64xf32>
    %c0_21 = arith.constant 0 : index
    %c0_22 = arith.constant 0 : index
    %11 = vector.load %arg16[%c0_21, %c0_22] : memref<1x64xf32, #tpu.memory_space<vmem>>, vector<1x64xf32>
    %c0_23 = arith.constant 0 : index
    %c0_24 = arith.constant 0 : index
    %12 = vector.load %arg17[%c0_23, %c0_24] : memref<64x32xf32, #tpu.memory_space<vmem>>, vector<64x32xf32>
    %c0_25 = arith.constant 0 : index
    %c0_26 = arith.constant 0 : index
    %13 = vector.load %arg18[%c0_25, %c0_26] : memref<1x32xf32, #tpu.memory_space<vmem>>, vector<1x32xf32>
    %c0_27 = arith.constant 0 : index
    %c0_28 = arith.constant 0 : index
    %14 = vector.load %arg19[%c0_27, %c0_28] : memref<1x32xf32, #tpu.memory_space<vmem>>, vector<1x32xf32>
    %c0_29 = arith.constant 0 : index
    %c0_30 = arith.constant 0 : index
    %15 = vector.load %arg20[%c0_29, %c0_30] : memref<1x32xf32, #tpu.memory_space<vmem>>, vector<1x32xf32>
    %c0_31 = arith.constant 0 : index
    %c0_32 = arith.constant 0 : index
    %16 = vector.load %arg21[%c0_31, %c0_32] : memref<32x96xf32, #tpu.memory_space<vmem>>, vector<32x96xf32>
    %c0_33 = arith.constant 0 : index
    %c0_34 = arith.constant 0 : index
    %17 = vector.load %arg22[%c0_33, %c0_34] : memref<1x96xf32, #tpu.memory_space<vmem>>, vector<1x96xf32>
    %c0_35 = arith.constant 0 : index
    %c0_36 = arith.constant 0 : index
    %18 = vector.load %arg23[%c0_35, %c0_36] : memref<32x32xf32, #tpu.memory_space<vmem>>, vector<32x32xf32>
    %c0_37 = arith.constant 0 : index
    %c0_38 = arith.constant 0 : index
    %19 = vector.load %arg24[%c0_37, %c0_38] : memref<1x32xf32, #tpu.memory_space<vmem>>, vector<1x32xf32>
    %c0_39 = arith.constant 0 : index
    %c0_40 = arith.constant 0 : index
    %20 = vector.load %arg25[%c0_39, %c0_40] : memref<1x32xf32, #tpu.memory_space<vmem>>, vector<1x32xf32>
    %c0_41 = arith.constant 0 : index
    %c0_42 = arith.constant 0 : index
    %21 = vector.load %arg26[%c0_41, %c0_42] : memref<1x32xf32, #tpu.memory_space<vmem>>, vector<1x32xf32>
    %c0_43 = arith.constant 0 : index
    %c0_44 = arith.constant 0 : index
    %22 = vector.load %arg27[%c0_43, %c0_44] : memref<32x32xf32, #tpu.memory_space<vmem>>, vector<32x32xf32>
    %c0_45 = arith.constant 0 : index
    %c0_46 = arith.constant 0 : index
    %23 = vector.load %arg28[%c0_45, %c0_46] : memref<1x32xf32, #tpu.memory_space<vmem>>, vector<1x32xf32>
    %c0_47 = arith.constant 0 : index
    %c0_48 = arith.constant 0 : index
    %24 = vector.load %arg29[%c0_47, %c0_48] : memref<32x64xf32, #tpu.memory_space<vmem>>, vector<32x64xf32>
    %c0_49 = arith.constant 0 : index
    %c0_50 = arith.constant 0 : index
    %25 = vector.load %arg30[%c0_49, %c0_50] : memref<1x64xf32, #tpu.memory_space<vmem>>, vector<1x64xf32>
    %c0_51 = arith.constant 0 : index
    %c0_52 = arith.constant 0 : index
    %26 = vector.load %arg31[%c0_51, %c0_52] : memref<32x32xf32, #tpu.memory_space<vmem>>, vector<32x32xf32>
    %c0_53 = arith.constant 0 : index
    %c0_54 = arith.constant 0 : index
    %27 = vector.load %arg32[%c0_53, %c0_54] : memref<1x32xf32, #tpu.memory_space<vmem>>, vector<1x32xf32>
    %c0_55 = arith.constant 0 : index
    %c0_56 = arith.constant 0 : index
    %28 = vector.load %arg33[%c0_55, %c0_56] : memref<1x32xf32, #tpu.memory_space<vmem>>, vector<1x32xf32>
    %c0_57 = arith.constant 0 : index
    %c0_58 = arith.constant 0 : index
    %29 = vector.load %arg34[%c0_57, %c0_58] : memref<1x32xf32, #tpu.memory_space<vmem>>, vector<1x32xf32>
    %c0_59 = arith.constant 0 : index
    %c0_60 = arith.constant 0 : index
    %30 = vector.load %arg35[%c0_59, %c0_60] : memref<32x64xf32, #tpu.memory_space<vmem>>, vector<32x64xf32>
    %c0_61 = arith.constant 0 : index
    %c0_62 = arith.constant 0 : index
    %31 = vector.load %arg36[%c0_61, %c0_62] : memref<1x64xf32, #tpu.memory_space<vmem>>, vector<1x64xf32>
    %c0_63 = arith.constant 0 : index
    %c0_64 = arith.constant 0 : index
    %32 = vector.load %arg37[%c0_63, %c0_64] : memref<64x32xf32, #tpu.memory_space<vmem>>, vector<64x32xf32>
    %c0_65 = arith.constant 0 : index
    %c0_66 = arith.constant 0 : index
    %33 = vector.load %arg38[%c0_65, %c0_66] : memref<1x32xf32, #tpu.memory_space<vmem>>, vector<1x32xf32>
    %c0_67 = arith.constant 0 : index
    %c0_68 = arith.constant 0 : index
    %34 = vector.load %arg39[%c0_67, %c0_68] : memref<1x32xf32, #tpu.memory_space<vmem>>, vector<1x32xf32>
    %c0_69 = arith.constant 0 : index
    %c0_70 = arith.constant 0 : index
    %35 = vector.load %arg40[%c0_69, %c0_70] : memref<1x32xf32, #tpu.memory_space<vmem>>, vector<1x32xf32>
    %c0_71 = arith.constant 0 : index
    %c0_72 = arith.constant 0 : index
    %36 = vector.load %arg41[%c0_71, %c0_72] : memref<32x32xf32, #tpu.memory_space<vmem>>, vector<32x32xf32>
    %c0_73 = arith.constant 0 : index
    %c0_74 = arith.constant 0 : index
    %37 = vector.load %arg42[%c0_73, %c0_74] : memref<1x32xf32, #tpu.memory_space<vmem>>, vector<1x32xf32>
    %38 = tpu.iota {dimensions = array<i32: 1>} : vector<1x64xi32>
    %39 = arith.index_cast %arg0 : i32 to index
    %c0_75 = arith.constant 0 : index
    %40 = vector.load %arg4[%39, %c0_75] : memref<2x8xf32, #tpu.memory_space<vmem>>, vector<1x8xf32>
    %cst = arith.constant 1.000000e+00 : f32
    %41 = vector.broadcast %cst : f32 to vector<1x8xf32>
    %42 = arith.subf %41, %40 : vector<1x8xf32>
    %cst_76 = arith.constant -1.000000e+04 : f32
    %43 = vector.broadcast %cst_76 : f32 to vector<1x8xf32>
    %44 = arith.mulf %42, %43 : vector<1x8xf32>
    %45 = vector.shape_cast %44 : vector<1x8xf32> to vector<1x1x8xf32>
    %cst_77 = arith.constant 1.000000e+00 : f32
    %46 = vector.broadcast %cst_77 : f32 to vector<1x8xf32>
    %47 = arith.subf %46, %40 : vector<1x8xf32>
    %cst_78 = arith.constant -1.000000e+09 : f32
    %48 = vector.broadcast %cst_78 : f32 to vector<1x8xf32>
    %49 = arith.mulf %47, %48 : vector<1x8xf32>
    %50 = vector.shape_cast %49 : vector<1x8xf32> to vector<1x1x8xf32>
    %51 = tpu.iota {dimensions = array<i32: 0>} : vector<8x8xi32>
    %52 = tpu.iota {dimensions = array<i32: 1>} : vector<8x8xi32>
    %53 = arith.cmpi sgt, %52, %51 : vector<8x8xi32>
    %cst_79 = arith.constant -1.000000e+04 : f32
    %cst_80 = arith.constant 0.000000e+00 : f32
    %54 = vector.broadcast %cst_79 : f32 to vector<8x8xf32>
    %55 = vector.broadcast %cst_80 : f32 to vector<8x8xf32>
    %56 = arith.select %53, %54, %55 : vector<8x8xi1>, vector<8x8xf32>
    %57 = vector.shape_cast %56 : vector<8x8xf32> to vector<1x8x8xf32>
    %58 = arith.index_cast %arg0 : i32 to index
    %c0_81 = arith.constant 0 : index
    %59 = memref.load %arg1[%58, %c0_81] : memref<2x8xi32, #tpu.memory_space<smem>>
    %60 = vector.broadcast %59 : i32 to vector<1x64xi32>
    %61 = arith.cmpi eq, %38, %60 : vector<1x64xi32>
    %cst_82 = arith.constant 1.000000e+00 : f32
    %cst_83 = arith.constant 0.000000e+00 : f32
    %62 = vector.broadcast %cst_82 : f32 to vector<1x64xf32>
    %63 = vector.broadcast %cst_83 : f32 to vector<1x64xf32>
    %64 = arith.select %61, %62, %63 : vector<1x64xi1>, vector<1x64xf32>
    %65 = arith.index_cast %arg0 : i32 to index
    %c1 = arith.constant 1 : index
    %66 = memref.load %arg1[%65, %c1] : memref<2x8xi32, #tpu.memory_space<smem>>
    %67 = vector.broadcast %66 : i32 to vector<1x64xi32>
    %68 = arith.cmpi eq, %38, %67 : vector<1x64xi32>
    %cst_84 = arith.constant 1.000000e+00 : f32
    %cst_85 = arith.constant 0.000000e+00 : f32
    %69 = vector.broadcast %cst_84 : f32 to vector<1x64xf32>
    %70 = vector.broadcast %cst_85 : f32 to vector<1x64xf32>
    %71 = arith.select %68, %69, %70 : vector<1x64xi1>, vector<1x64xf32>
    %72 = arith.index_cast %arg0 : i32 to index
    %c2 = arith.constant 2 : index
    %73 = memref.load %arg1[%72, %c2] : memref<2x8xi32, #tpu.memory_space<smem>>
    %74 = vector.broadcast %73 : i32 to vector<1x64xi32>
    %75 = arith.cmpi eq, %38, %74 : vector<1x64xi32>
    %cst_86 = arith.constant 1.000000e+00 : f32
    %cst_87 = arith.constant 0.000000e+00 : f32
    %76 = vector.broadcast %cst_86 : f32 to vector<1x64xf32>
    %77 = vector.broadcast %cst_87 : f32 to vector<1x64xf32>
    %78 = arith.select %75, %76, %77 : vector<1x64xi1>, vector<1x64xf32>
    %79 = arith.index_cast %arg0 : i32 to index
    %c3 = arith.constant 3 : index
    %80 = memref.load %arg1[%79, %c3] : memref<2x8xi32, #tpu.memory_space<smem>>
    %81 = vector.broadcast %80 : i32 to vector<1x64xi32>
    %82 = arith.cmpi eq, %38, %81 : vector<1x64xi32>
    %cst_88 = arith.constant 1.000000e+00 : f32
    %cst_89 = arith.constant 0.000000e+00 : f32
    %83 = vector.broadcast %cst_88 : f32 to vector<1x64xf32>
    %84 = vector.broadcast %cst_89 : f32 to vector<1x64xf32>
    %85 = arith.select %82, %83, %84 : vector<1x64xi1>, vector<1x64xf32>
    %86 = arith.index_cast %arg0 : i32 to index
    %c4 = arith.constant 4 : index
    %87 = memref.load %arg1[%86, %c4] : memref<2x8xi32, #tpu.memory_space<smem>>
    %88 = vector.broadcast %87 : i32 to vector<1x64xi32>
    %89 = arith.cmpi eq, %38, %88 : vector<1x64xi32>
    %cst_90 = arith.constant 1.000000e+00 : f32
    %cst_91 = arith.constant 0.000000e+00 : f32
    %90 = vector.broadcast %cst_90 : f32 to vector<1x64xf32>
    %91 = vector.broadcast %cst_91 : f32 to vector<1x64xf32>
    %92 = arith.select %89, %90, %91 : vector<1x64xi1>, vector<1x64xf32>
    %93 = arith.index_cast %arg0 : i32 to index
    %c5 = arith.constant 5 : index
    %94 = memref.load %arg1[%93, %c5] : memref<2x8xi32, #tpu.memory_space<smem>>
    %95 = vector.broadcast %94 : i32 to vector<1x64xi32>
    %96 = arith.cmpi eq, %38, %95 : vector<1x64xi32>
    %cst_92 = arith.constant 1.000000e+00 : f32
    %cst_93 = arith.constant 0.000000e+00 : f32
    %97 = vector.broadcast %cst_92 : f32 to vector<1x64xf32>
    %98 = vector.broadcast %cst_93 : f32 to vector<1x64xf32>
    %99 = arith.select %96, %97, %98 : vector<1x64xi1>, vector<1x64xf32>
    %100 = arith.index_cast %arg0 : i32 to index
    %c6 = arith.constant 6 : index
    %101 = memref.load %arg1[%100, %c6] : memref<2x8xi32, #tpu.memory_space<smem>>
    %102 = vector.broadcast %101 : i32 to vector<1x64xi32>
    %103 = arith.cmpi eq, %38, %102 : vector<1x64xi32>
    %cst_94 = arith.constant 1.000000e+00 : f32
    %cst_95 = arith.constant 0.000000e+00 : f32
    %104 = vector.broadcast %cst_94 : f32 to vector<1x64xf32>
    %105 = vector.broadcast %cst_95 : f32 to vector<1x64xf32>
    %106 = arith.select %103, %104, %105 : vector<1x64xi1>, vector<1x64xf32>
    %107 = arith.index_cast %arg0 : i32 to index
    %c7 = arith.constant 7 : index
    %108 = memref.load %arg1[%107, %c7] : memref<2x8xi32, #tpu.memory_space<smem>>
    %109 = vector.broadcast %108 : i32 to vector<1x64xi32>
    %110 = arith.cmpi eq, %38, %109 : vector<1x64xi32>
    %cst_96 = arith.constant 1.000000e+00 : f32
    %cst_97 = arith.constant 0.000000e+00 : f32
    %111 = vector.broadcast %cst_96 : f32 to vector<1x64xf32>
    %112 = vector.broadcast %cst_97 : f32 to vector<1x64xf32>
    %113 = arith.select %110, %111, %112 : vector<1x64xi1>, vector<1x64xf32>
    %114 = tpu.concatenate %64, %71, %78, %85, %92, %99, %106, %113 in 0 : vector<1x64xf32>, vector<1x64xf32>, vector<1x64xf32>, vector<1x64xf32>, vector<1x64xf32>, vector<1x64xf32>, vector<1x64xf32>, vector<1x64xf32> -> vector<8x64xf32>
    %cst_98 = arith.constant dense<0.000000e+00> : vector<8x32xf32>
    %115 = tpu.matmul %114, %0, %cst_98 {dimension_numbers = #tpu.dot_dimension_numbers<[1], [0], [0], [1], [0, 0, 1, 1], [], []>} : vector<8x64xf32>, vector<64x32xf32>, vector<8x32xf32> -> vector<8x32xf32>
    %116 = vector.extract_strided_slice %1 {offsets = [0, 0], sizes = [8, 32], strides = [1, 1]} : vector<64x32xf32> to vector<8x32xf32>
    %117 = arith.addf %115, %116 : vector<8x32xf32>
    %cst_99 = arith.constant dense<0.000000e+00> : vector<8xf32>
    %118 = vector.multi_reduction <add>, %117, %cst_99 [1] : vector<8x32xf32> to vector<8xf32>
    %119 = vector.shape_cast %118 : vector<8xf32> to vector<8x1xf32>
    %cst_100 = arith.constant 3.200000e+01 : f32
    %120 = vector.broadcast %cst_100 : f32 to vector<8x1xf32>
    %121 = arith.divf %119, %120 : vector<8x1xf32>
    %122 = vector.broadcast %121 : vector<8x1xf32> to vector<8x32xf32>
    %123 = arith.subf %117, %122 : vector<8x32xf32>
    %124 = arith.mulf %123, %123 : vector<8x32xf32>
    %cst_101 = arith.constant dense<0.000000e+00> : vector<8xf32>
    %125 = vector.multi_reduction <add>, %124, %cst_101 [1] : vector<8x32xf32> to vector<8xf32>
    %126 = vector.shape_cast %125 : vector<8xf32> to vector<8x1xf32>
    %cst_102 = arith.constant 3.200000e+01 : f32
    %127 = vector.broadcast %cst_102 : f32 to vector<8x1xf32>
    %128 = arith.divf %126, %127 : vector<8x1xf32>
    %129 = vector.broadcast %121 : vector<8x1xf32> to vector<8x32xf32>
    %130 = arith.subf %117, %129 : vector<8x32xf32>
    %cst_103 = arith.constant 9.99999974E-6 : f32
    %131 = vector.broadcast %cst_103 : f32 to vector<8x1xf32>
    %132 = arith.addf %128, %131 : vector<8x1xf32>
    %133 = math.rsqrt %132 : vector<8x1xf32>
    %134 = vector.broadcast %133 : vector<8x1xf32> to vector<8x32xf32>
    %135 = arith.mulf %130, %134 : vector<8x32xf32>
    %136 = vector.broadcast %2 : vector<1x32xf32> to vector<8x32xf32>
    %137 = arith.mulf %135, %136 : vector<8x32xf32>
    %138 = vector.broadcast %3 : vector<1x32xf32> to vector<8x32xf32>
    %139 = arith.addf %137, %138 : vector<8x32xf32>
    %140 = arith.truncf %139 : vector<8x32xf32> to vector<8x32xbf16>
    %141 = arith.truncf %4 : vector<32x96xf32> to vector<32x96xbf16>
    %cst_104 = arith.constant dense<0.000000e+00> : vector<8x96xf32>
    %142 = tpu.matmul %140, %141, %cst_104 {dimension_numbers = #tpu.dot_dimension_numbers<[1], [0], [0], [1], [0, 0, 1, 1], [], []>} : vector<8x32xbf16>, vector<32x96xbf16>, vector<8x96xf32> -> vector<8x96xf32>
    %143 = vector.broadcast %5 : vector<1x96xf32> to vector<8x96xf32>
    %144 = arith.addf %142, %143 : vector<8x96xf32>
    %145 = vector.extract_strided_slice %144 {offsets = [0, 0], sizes = [8, 32], strides = [1, 1]} : vector<8x96xf32> to vector<8x32xf32>
    %146 = vector.extract_strided_slice %144 {offsets = [0, 32], sizes = [8, 32], strides = [1, 1]} : vector<8x96xf32> to vector<8x32xf32>
    %147 = vector.extract_strided_slice %144 {offsets = [0, 64], sizes = [8, 32], strides = [1, 1]} : vector<8x96xf32> to vector<8x32xf32>
    %148 = vector.extract_strided_slice %145 {offsets = [0, 0], sizes = [8, 8], strides = [1, 1]} : vector<8x32xf32> to vector<8x8xf32>
    %149 = vector.extract_strided_slice %145 {offsets = [0, 8], sizes = [8, 8], strides = [1, 1]} : vector<8x32xf32> to vector<8x8xf32>
    %150 = vector.extract_strided_slice %145 {offsets = [0, 16], sizes = [8, 8], strides = [1, 1]} : vector<8x32xf32> to vector<8x8xf32>
    %151 = vector.extract_strided_slice %145 {offsets = [0, 24], sizes = [8, 8], strides = [1, 1]} : vector<8x32xf32> to vector<8x8xf32>
    %152 = vector.shape_cast %148 : vector<8x8xf32> to vector<1x8x8xf32>
    %153 = vector.shape_cast %149 : vector<8x8xf32> to vector<1x8x8xf32>
    %154 = vector.shape_cast %150 : vector<8x8xf32> to vector<1x8x8xf32>
    %155 = vector.shape_cast %151 : vector<8x8xf32> to vector<1x8x8xf32>
    %156 = tpu.concatenate %152, %153, %154, %155 in 0 : vector<1x8x8xf32>, vector<1x8x8xf32>, vector<1x8x8xf32>, vector<1x8x8xf32> -> vector<4x8x8xf32>
    %157 = arith.truncf %156 : vector<4x8x8xf32> to vector<4x8x8xbf16>
    %158 = vector.extract_strided_slice %146 {offsets = [0, 0], sizes = [8, 8], strides = [1, 1]} : vector<8x32xf32> to vector<8x8xf32>
    %159 = vector.extract_strided_slice %146 {offsets = [0, 8], sizes = [8, 8], strides = [1, 1]} : vector<8x32xf32> to vector<8x8xf32>
    %160 = vector.extract_strided_slice %146 {offsets = [0, 16], sizes = [8, 8], strides = [1, 1]} : vector<8x32xf32> to vector<8x8xf32>
    %161 = vector.extract_strided_slice %146 {offsets = [0, 24], sizes = [8, 8], strides = [1, 1]} : vector<8x32xf32> to vector<8x8xf32>
    %162 = vector.shape_cast %158 : vector<8x8xf32> to vector<1x8x8xf32>
    %163 = vector.shape_cast %159 : vector<8x8xf32> to vector<1x8x8xf32>
    %164 = vector.shape_cast %160 : vector<8x8xf32> to vector<1x8x8xf32>
    %165 = vector.shape_cast %161 : vector<8x8xf32> to vector<1x8x8xf32>
    %166 = tpu.concatenate %162, %163, %164, %165 in 0 : vector<1x8x8xf32>, vector<1x8x8xf32>, vector<1x8x8xf32>, vector<1x8x8xf32> -> vector<4x8x8xf32>
    %167 = arith.truncf %166 : vector<4x8x8xf32> to vector<4x8x8xbf16>
    %168 = vector.extract_strided_slice %147 {offsets = [0, 0], sizes = [8, 8], strides = [1, 1]} : vector<8x32xf32> to vector<8x8xf32>
    %169 = vector.extract_strided_slice %147 {offsets = [0, 8], sizes = [8, 8], strides = [1, 1]} : vector<8x32xf32> to vector<8x8xf32>
    %170 = vector.extract_strided_slice %147 {offsets = [0, 16], sizes = [8, 8], strides = [1, 1]} : vector<8x32xf32> to vector<8x8xf32>
    %171 = vector.extract_strided_slice %147 {offsets = [0, 24], sizes = [8, 8], strides = [1, 1]} : vector<8x32xf32> to vector<8x8xf32>
    %172 = vector.shape_cast %168 : vector<8x8xf32> to vector<1x8x8xf32>
    %173 = vector.shape_cast %169 : vector<8x8xf32> to vector<1x8x8xf32>
    %174 = vector.shape_cast %170 : vector<8x8xf32> to vector<1x8x8xf32>
    %175 = vector.shape_cast %171 : vector<8x8xf32> to vector<1x8x8xf32>
    %176 = tpu.concatenate %172, %173, %174, %175 in 0 : vector<1x8x8xf32>, vector<1x8x8xf32>, vector<1x8x8xf32>, vector<1x8x8xf32> -> vector<4x8x8xf32>
    %177 = arith.truncf %176 : vector<4x8x8xf32> to vector<4x8x8xbf16>
    "tpu.trace_start"() <{level = 10 : i32, message = "hqd,hkd->hqk"}> : () -> ()
    %cst_105 = arith.constant dense<0.000000e+00> : vector<4x8x8xf32>
    %178 = tpu.matmul %157, %167, %cst_105 {dimension_numbers = #tpu.dot_dimension_numbers<[2], [2], [1], [1], [0, 0, 0, 1, 1, 1], [0], [0]>} : vector<4x8x8xbf16>, vector<4x8x8xbf16>, vector<4x8x8xf32> -> vector<4x8x8xf32>
    "tpu.trace_stop"() : () -> ()
    %cst_106 = arith.constant 0.353553385 : f32
    %179 = vector.broadcast %cst_106 : f32 to vector<4x8x8xf32>
    %180 = arith.mulf %178, %179 : vector<4x8x8xf32>
    %181 = vector.broadcast %45 : vector<1x1x8xf32> to vector<4x8x8xf32>
    %182 = arith.addf %180, %181 : vector<4x8x8xf32>
    %cst_107 = arith.constant dense<0xFF800000> : vector<4x8xf32>
    %183 = vector.multi_reduction <maximumf>, %182, %cst_107 [2] : vector<4x8x8xf32> to vector<4x8xf32>
    %184 = vector.shape_cast %183 : vector<4x8xf32> to vector<4x8x1xf32>
    %185 = vector.broadcast %184 : vector<4x8x1xf32> to vector<4x8x8xf32>
    %186 = arith.subf %182, %185 : vector<4x8x8xf32>
    %187 = math.exp %186 : vector<4x8x8xf32>
    %cst_108 = arith.constant dense<0.000000e+00> : vector<4x8xf32>
    %188 = vector.multi_reduction <add>, %187, %cst_108 [2] : vector<4x8x8xf32> to vector<4x8xf32>
    %189 = vector.shape_cast %188 : vector<4x8xf32> to vector<4x8x1xf32>
    %190 = tpu.reciprocal %189 {approx = true} : vector<4x8x1xf32> -> vector<4x8x1xf32>
    %191 = vector.broadcast %190 : vector<4x8x1xf32> to vector<4x8x8xf32>
    %192 = arith.mulf %187, %191 : vector<4x8x8xf32>
    %193 = arith.truncf %192 : vector<4x8x8xf32> to vector<4x8x8xbf16>
    "tpu.trace_start"() <{level = 10 : i32, message = "hqk,hkd->hqd"}> : () -> ()
    %cst_109 = arith.constant dense<0.000000e+00> : vector<4x8x8xf32>
    %194 = tpu.matmul %193, %177, %cst_109 {dimension_numbers = #tpu.dot_dimension_numbers<[2], [1], [1], [2], [0, 0, 0, 1, 1, 2], [0], [0]>} : vector<4x8x8xbf16>, vector<4x8x8xbf16>, vector<4x8x8xf32> -> vector<4x8x8xf32>
    "tpu.trace_stop"() : () -> ()
    %195 = vector.extract_strided_slice %194 {offsets = [0, 0, 0], sizes = [1, 8, 8], strides = [1, 1, 1]} : vector<4x8x8xf32> to vector<1x8x8xf32>
    %196 = vector.shape_cast %195 : vector<1x8x8xf32> to vector<8x8xf32>
    %197 = vector.extract_strided_slice %194 {offsets = [1, 0, 0], sizes = [1, 8, 8], strides = [1, 1, 1]} : vector<4x8x8xf32> to vector<1x8x8xf32>
    %198 = vector.shape_cast %197 : vector<1x8x8xf32> to vector<8x8xf32>
    %199 = vector.extract_strided_slice %194 {offsets = [2, 0, 0], sizes = [1, 8, 8], strides = [1, 1, 1]} : vector<4x8x8xf32> to vector<1x8x8xf32>
    %200 = vector.shape_cast %199 : vector<1x8x8xf32> to vector<8x8xf32>
    %201 = vector.extract_strided_slice %194 {offsets = [3, 0, 0], sizes = [1, 8, 8], strides = [1, 1, 1]} : vector<4x8x8xf32> to vector<1x8x8xf32>
    %202 = vector.shape_cast %201 : vector<1x8x8xf32> to vector<8x8xf32>
    %203 = tpu.concatenate %196, %198, %200, %202 in 1 : vector<8x8xf32>, vector<8x8xf32>, vector<8x8xf32>, vector<8x8xf32> -> vector<8x32xf32>
    %204 = arith.truncf %203 : vector<8x32xf32> to vector<8x32xbf16>
    %205 = arith.truncf %6 : vector<32x32xf32> to vector<32x32xbf16>
    %cst_110 = arith.constant dense<0.000000e+00> : vector<8x32xf32>
    %206 = tpu.matmul %204, %205, %cst_110 {dimension_numbers = #tpu.dot_dimension_numbers<[1], [0], [0], [1], [0, 0, 1, 1], [], []>} : vector<8x32xbf16>, vector<32x32xbf16>, vector<8x32xf32> -> vector<8x32xf32>
    %207 = vector.broadcast %7 : vector<1x32xf32> to vector<8x32xf32>
    %208 = arith.addf %206, %207 : vector<8x32xf32>
    %209 = arith.addf %139, %208 : vector<8x32xf32>
    %cst_111 = arith.constant dense<0.000000e+00> : vector<8xf32>
    %210 = vector.multi_reduction <add>, %209, %cst_111 [1] : vector<8x32xf32> to vector<8xf32>
    %211 = vector.shape_cast %210 : vector<8xf32> to vector<8x1xf32>
    %cst_112 = arith.constant 3.200000e+01 : f32
    %212 = vector.broadcast %cst_112 : f32 to vector<8x1xf32>
    %213 = arith.divf %211, %212 : vector<8x1xf32>
    %214 = vector.broadcast %213 : vector<8x1xf32> to vector<8x32xf32>
    %215 = arith.subf %209, %214 : vector<8x32xf32>
    %216 = arith.mulf %215, %215 : vector<8x32xf32>
    %cst_113 = arith.constant dense<0.000000e+00> : vector<8xf32>
    %217 = vector.multi_reduction <add>, %216, %cst_113 [1] : vector<8x32xf32> to vector<8xf32>
    %218 = vector.shape_cast %217 : vector<8xf32> to vector<8x1xf32>
    %cst_114 = arith.constant 3.200000e+01 : f32
    %219 = vector.broadcast %cst_114 : f32 to vector<8x1xf32>
    %220 = arith.divf %218, %219 : vector<8x1xf32>
    %221 = vector.broadcast %213 : vector<8x1xf32> to vector<8x32xf32>
    %222 = arith.subf %209, %221 : vector<8x32xf32>
    %cst_115 = arith.constant 9.99999974E-6 : f32
    %223 = vector.broadcast %cst_115 : f32 to vector<8x1xf32>
    %224 = arith.addf %220, %223 : vector<8x1xf32>
    %225 = math.rsqrt %224 : vector<8x1xf32>
    %226 = vector.broadcast %225 : vector<8x1xf32> to vector<8x32xf32>
    %227 = arith.mulf %222, %226 : vector<8x32xf32>
    %228 = vector.broadcast %8 : vector<1x32xf32> to vector<8x32xf32>
    %229 = arith.mulf %227, %228 : vector<8x32xf32>
    %230 = vector.broadcast %9 : vector<1x32xf32> to vector<8x32xf32>
    %231 = arith.addf %229, %230 : vector<8x32xf32>
    %232 = arith.truncf %231 : vector<8x32xf32> to vector<8x32xbf16>
    %233 = arith.truncf %10 : vector<32x64xf32> to vector<32x64xbf16>
    %cst_116 = arith.constant dense<0.000000e+00> : vector<8x64xf32>
    %234 = tpu.matmul %232, %233, %cst_116 {dimension_numbers = #tpu.dot_dimension_numbers<[1], [0], [0], [1], [0, 0, 1, 1], [], []>} : vector<8x32xbf16>, vector<32x64xbf16>, vector<8x64xf32> -> vector<8x64xf32>
    %235 = vector.broadcast %11 : vector<1x64xf32> to vector<8x64xf32>
    %236 = arith.addf %234, %235 : vector<8x64xf32>
    %cst_117 = arith.constant 0.000000e+00 : f32
    %237 = vector.broadcast %cst_117 : f32 to vector<8x64xf32>
    %238 = arith.maximumf %236, %237 : vector<8x64xf32>
    %239 = arith.truncf %238 : vector<8x64xf32> to vector<8x64xbf16>
    %240 = arith.truncf %12 : vector<64x32xf32> to vector<64x32xbf16>
    %cst_118 = arith.constant dense<0.000000e+00> : vector<8x32xf32>
    %241 = tpu.matmul %239, %240, %cst_118 {dimension_numbers = #tpu.dot_dimension_numbers<[1], [0], [0], [1], [0, 0, 1, 1], [], []>} : vector<8x64xbf16>, vector<64x32xbf16>, vector<8x32xf32> -> vector<8x32xf32>
    %242 = vector.broadcast %13 : vector<1x32xf32> to vector<8x32xf32>
    %243 = arith.addf %241, %242 : vector<8x32xf32>
    %244 = arith.addf %231, %243 : vector<8x32xf32>
    %cst_119 = arith.constant dense<0.000000e+00> : vector<8xf32>
    %245 = vector.multi_reduction <add>, %244, %cst_119 [1] : vector<8x32xf32> to vector<8xf32>
    %246 = vector.shape_cast %245 : vector<8xf32> to vector<8x1xf32>
    %cst_120 = arith.constant 3.200000e+01 : f32
    %247 = vector.broadcast %cst_120 : f32 to vector<8x1xf32>
    %248 = arith.divf %246, %247 : vector<8x1xf32>
    %249 = vector.broadcast %248 : vector<8x1xf32> to vector<8x32xf32>
    %250 = arith.subf %244, %249 : vector<8x32xf32>
    %251 = arith.mulf %250, %250 : vector<8x32xf32>
    %cst_121 = arith.constant dense<0.000000e+00> : vector<8xf32>
    %252 = vector.multi_reduction <add>, %251, %cst_121 [1] : vector<8x32xf32> to vector<8xf32>
    %253 = vector.shape_cast %252 : vector<8xf32> to vector<8x1xf32>
    %cst_122 = arith.constant 3.200000e+01 : f32
    %254 = vector.broadcast %cst_122 : f32 to vector<8x1xf32>
    %255 = arith.divf %253, %254 : vector<8x1xf32>
    %256 = vector.broadcast %248 : vector<8x1xf32> to vector<8x32xf32>
    %257 = arith.subf %244, %256 : vector<8x32xf32>
    %cst_123 = arith.constant 9.99999974E-6 : f32
    %258 = vector.broadcast %cst_123 : f32 to vector<8x1xf32>
    %259 = arith.addf %255, %258 : vector<8x1xf32>
    %260 = math.rsqrt %259 : vector<8x1xf32>
    %261 = vector.broadcast %260 : vector<8x1xf32> to vector<8x32xf32>
    %262 = arith.mulf %257, %261 : vector<8x32xf32>
    %263 = vector.broadcast %14 : vector<1x32xf32> to vector<8x32xf32>
    %264 = arith.mulf %262, %263 : vector<8x32xf32>
    %265 = vector.broadcast %15 : vector<1x32xf32> to vector<8x32xf32>
    %266 = arith.addf %264, %265 : vector<8x32xf32>
    %267 = arith.index_cast %arg0 : i32 to index
    %c0_124 = arith.constant 0 : index
    %268 = memref.load %arg2[%267, %c0_124] : memref<2x8xi32, #tpu.memory_space<smem>>
    %269 = vector.broadcast %268 : i32 to vector<1x64xi32>
    %270 = arith.cmpi eq, %38, %269 : vector<1x64xi32>
    %cst_125 = arith.constant 1.000000e+00 : f32
    %cst_126 = arith.constant 0.000000e+00 : f32
    %271 = vector.broadcast %cst_125 : f32 to vector<1x64xf32>
    %272 = vector.broadcast %cst_126 : f32 to vector<1x64xf32>
    %273 = arith.select %270, %271, %272 : vector<1x64xi1>, vector<1x64xf32>
    %274 = arith.index_cast %arg0 : i32 to index
    %c1_127 = arith.constant 1 : index
    %275 = memref.load %arg2[%274, %c1_127] : memref<2x8xi32, #tpu.memory_space<smem>>
    %276 = vector.broadcast %275 : i32 to vector<1x64xi32>
    %277 = arith.cmpi eq, %38, %276 : vector<1x64xi32>
    %cst_128 = arith.constant 1.000000e+00 : f32
    %cst_129 = arith.constant 0.000000e+00 : f32
    %278 = vector.broadcast %cst_128 : f32 to vector<1x64xf32>
    %279 = vector.broadcast %cst_129 : f32 to vector<1x64xf32>
    %280 = arith.select %277, %278, %279 : vector<1x64xi1>, vector<1x64xf32>
    %281 = arith.index_cast %arg0 : i32 to index
    %c2_130 = arith.constant 2 : index
    %282 = memref.load %arg2[%281, %c2_130] : memref<2x8xi32, #tpu.memory_space<smem>>
    %283 = vector.broadcast %282 : i32 to vector<1x64xi32>
    %284 = arith.cmpi eq, %38, %283 : vector<1x64xi32>
    %cst_131 = arith.constant 1.000000e+00 : f32
    %cst_132 = arith.constant 0.000000e+00 : f32
    %285 = vector.broadcast %cst_131 : f32 to vector<1x64xf32>
    %286 = vector.broadcast %cst_132 : f32 to vector<1x64xf32>
    %287 = arith.select %284, %285, %286 : vector<1x64xi1>, vector<1x64xf32>
    %288 = arith.index_cast %arg0 : i32 to index
    %c3_133 = arith.constant 3 : index
    %289 = memref.load %arg2[%288, %c3_133] : memref<2x8xi32, #tpu.memory_space<smem>>
    %290 = vector.broadcast %289 : i32 to vector<1x64xi32>
    %291 = arith.cmpi eq, %38, %290 : vector<1x64xi32>
    %cst_134 = arith.constant 1.000000e+00 : f32
    %cst_135 = arith.constant 0.000000e+00 : f32
    %292 = vector.broadcast %cst_134 : f32 to vector<1x64xf32>
    %293 = vector.broadcast %cst_135 : f32 to vector<1x64xf32>
    %294 = arith.select %291, %292, %293 : vector<1x64xi1>, vector<1x64xf32>
    %295 = arith.index_cast %arg0 : i32 to index
    %c4_136 = arith.constant 4 : index
    %296 = memref.load %arg2[%295, %c4_136] : memref<2x8xi32, #tpu.memory_space<smem>>
    %297 = vector.broadcast %296 : i32 to vector<1x64xi32>
    %298 = arith.cmpi eq, %38, %297 : vector<1x64xi32>
    %cst_137 = arith.constant 1.000000e+00 : f32
    %cst_138 = arith.constant 0.000000e+00 : f32
    %299 = vector.broadcast %cst_137 : f32 to vector<1x64xf32>
    %300 = vector.broadcast %cst_138 : f32 to vector<1x64xf32>
    %301 = arith.select %298, %299, %300 : vector<1x64xi1>, vector<1x64xf32>
    %302 = arith.index_cast %arg0 : i32 to index
    %c5_139 = arith.constant 5 : index
    %303 = memref.load %arg2[%302, %c5_139] : memref<2x8xi32, #tpu.memory_space<smem>>
    %304 = vector.broadcast %303 : i32 to vector<1x64xi32>
    %305 = arith.cmpi eq, %38, %304 : vector<1x64xi32>
    %cst_140 = arith.constant 1.000000e+00 : f32
    %cst_141 = arith.constant 0.000000e+00 : f32
    %306 = vector.broadcast %cst_140 : f32 to vector<1x64xf32>
    %307 = vector.broadcast %cst_141 : f32 to vector<1x64xf32>
    %308 = arith.select %305, %306, %307 : vector<1x64xi1>, vector<1x64xf32>
    %309 = arith.index_cast %arg0 : i32 to index
    %c6_142 = arith.constant 6 : index
    %310 = memref.load %arg2[%309, %c6_142] : memref<2x8xi32, #tpu.memory_space<smem>>
    %311 = vector.broadcast %310 : i32 to vector<1x64xi32>
    %312 = arith.cmpi eq, %38, %311 : vector<1x64xi32>
    %cst_143 = arith.constant 1.000000e+00 : f32
    %cst_144 = arith.constant 0.000000e+00 : f32
    %313 = vector.broadcast %cst_143 : f32 to vector<1x64xf32>
    %314 = vector.broadcast %cst_144 : f32 to vector<1x64xf32>
    %315 = arith.select %312, %313, %314 : vector<1x64xi1>, vector<1x64xf32>
    %316 = arith.index_cast %arg0 : i32 to index
    %c7_145 = arith.constant 7 : index
    %317 = memref.load %arg2[%316, %c7_145] : memref<2x8xi32, #tpu.memory_space<smem>>
    %318 = vector.broadcast %317 : i32 to vector<1x64xi32>
    %319 = arith.cmpi eq, %38, %318 : vector<1x64xi32>
    %cst_146 = arith.constant 1.000000e+00 : f32
    %cst_147 = arith.constant 0.000000e+00 : f32
    %320 = vector.broadcast %cst_146 : f32 to vector<1x64xf32>
    %321 = vector.broadcast %cst_147 : f32 to vector<1x64xf32>
    %322 = arith.select %319, %320, %321 : vector<1x64xi1>, vector<1x64xf32>
    %323 = tpu.concatenate %273, %280, %287, %294, %301, %308, %315, %322 in 0 : vector<1x64xf32>, vector<1x64xf32>, vector<1x64xf32>, vector<1x64xf32>, vector<1x64xf32>, vector<1x64xf32>, vector<1x64xf32>, vector<1x64xf32> -> vector<8x64xf32>
    %cst_148 = arith.constant dense<0.000000e+00> : vector<8x32xf32>
    %324 = tpu.matmul %323, %0, %cst_148 {dimension_numbers = #tpu.dot_dimension_numbers<[1], [0], [0], [1], [0, 0, 1, 1], [], []>} : vector<8x64xf32>, vector<64x32xf32>, vector<8x32xf32> -> vector<8x32xf32>
    %325 = vector.extract_strided_slice %1 {offsets = [0, 0], sizes = [8, 32], strides = [1, 1]} : vector<64x32xf32> to vector<8x32xf32>
    %326 = arith.addf %324, %325 : vector<8x32xf32>
    %cst_149 = arith.constant dense<0.000000e+00> : vector<8xf32>
    %327 = vector.multi_reduction <add>, %326, %cst_149 [1] : vector<8x32xf32> to vector<8xf32>
    %328 = vector.shape_cast %327 : vector<8xf32> to vector<8x1xf32>
    %cst_150 = arith.constant 3.200000e+01 : f32
    %329 = vector.broadcast %cst_150 : f32 to vector<8x1xf32>
    %330 = arith.divf %328, %329 : vector<8x1xf32>
    %331 = vector.broadcast %330 : vector<8x1xf32> to vector<8x32xf32>
    %332 = arith.subf %326, %331 : vector<8x32xf32>
    %333 = arith.mulf %332, %332 : vector<8x32xf32>
    %cst_151 = arith.constant dense<0.000000e+00> : vector<8xf32>
    %334 = vector.multi_reduction <add>, %333, %cst_151 [1] : vector<8x32xf32> to vector<8xf32>
    %335 = vector.shape_cast %334 : vector<8xf32> to vector<8x1xf32>
    %cst_152 = arith.constant 3.200000e+01 : f32
    %336 = vector.broadcast %cst_152 : f32 to vector<8x1xf32>
    %337 = arith.divf %335, %336 : vector<8x1xf32>
    %338 = vector.broadcast %330 : vector<8x1xf32> to vector<8x32xf32>
    %339 = arith.subf %326, %338 : vector<8x32xf32>
    %cst_153 = arith.constant 9.99999974E-6 : f32
    %340 = vector.broadcast %cst_153 : f32 to vector<8x1xf32>
    %341 = arith.addf %337, %340 : vector<8x1xf32>
    %342 = math.rsqrt %341 : vector<8x1xf32>
    %343 = vector.broadcast %342 : vector<8x1xf32> to vector<8x32xf32>
    %344 = arith.mulf %339, %343 : vector<8x32xf32>
    %345 = vector.broadcast %2 : vector<1x32xf32> to vector<8x32xf32>
    %346 = arith.mulf %344, %345 : vector<8x32xf32>
    %347 = vector.broadcast %3 : vector<1x32xf32> to vector<8x32xf32>
    %348 = arith.addf %346, %347 : vector<8x32xf32>
    %349 = arith.truncf %348 : vector<8x32xf32> to vector<8x32xbf16>
    %350 = arith.truncf %16 : vector<32x96xf32> to vector<32x96xbf16>
    %cst_154 = arith.constant dense<0.000000e+00> : vector<8x96xf32>
    %351 = tpu.matmul %349, %350, %cst_154 {dimension_numbers = #tpu.dot_dimension_numbers<[1], [0], [0], [1], [0, 0, 1, 1], [], []>} : vector<8x32xbf16>, vector<32x96xbf16>, vector<8x96xf32> -> vector<8x96xf32>
    %352 = vector.broadcast %17 : vector<1x96xf32> to vector<8x96xf32>
    %353 = arith.addf %351, %352 : vector<8x96xf32>
    %354 = vector.extract_strided_slice %353 {offsets = [0, 0], sizes = [8, 32], strides = [1, 1]} : vector<8x96xf32> to vector<8x32xf32>
    %355 = vector.extract_strided_slice %353 {offsets = [0, 32], sizes = [8, 32], strides = [1, 1]} : vector<8x96xf32> to vector<8x32xf32>
    %356 = vector.extract_strided_slice %353 {offsets = [0, 64], sizes = [8, 32], strides = [1, 1]} : vector<8x96xf32> to vector<8x32xf32>
    %357 = vector.extract_strided_slice %354 {offsets = [0, 0], sizes = [8, 8], strides = [1, 1]} : vector<8x32xf32> to vector<8x8xf32>
    %358 = vector.extract_strided_slice %354 {offsets = [0, 8], sizes = [8, 8], strides = [1, 1]} : vector<8x32xf32> to vector<8x8xf32>
    %359 = vector.extract_strided_slice %354 {offsets = [0, 16], sizes = [8, 8], strides = [1, 1]} : vector<8x32xf32> to vector<8x8xf32>
    %360 = vector.extract_strided_slice %354 {offsets = [0, 24], sizes = [8, 8], strides = [1, 1]} : vector<8x32xf32> to vector<8x8xf32>
    %361 = vector.shape_cast %357 : vector<8x8xf32> to vector<1x8x8xf32>
    %362 = vector.shape_cast %358 : vector<8x8xf32> to vector<1x8x8xf32>
    %363 = vector.shape_cast %359 : vector<8x8xf32> to vector<1x8x8xf32>
    %364 = vector.shape_cast %360 : vector<8x8xf32> to vector<1x8x8xf32>
    %365 = tpu.concatenate %361, %362, %363, %364 in 0 : vector<1x8x8xf32>, vector<1x8x8xf32>, vector<1x8x8xf32>, vector<1x8x8xf32> -> vector<4x8x8xf32>
    %366 = arith.truncf %365 : vector<4x8x8xf32> to vector<4x8x8xbf16>
    %367 = vector.extract_strided_slice %355 {offsets = [0, 0], sizes = [8, 8], strides = [1, 1]} : vector<8x32xf32> to vector<8x8xf32>
    %368 = vector.extract_strided_slice %355 {offsets = [0, 8], sizes = [8, 8], strides = [1, 1]} : vector<8x32xf32> to vector<8x8xf32>
    %369 = vector.extract_strided_slice %355 {offsets = [0, 16], sizes = [8, 8], strides = [1, 1]} : vector<8x32xf32> to vector<8x8xf32>
    %370 = vector.extract_strided_slice %355 {offsets = [0, 24], sizes = [8, 8], strides = [1, 1]} : vector<8x32xf32> to vector<8x8xf32>
    %371 = vector.shape_cast %367 : vector<8x8xf32> to vector<1x8x8xf32>
    %372 = vector.shape_cast %368 : vector<8x8xf32> to vector<1x8x8xf32>
    %373 = vector.shape_cast %369 : vector<8x8xf32> to vector<1x8x8xf32>
    %374 = vector.shape_cast %370 : vector<8x8xf32> to vector<1x8x8xf32>
    %375 = tpu.concatenate %371, %372, %373, %374 in 0 : vector<1x8x8xf32>, vector<1x8x8xf32>, vector<1x8x8xf32>, vector<1x8x8xf32> -> vector<4x8x8xf32>
    %376 = arith.truncf %375 : vector<4x8x8xf32> to vector<4x8x8xbf16>
    %377 = vector.extract_strided_slice %356 {offsets = [0, 0], sizes = [8, 8], strides = [1, 1]} : vector<8x32xf32> to vector<8x8xf32>
    %378 = vector.extract_strided_slice %356 {offsets = [0, 8], sizes = [8, 8], strides = [1, 1]} : vector<8x32xf32> to vector<8x8xf32>
    %379 = vector.extract_strided_slice %356 {offsets = [0, 16], sizes = [8, 8], strides = [1, 1]} : vector<8x32xf32> to vector<8x8xf32>
    %380 = vector.extract_strided_slice %356 {offsets = [0, 24], sizes = [8, 8], strides = [1, 1]} : vector<8x32xf32> to vector<8x8xf32>
    %381 = vector.shape_cast %377 : vector<8x8xf32> to vector<1x8x8xf32>
    %382 = vector.shape_cast %378 : vector<8x8xf32> to vector<1x8x8xf32>
    %383 = vector.shape_cast %379 : vector<8x8xf32> to vector<1x8x8xf32>
    %384 = vector.shape_cast %380 : vector<8x8xf32> to vector<1x8x8xf32>
    %385 = tpu.concatenate %381, %382, %383, %384 in 0 : vector<1x8x8xf32>, vector<1x8x8xf32>, vector<1x8x8xf32>, vector<1x8x8xf32> -> vector<4x8x8xf32>
    %386 = arith.truncf %385 : vector<4x8x8xf32> to vector<4x8x8xbf16>
    "tpu.trace_start"() <{level = 10 : i32, message = "hqd,hkd->hqk"}> : () -> ()
    %cst_155 = arith.constant dense<0.000000e+00> : vector<4x8x8xf32>
    %387 = tpu.matmul %366, %376, %cst_155 {dimension_numbers = #tpu.dot_dimension_numbers<[2], [2], [1], [1], [0, 0, 0, 1, 1, 1], [0], [0]>} : vector<4x8x8xbf16>, vector<4x8x8xbf16>, vector<4x8x8xf32> -> vector<4x8x8xf32>
    "tpu.trace_stop"() : () -> ()
    %cst_156 = arith.constant 0.353553385 : f32
    %388 = vector.broadcast %cst_156 : f32 to vector<4x8x8xf32>
    %389 = arith.mulf %387, %388 : vector<4x8x8xf32>
    %390 = vector.broadcast %57 : vector<1x8x8xf32> to vector<4x8x8xf32>
    %391 = arith.addf %389, %390 : vector<4x8x8xf32>
    %cst_157 = arith.constant dense<0xFF800000> : vector<4x8xf32>
    %392 = vector.multi_reduction <maximumf>, %391, %cst_157 [2] : vector<4x8x8xf32> to vector<4x8xf32>
    %393 = vector.shape_cast %392 : vector<4x8xf32> to vector<4x8x1xf32>
    %394 = vector.broadcast %393 : vector<4x8x1xf32> to vector<4x8x8xf32>
    %395 = arith.subf %391, %394 : vector<4x8x8xf32>
    %396 = math.exp %395 : vector<4x8x8xf32>
    %cst_158 = arith.constant dense<0.000000e+00> : vector<4x8xf32>
    %397 = vector.multi_reduction <add>, %396, %cst_158 [2] : vector<4x8x8xf32> to vector<4x8xf32>
    %398 = vector.shape_cast %397 : vector<4x8xf32> to vector<4x8x1xf32>
    %399 = tpu.reciprocal %398 {approx = true} : vector<4x8x1xf32> -> vector<4x8x1xf32>
    %400 = vector.broadcast %399 : vector<4x8x1xf32> to vector<4x8x8xf32>
    %401 = arith.mulf %396, %400 : vector<4x8x8xf32>
    %402 = arith.truncf %401 : vector<4x8x8xf32> to vector<4x8x8xbf16>
    "tpu.trace_start"() <{level = 10 : i32, message = "hqk,hkd->hqd"}> : () -> ()
    %cst_159 = arith.constant dense<0.000000e+00> : vector<4x8x8xf32>
    %403 = tpu.matmul %402, %386, %cst_159 {dimension_numbers = #tpu.dot_dimension_numbers<[2], [1], [1], [2], [0, 0, 0, 1, 1, 2], [0], [0]>} : vector<4x8x8xbf16>, vector<4x8x8xbf16>, vector<4x8x8xf32> -> vector<4x8x8xf32>
    "tpu.trace_stop"() : () -> ()
    %404 = vector.extract_strided_slice %403 {offsets = [0, 0, 0], sizes = [1, 8, 8], strides = [1, 1, 1]} : vector<4x8x8xf32> to vector<1x8x8xf32>
    %405 = vector.shape_cast %404 : vector<1x8x8xf32> to vector<8x8xf32>
    %406 = vector.extract_strided_slice %403 {offsets = [1, 0, 0], sizes = [1, 8, 8], strides = [1, 1, 1]} : vector<4x8x8xf32> to vector<1x8x8xf32>
    %407 = vector.shape_cast %406 : vector<1x8x8xf32> to vector<8x8xf32>
    %408 = vector.extract_strided_slice %403 {offsets = [2, 0, 0], sizes = [1, 8, 8], strides = [1, 1, 1]} : vector<4x8x8xf32> to vector<1x8x8xf32>
    %409 = vector.shape_cast %408 : vector<1x8x8xf32> to vector<8x8xf32>
    %410 = vector.extract_strided_slice %403 {offsets = [3, 0, 0], sizes = [1, 8, 8], strides = [1, 1, 1]} : vector<4x8x8xf32> to vector<1x8x8xf32>
    %411 = vector.shape_cast %410 : vector<1x8x8xf32> to vector<8x8xf32>
    %412 = tpu.concatenate %405, %407, %409, %411 in 1 : vector<8x8xf32>, vector<8x8xf32>, vector<8x8xf32>, vector<8x8xf32> -> vector<8x32xf32>
    %413 = arith.truncf %412 : vector<8x32xf32> to vector<8x32xbf16>
    %414 = arith.truncf %18 : vector<32x32xf32> to vector<32x32xbf16>
    %cst_160 = arith.constant dense<0.000000e+00> : vector<8x32xf32>
    %415 = tpu.matmul %413, %414, %cst_160 {dimension_numbers = #tpu.dot_dimension_numbers<[1], [0], [0], [1], [0, 0, 1, 1], [], []>} : vector<8x32xbf16>, vector<32x32xbf16>, vector<8x32xf32> -> vector<8x32xf32>
    %416 = vector.broadcast %19 : vector<1x32xf32> to vector<8x32xf32>
    %417 = arith.addf %415, %416 : vector<8x32xf32>
    %418 = arith.addf %348, %417 : vector<8x32xf32>
    %cst_161 = arith.constant dense<0.000000e+00> : vector<8xf32>
    %419 = vector.multi_reduction <add>, %418, %cst_161 [1] : vector<8x32xf32> to vector<8xf32>
    %420 = vector.shape_cast %419 : vector<8xf32> to vector<8x1xf32>
    %cst_162 = arith.constant 3.200000e+01 : f32
    %421 = vector.broadcast %cst_162 : f32 to vector<8x1xf32>
    %422 = arith.divf %420, %421 : vector<8x1xf32>
    %423 = vector.broadcast %422 : vector<8x1xf32> to vector<8x32xf32>
    %424 = arith.subf %418, %423 : vector<8x32xf32>
    %425 = arith.mulf %424, %424 : vector<8x32xf32>
    %cst_163 = arith.constant dense<0.000000e+00> : vector<8xf32>
    %426 = vector.multi_reduction <add>, %425, %cst_163 [1] : vector<8x32xf32> to vector<8xf32>
    %427 = vector.shape_cast %426 : vector<8xf32> to vector<8x1xf32>
    %cst_164 = arith.constant 3.200000e+01 : f32
    %428 = vector.broadcast %cst_164 : f32 to vector<8x1xf32>
    %429 = arith.divf %427, %428 : vector<8x1xf32>
    %430 = vector.broadcast %422 : vector<8x1xf32> to vector<8x32xf32>
    %431 = arith.subf %418, %430 : vector<8x32xf32>
    %cst_165 = arith.constant 9.99999974E-6 : f32
    %432 = vector.broadcast %cst_165 : f32 to vector<8x1xf32>
    %433 = arith.addf %429, %432 : vector<8x1xf32>
    %434 = math.rsqrt %433 : vector<8x1xf32>
    %435 = vector.broadcast %434 : vector<8x1xf32> to vector<8x32xf32>
    %436 = arith.mulf %431, %435 : vector<8x32xf32>
    %437 = vector.broadcast %20 : vector<1x32xf32> to vector<8x32xf32>
    %438 = arith.mulf %436, %437 : vector<8x32xf32>
    %439 = vector.broadcast %21 : vector<1x32xf32> to vector<8x32xf32>
    %440 = arith.addf %438, %439 : vector<8x32xf32>
    %441 = arith.truncf %440 : vector<8x32xf32> to vector<8x32xbf16>
    %442 = arith.truncf %22 : vector<32x32xf32> to vector<32x32xbf16>
    %cst_166 = arith.constant dense<0.000000e+00> : vector<8x32xf32>
    %443 = tpu.matmul %441, %442, %cst_166 {dimension_numbers = #tpu.dot_dimension_numbers<[1], [0], [0], [1], [0, 0, 1, 1], [], []>} : vector<8x32xbf16>, vector<32x32xbf16>, vector<8x32xf32> -> vector<8x32xf32>
    %444 = vector.broadcast %23 : vector<1x32xf32> to vector<8x32xf32>
    %445 = arith.addf %443, %444 : vector<8x32xf32>
    %446 = arith.truncf %266 : vector<8x32xf32> to vector<8x32xbf16>
    %447 = arith.truncf %24 : vector<32x64xf32> to vector<32x64xbf16>
    %cst_167 = arith.constant dense<0.000000e+00> : vector<8x64xf32>
    %448 = tpu.matmul %446, %447, %cst_167 {dimension_numbers = #tpu.dot_dimension_numbers<[1], [0], [0], [1], [0, 0, 1, 1], [], []>} : vector<8x32xbf16>, vector<32x64xbf16>, vector<8x64xf32> -> vector<8x64xf32>
    %449 = vector.broadcast %25 : vector<1x64xf32> to vector<8x64xf32>
    %450 = arith.addf %448, %449 : vector<8x64xf32>
    %451 = vector.extract_strided_slice %450 {offsets = [0, 0], sizes = [8, 32], strides = [1, 1]} : vector<8x64xf32> to vector<8x32xf32>
    %452 = vector.extract_strided_slice %450 {offsets = [0, 32], sizes = [8, 32], strides = [1, 1]} : vector<8x64xf32> to vector<8x32xf32>
    %453 = vector.extract_strided_slice %445 {offsets = [0, 0], sizes = [8, 8], strides = [1, 1]} : vector<8x32xf32> to vector<8x8xf32>
    %454 = vector.extract_strided_slice %445 {offsets = [0, 8], sizes = [8, 8], strides = [1, 1]} : vector<8x32xf32> to vector<8x8xf32>
    %455 = vector.extract_strided_slice %445 {offsets = [0, 16], sizes = [8, 8], strides = [1, 1]} : vector<8x32xf32> to vector<8x8xf32>
    %456 = vector.extract_strided_slice %445 {offsets = [0, 24], sizes = [8, 8], strides = [1, 1]} : vector<8x32xf32> to vector<8x8xf32>
    %457 = vector.shape_cast %453 : vector<8x8xf32> to vector<1x8x8xf32>
    %458 = vector.shape_cast %454 : vector<8x8xf32> to vector<1x8x8xf32>
    %459 = vector.shape_cast %455 : vector<8x8xf32> to vector<1x8x8xf32>
    %460 = vector.shape_cast %456 : vector<8x8xf32> to vector<1x8x8xf32>
    %461 = tpu.concatenate %457, %458, %459, %460 in 0 : vector<1x8x8xf32>, vector<1x8x8xf32>, vector<1x8x8xf32>, vector<1x8x8xf32> -> vector<4x8x8xf32>
    %462 = arith.truncf %461 : vector<4x8x8xf32> to vector<4x8x8xbf16>
    %463 = vector.extract_strided_slice %451 {offsets = [0, 0], sizes = [8, 8], strides = [1, 1]} : vector<8x32xf32> to vector<8x8xf32>
    %464 = vector.extract_strided_slice %451 {offsets = [0, 8], sizes = [8, 8], strides = [1, 1]} : vector<8x32xf32> to vector<8x8xf32>
    %465 = vector.extract_strided_slice %451 {offsets = [0, 16], sizes = [8, 8], strides = [1, 1]} : vector<8x32xf32> to vector<8x8xf32>
    %466 = vector.extract_strided_slice %451 {offsets = [0, 24], sizes = [8, 8], strides = [1, 1]} : vector<8x32xf32> to vector<8x8xf32>
    %467 = vector.shape_cast %463 : vector<8x8xf32> to vector<1x8x8xf32>
    %468 = vector.shape_cast %464 : vector<8x8xf32> to vector<1x8x8xf32>
    %469 = vector.shape_cast %465 : vector<8x8xf32> to vector<1x8x8xf32>
    %470 = vector.shape_cast %466 : vector<8x8xf32> to vector<1x8x8xf32>
    %471 = tpu.concatenate %467, %468, %469, %470 in 0 : vector<1x8x8xf32>, vector<1x8x8xf32>, vector<1x8x8xf32>, vector<1x8x8xf32> -> vector<4x8x8xf32>
    %472 = arith.truncf %471 : vector<4x8x8xf32> to vector<4x8x8xbf16>
    %473 = vector.extract_strided_slice %452 {offsets = [0, 0], sizes = [8, 8], strides = [1, 1]} : vector<8x32xf32> to vector<8x8xf32>
    %474 = vector.extract_strided_slice %452 {offsets = [0, 8], sizes = [8, 8], strides = [1, 1]} : vector<8x32xf32> to vector<8x8xf32>
    %475 = vector.extract_strided_slice %452 {offsets = [0, 16], sizes = [8, 8], strides = [1, 1]} : vector<8x32xf32> to vector<8x8xf32>
    %476 = vector.extract_strided_slice %452 {offsets = [0, 24], sizes = [8, 8], strides = [1, 1]} : vector<8x32xf32> to vector<8x8xf32>
    %477 = vector.shape_cast %473 : vector<8x8xf32> to vector<1x8x8xf32>
    %478 = vector.shape_cast %474 : vector<8x8xf32> to vector<1x8x8xf32>
    %479 = vector.shape_cast %475 : vector<8x8xf32> to vector<1x8x8xf32>
    %480 = vector.shape_cast %476 : vector<8x8xf32> to vector<1x8x8xf32>
    %481 = tpu.concatenate %477, %478, %479, %480 in 0 : vector<1x8x8xf32>, vector<1x8x8xf32>, vector<1x8x8xf32>, vector<1x8x8xf32> -> vector<4x8x8xf32>
    %482 = arith.truncf %481 : vector<4x8x8xf32> to vector<4x8x8xbf16>
    "tpu.trace_start"() <{level = 10 : i32, message = "hqd,hkd->hqk"}> : () -> ()
    %cst_168 = arith.constant dense<0.000000e+00> : vector<4x8x8xf32>
    %483 = tpu.matmul %462, %472, %cst_168 {dimension_numbers = #tpu.dot_dimension_numbers<[2], [2], [1], [1], [0, 0, 0, 1, 1, 1], [0], [0]>} : vector<4x8x8xbf16>, vector<4x8x8xbf16>, vector<4x8x8xf32> -> vector<4x8x8xf32>
    "tpu.trace_stop"() : () -> ()
    %cst_169 = arith.constant 0.353553385 : f32
    %484 = vector.broadcast %cst_169 : f32 to vector<4x8x8xf32>
    %485 = arith.mulf %483, %484 : vector<4x8x8xf32>
    %486 = vector.broadcast %50 : vector<1x1x8xf32> to vector<4x8x8xf32>
    %487 = arith.addf %485, %486 : vector<4x8x8xf32>
    %cst_170 = arith.constant dense<0xFF800000> : vector<4x8xf32>
    %488 = vector.multi_reduction <maximumf>, %487, %cst_170 [2] : vector<4x8x8xf32> to vector<4x8xf32>
    %489 = vector.shape_cast %488 : vector<4x8xf32> to vector<4x8x1xf32>
    %490 = vector.broadcast %489 : vector<4x8x1xf32> to vector<4x8x8xf32>
    %491 = arith.subf %487, %490 : vector<4x8x8xf32>
    %492 = math.exp %491 : vector<4x8x8xf32>
    %cst_171 = arith.constant dense<0.000000e+00> : vector<4x8xf32>
    %493 = vector.multi_reduction <add>, %492, %cst_171 [2] : vector<4x8x8xf32> to vector<4x8xf32>
    %494 = vector.shape_cast %493 : vector<4x8xf32> to vector<4x8x1xf32>
    %495 = tpu.reciprocal %494 {approx = true} : vector<4x8x1xf32> -> vector<4x8x1xf32>
    %496 = vector.broadcast %495 : vector<4x8x1xf32> to vector<4x8x8xf32>
    %497 = arith.mulf %492, %496 : vector<4x8x8xf32>
    %498 = arith.truncf %497 : vector<4x8x8xf32> to vector<4x8x8xbf16>
    "tpu.trace_start"() <{level = 10 : i32, message = "hqk,hkd->hqd"}> : () -> ()
    %cst_172 = arith.constant dense<0.000000e+00> : vector<4x8x8xf32>
    %499 = tpu.matmul %498, %482, %cst_172 {dimension_numbers = #tpu.dot_dimension_numbers<[2], [1], [1], [2], [0, 0, 0, 1, 1, 2], [0], [0]>} : vector<4x8x8xbf16>, vector<4x8x8xbf16>, vector<4x8x8xf32> -> vector<4x8x8xf32>
    "tpu.trace_stop"() : () -> ()
    %500 = vector.extract_strided_slice %499 {offsets = [0, 0, 0], sizes = [1, 8, 8], strides = [1, 1, 1]} : vector<4x8x8xf32> to vector<1x8x8xf32>
    %501 = vector.shape_cast %500 : vector<1x8x8xf32> to vector<8x8xf32>
    %502 = vector.extract_strided_slice %499 {offsets = [1, 0, 0], sizes = [1, 8, 8], strides = [1, 1, 1]} : vector<4x8x8xf32> to vector<1x8x8xf32>
    %503 = vector.shape_cast %502 : vector<1x8x8xf32> to vector<8x8xf32>
    %504 = vector.extract_strided_slice %499 {offsets = [2, 0, 0], sizes = [1, 8, 8], strides = [1, 1, 1]} : vector<4x8x8xf32> to vector<1x8x8xf32>
    %505 = vector.shape_cast %504 : vector<1x8x8xf32> to vector<8x8xf32>
    %506 = vector.extract_strided_slice %499 {offsets = [3, 0, 0], sizes = [1, 8, 8], strides = [1, 1, 1]} : vector<4x8x8xf32> to vector<1x8x8xf32>
    %507 = vector.shape_cast %506 : vector<1x8x8xf32> to vector<8x8xf32>
    %508 = tpu.concatenate %501, %503, %505, %507 in 1 : vector<8x8xf32>, vector<8x8xf32>, vector<8x8xf32>, vector<8x8xf32> -> vector<8x32xf32>
    %509 = arith.truncf %508 : vector<8x32xf32> to vector<8x32xbf16>
    %510 = arith.truncf %26 : vector<32x32xf32> to vector<32x32xbf16>
    %cst_173 = arith.constant dense<0.000000e+00> : vector<8x32xf32>
    %511 = tpu.matmul %509, %510, %cst_173 {dimension_numbers = #tpu.dot_dimension_numbers<[1], [0], [0], [1], [0, 0, 1, 1], [], []>} : vector<8x32xbf16>, vector<32x32xbf16>, vector<8x32xf32> -> vector<8x32xf32>
    %512 = vector.broadcast %27 : vector<1x32xf32> to vector<8x32xf32>
    %513 = arith.addf %511, %512 : vector<8x32xf32>
    %514 = arith.addf %440, %513 : vector<8x32xf32>
    %cst_174 = arith.constant dense<0.000000e+00> : vector<8xf32>
    %515 = vector.multi_reduction <add>, %514, %cst_174 [1] : vector<8x32xf32> to vector<8xf32>
    %516 = vector.shape_cast %515 : vector<8xf32> to vector<8x1xf32>
    %cst_175 = arith.constant 3.200000e+01 : f32
    %517 = vector.broadcast %cst_175 : f32 to vector<8x1xf32>
    %518 = arith.divf %516, %517 : vector<8x1xf32>
    %519 = vector.broadcast %518 : vector<8x1xf32> to vector<8x32xf32>
    %520 = arith.subf %514, %519 : vector<8x32xf32>
    %521 = arith.mulf %520, %520 : vector<8x32xf32>
    %cst_176 = arith.constant dense<0.000000e+00> : vector<8xf32>
    %522 = vector.multi_reduction <add>, %521, %cst_176 [1] : vector<8x32xf32> to vector<8xf32>
    %523 = vector.shape_cast %522 : vector<8xf32> to vector<8x1xf32>
    %cst_177 = arith.constant 3.200000e+01 : f32
    %524 = vector.broadcast %cst_177 : f32 to vector<8x1xf32>
    %525 = arith.divf %523, %524 : vector<8x1xf32>
    %526 = vector.broadcast %518 : vector<8x1xf32> to vector<8x32xf32>
    %527 = arith.subf %514, %526 : vector<8x32xf32>
    %cst_178 = arith.constant 9.99999974E-6 : f32
    %528 = vector.broadcast %cst_178 : f32 to vector<8x1xf32>
    %529 = arith.addf %525, %528 : vector<8x1xf32>
    %530 = math.rsqrt %529 : vector<8x1xf32>
    %531 = vector.broadcast %530 : vector<8x1xf32> to vector<8x32xf32>
    %532 = arith.mulf %527, %531 : vector<8x32xf32>
    %533 = vector.broadcast %28 : vector<1x32xf32> to vector<8x32xf32>
    %534 = arith.mulf %532, %533 : vector<8x32xf32>
    %535 = vector.broadcast %29 : vector<1x32xf32> to vector<8x32xf32>
    %536 = arith.addf %534, %535 : vector<8x32xf32>
    %537 = arith.truncf %536 : vector<8x32xf32> to vector<8x32xbf16>
    %538 = arith.truncf %30 : vector<32x64xf32> to vector<32x64xbf16>
    %cst_179 = arith.constant dense<0.000000e+00> : vector<8x64xf32>
    %539 = tpu.matmul %537, %538, %cst_179 {dimension_numbers = #tpu.dot_dimension_numbers<[1], [0], [0], [1], [0, 0, 1, 1], [], []>} : vector<8x32xbf16>, vector<32x64xbf16>, vector<8x64xf32> -> vector<8x64xf32>
    %540 = vector.broadcast %31 : vector<1x64xf32> to vector<8x64xf32>
    %541 = arith.addf %539, %540 : vector<8x64xf32>
    %cst_180 = arith.constant 0.000000e+00 : f32
    %542 = vector.broadcast %cst_180 : f32 to vector<8x64xf32>
    %543 = arith.maximumf %541, %542 : vector<8x64xf32>
    %544 = arith.truncf %543 : vector<8x64xf32> to vector<8x64xbf16>
    %545 = arith.truncf %32 : vector<64x32xf32> to vector<64x32xbf16>
    %cst_181 = arith.constant dense<0.000000e+00> : vector<8x32xf32>
    %546 = tpu.matmul %544, %545, %cst_181 {dimension_numbers = #tpu.dot_dimension_numbers<[1], [0], [0], [1], [0, 0, 1, 1], [], []>} : vector<8x64xbf16>, vector<64x32xbf16>, vector<8x32xf32> -> vector<8x32xf32>
    %547 = vector.broadcast %33 : vector<1x32xf32> to vector<8x32xf32>
    %548 = arith.addf %546, %547 : vector<8x32xf32>
    %549 = arith.addf %536, %548 : vector<8x32xf32>
    %cst_182 = arith.constant dense<0.000000e+00> : vector<8xf32>
    %550 = vector.multi_reduction <add>, %549, %cst_182 [1] : vector<8x32xf32> to vector<8xf32>
    %551 = vector.shape_cast %550 : vector<8xf32> to vector<8x1xf32>
    %cst_183 = arith.constant 3.200000e+01 : f32
    %552 = vector.broadcast %cst_183 : f32 to vector<8x1xf32>
    %553 = arith.divf %551, %552 : vector<8x1xf32>
    %554 = vector.broadcast %553 : vector<8x1xf32> to vector<8x32xf32>
    %555 = arith.subf %549, %554 : vector<8x32xf32>
    %556 = arith.mulf %555, %555 : vector<8x32xf32>
    %cst_184 = arith.constant dense<0.000000e+00> : vector<8xf32>
    %557 = vector.multi_reduction <add>, %556, %cst_184 [1] : vector<8x32xf32> to vector<8xf32>
    %558 = vector.shape_cast %557 : vector<8xf32> to vector<8x1xf32>
    %cst_185 = arith.constant 3.200000e+01 : f32
    %559 = vector.broadcast %cst_185 : f32 to vector<8x1xf32>
    %560 = arith.divf %558, %559 : vector<8x1xf32>
    %561 = vector.broadcast %553 : vector<8x1xf32> to vector<8x32xf32>
    %562 = arith.subf %549, %561 : vector<8x32xf32>
    %cst_186 = arith.constant 9.99999974E-6 : f32
    %563 = vector.broadcast %cst_186 : f32 to vector<8x1xf32>
    %564 = arith.addf %560, %563 : vector<8x1xf32>
    %565 = math.rsqrt %564 : vector<8x1xf32>
    %566 = vector.broadcast %565 : vector<8x1xf32> to vector<8x32xf32>
    %567 = arith.mulf %562, %566 : vector<8x32xf32>
    %568 = vector.broadcast %34 : vector<1x32xf32> to vector<8x32xf32>
    %569 = arith.mulf %567, %568 : vector<8x32xf32>
    %570 = vector.broadcast %35 : vector<1x32xf32> to vector<8x32xf32>
    %571 = arith.addf %569, %570 : vector<8x32xf32>
    %572 = arith.truncf %571 : vector<8x32xf32> to vector<8x32xbf16>
    %573 = arith.truncf %36 : vector<32x32xf32> to vector<32x32xbf16>
    %cst_187 = arith.constant dense<0.000000e+00> : vector<8x32xf32>
    %574 = tpu.matmul %572, %573, %cst_187 {dimension_numbers = #tpu.dot_dimension_numbers<[1], [0], [0], [1], [0, 0, 1, 1], [], []>} : vector<8x32xbf16>, vector<32x32xbf16>, vector<8x32xf32> -> vector<8x32xf32>
    %575 = vector.broadcast %37 : vector<1x32xf32> to vector<8x32xf32>
    %576 = arith.addf %574, %575 : vector<8x32xf32>
    %577 = math.tanh %576 : vector<8x32xf32>
    %578 = arith.truncf %577 : vector<8x32xf32> to vector<8x32xbf16>
    %579 = arith.truncf %0 : vector<64x32xf32> to vector<64x32xbf16>
    %cst_188 = arith.constant dense<0.000000e+00> : vector<8x64xf32>
    %580 = tpu.matmul %578, %579, %cst_188 {dimension_numbers = #tpu.dot_dimension_numbers<[1], [1], [0], [0], [0, 0, 1, 0], [], []>} : vector<8x32xbf16>, vector<64x32xbf16>, vector<8x64xf32> -> vector<8x64xf32>
    %cst_189 = arith.constant dense<0xFF800000> : vector<8xf32>
    %581 = vector.multi_reduction <maximumf>, %580, %cst_189 [1] : vector<8x64xf32> to vector<8xf32>
    %582 = vector.shape_cast %581 : vector<8xf32> to vector<8x1xf32>
    %583 = vector.broadcast %582 : vector<8x1xf32> to vector<8x64xf32>
    %584 = arith.subf %580, %583 : vector<8x64xf32>
    %585 = math.exp %584 : vector<8x64xf32>
    %cst_190 = arith.constant dense<0.000000e+00> : vector<8xf32>
    %586 = vector.multi_reduction <add>, %585, %cst_190 [1] : vector<8x64xf32> to vector<8xf32>
    %587 = vector.shape_cast %586 : vector<8xf32> to vector<8x1xf32>
    %588 = math.log %587 : vector<8x1xf32>
    %589 = arith.addf %582, %588 : vector<8x1xf32>
    %590 = arith.index_cast %arg0 : i32 to index
    %c1_191 = arith.constant 1 : index
    %591 = memref.load %arg3[%590, %c1_191] : memref<2x8xi32, #tpu.memory_space<smem>>
    %c0_i32 = arith.constant 0 : i32
    %592 = arith.cmpi ne, %591, %c0_i32 : i32
    %593 = arith.index_cast %arg0 : i32 to index
    %c1_192 = arith.constant 1 : index
    %594 = memref.load %arg2[%593, %c1_192] : memref<2x8xi32, #tpu.memory_space<smem>>
    %595 = vector.broadcast %594 : i32 to vector<1x64xi32>
    %596 = arith.cmpi eq, %38, %595 : vector<1x64xi32>
    %597 = vector.broadcast %592 : i1 to vector<1x64xi1>
    %598 = arith.andi %596, %597 : vector<1x64xi1>
    %cst_193 = arith.constant 1.000000e+00 : f32
    %cst_194 = arith.constant 0.000000e+00 : f32
    %599 = vector.broadcast %cst_193 : f32 to vector<1x64xf32>
    %600 = vector.broadcast %cst_194 : f32 to vector<1x64xf32>
    %601 = arith.select %598, %599, %600 : vector<1x64xi1>, vector<1x64xf32>
    %602 = arith.index_cast %arg0 : i32 to index
    %c2_195 = arith.constant 2 : index
    %603 = memref.load %arg3[%602, %c2_195] : memref<2x8xi32, #tpu.memory_space<smem>>
    %c0_i32_196 = arith.constant 0 : i32
    %604 = arith.cmpi ne, %603, %c0_i32_196 : i32
    %605 = arith.index_cast %arg0 : i32 to index
    %c2_197 = arith.constant 2 : index
    %606 = memref.load %arg2[%605, %c2_197] : memref<2x8xi32, #tpu.memory_space<smem>>
    %607 = vector.broadcast %606 : i32 to vector<1x64xi32>
    %608 = arith.cmpi eq, %38, %607 : vector<1x64xi32>
    %609 = vector.broadcast %604 : i1 to vector<1x64xi1>
    %610 = arith.andi %608, %609 : vector<1x64xi1>
    %cst_198 = arith.constant 1.000000e+00 : f32
    %cst_199 = arith.constant 0.000000e+00 : f32
    %611 = vector.broadcast %cst_198 : f32 to vector<1x64xf32>
    %612 = vector.broadcast %cst_199 : f32 to vector<1x64xf32>
    %613 = arith.select %610, %611, %612 : vector<1x64xi1>, vector<1x64xf32>
    %614 = arith.index_cast %arg0 : i32 to index
    %c3_200 = arith.constant 3 : index
    %615 = memref.load %arg3[%614, %c3_200] : memref<2x8xi32, #tpu.memory_space<smem>>
    %c0_i32_201 = arith.constant 0 : i32
    %616 = arith.cmpi ne, %615, %c0_i32_201 : i32
    %617 = arith.index_cast %arg0 : i32 to index
    %c3_202 = arith.constant 3 : index
    %618 = memref.load %arg2[%617, %c3_202] : memref<2x8xi32, #tpu.memory_space<smem>>
    %619 = vector.broadcast %618 : i32 to vector<1x64xi32>
    %620 = arith.cmpi eq, %38, %619 : vector<1x64xi32>
    %621 = vector.broadcast %616 : i1 to vector<1x64xi1>
    %622 = arith.andi %620, %621 : vector<1x64xi1>
    %cst_203 = arith.constant 1.000000e+00 : f32
    %cst_204 = arith.constant 0.000000e+00 : f32
    %623 = vector.broadcast %cst_203 : f32 to vector<1x64xf32>
    %624 = vector.broadcast %cst_204 : f32 to vector<1x64xf32>
    %625 = arith.select %622, %623, %624 : vector<1x64xi1>, vector<1x64xf32>
    %626 = arith.index_cast %arg0 : i32 to index
    %c4_205 = arith.constant 4 : index
    %627 = memref.load %arg3[%626, %c4_205] : memref<2x8xi32, #tpu.memory_space<smem>>
    %c0_i32_206 = arith.constant 0 : i32
    %628 = arith.cmpi ne, %627, %c0_i32_206 : i32
    %629 = arith.index_cast %arg0 : i32 to index
    %c4_207 = arith.constant 4 : index
    %630 = memref.load %arg2[%629, %c4_207] : memref<2x8xi32, #tpu.memory_space<smem>>
    %631 = vector.broadcast %630 : i32 to vector<1x64xi32>
    %632 = arith.cmpi eq, %38, %631 : vector<1x64xi32>
    %633 = vector.broadcast %628 : i1 to vector<1x64xi1>
    %634 = arith.andi %632, %633 : vector<1x64xi1>
    %cst_208 = arith.constant 1.000000e+00 : f32
    %cst_209 = arith.constant 0.000000e+00 : f32
    %635 = vector.broadcast %cst_208 : f32 to vector<1x64xf32>
    %636 = vector.broadcast %cst_209 : f32 to vector<1x64xf32>
    %637 = arith.select %634, %635, %636 : vector<1x64xi1>, vector<1x64xf32>
    %638 = arith.index_cast %arg0 : i32 to index
    %c5_210 = arith.constant 5 : index
    %639 = memref.load %arg3[%638, %c5_210] : memref<2x8xi32, #tpu.memory_space<smem>>
    %c0_i32_211 = arith.constant 0 : i32
    %640 = arith.cmpi ne, %639, %c0_i32_211 : i32
    %641 = arith.index_cast %arg0 : i32 to index
    %c5_212 = arith.constant 5 : index
    %642 = memref.load %arg2[%641, %c5_212] : memref<2x8xi32, #tpu.memory_space<smem>>
    %643 = vector.broadcast %642 : i32 to vector<1x64xi32>
    %644 = arith.cmpi eq, %38, %643 : vector<1x64xi32>
    %645 = vector.broadcast %640 : i1 to vector<1x64xi1>
    %646 = arith.andi %644, %645 : vector<1x64xi1>
    %cst_213 = arith.constant 1.000000e+00 : f32
    %cst_214 = arith.constant 0.000000e+00 : f32
    %647 = vector.broadcast %cst_213 : f32 to vector<1x64xf32>
    %648 = vector.broadcast %cst_214 : f32 to vector<1x64xf32>
    %649 = arith.select %646, %647, %648 : vector<1x64xi1>, vector<1x64xf32>
    %650 = arith.index_cast %arg0 : i32 to index
    %c6_215 = arith.constant 6 : index
    %651 = memref.load %arg3[%650, %c6_215] : memref<2x8xi32, #tpu.memory_space<smem>>
    %c0_i32_216 = arith.constant 0 : i32
    %652 = arith.cmpi ne, %651, %c0_i32_216 : i32
    %653 = arith.index_cast %arg0 : i32 to index
    %c6_217 = arith.constant 6 : index
    %654 = memref.load %arg2[%653, %c6_217] : memref<2x8xi32, #tpu.memory_space<smem>>
    %655 = vector.broadcast %654 : i32 to vector<1x64xi32>
    %656 = arith.cmpi eq, %38, %655 : vector<1x64xi32>
    %657 = vector.broadcast %652 : i1 to vector<1x64xi1>
    %658 = arith.andi %656, %657 : vector<1x64xi1>
    %cst_218 = arith.constant 1.000000e+00 : f32
    %cst_219 = arith.constant 0.000000e+00 : f32
    %659 = vector.broadcast %cst_218 : f32 to vector<1x64xf32>
    %660 = vector.broadcast %cst_219 : f32 to vector<1x64xf32>
    %661 = arith.select %658, %659, %660 : vector<1x64xi1>, vector<1x64xf32>
    %662 = arith.index_cast %arg0 : i32 to index
    %c7_220 = arith.constant 7 : index
    %663 = memref.load %arg3[%662, %c7_220] : memref<2x8xi32, #tpu.memory_space<smem>>
    %c0_i32_221 = arith.constant 0 : i32
    %664 = arith.cmpi ne, %663, %c0_i32_221 : i32
    %665 = arith.index_cast %arg0 : i32 to index
    %c7_222 = arith.constant 7 : index
    %666 = memref.load %arg2[%665, %c7_222] : memref<2x8xi32, #tpu.memory_space<smem>>
    %667 = vector.broadcast %666 : i32 to vector<1x64xi32>
    %668 = arith.cmpi eq, %38, %667 : vector<1x64xi32>
    %669 = vector.broadcast %664 : i1 to vector<1x64xi1>
    %670 = arith.andi %668, %669 : vector<1x64xi1>
    %cst_223 = arith.constant 1.000000e+00 : f32
    %cst_224 = arith.constant 0.000000e+00 : f32
    %671 = vector.broadcast %cst_223 : f32 to vector<1x64xf32>
    %672 = vector.broadcast %cst_224 : f32 to vector<1x64xf32>
    %673 = arith.select %670, %671, %672 : vector<1x64xi1>, vector<1x64xf32>
    %cst_225 = arith.constant 0.000000e+00 : f32
    %674 = vector.broadcast %cst_225 : f32 to vector<1x64xf32>
    %675 = tpu.concatenate %601, %613, %625, %637, %649, %661, %673, %674 in 0 : vector<1x64xf32>, vector<1x64xf32>, vector<1x64xf32>, vector<1x64xf32>, vector<1x64xf32>, vector<1x64xf32>, vector<1x64xf32>, vector<1x64xf32> -> vector<8x64xf32>
    %cst_226 = arith.constant dense<0.000000e+00> : vector<8xf32>
    %676 = vector.multi_reduction <add>, %675, %cst_226 [1] : vector<8x64xf32> to vector<8xf32>
    %677 = vector.shape_cast %676 : vector<8xf32> to vector<8x1xf32>
    %678 = arith.mulf %580, %675 : vector<8x64xf32>
    %cst_227 = arith.constant dense<0.000000e+00> : vector<8xf32>
    %679 = vector.multi_reduction <add>, %678, %cst_227 [1] : vector<8x64xf32> to vector<8xf32>
    %680 = vector.shape_cast %679 : vector<8xf32> to vector<8x1xf32>
    %681 = arith.mulf %589, %677 : vector<8x1xf32>
    %682 = arith.subf %681, %680 : vector<8x1xf32>
    %683 = vector.shape_cast %682 : vector<8x1xf32> to vector<1x8x1xf32>
    %cst_228 = arith.constant dense<0.000000e+00> : vector<1xf32>
    %684 = vector.multi_reduction <add>, %683, %cst_228 [1, 2] : vector<1x8x1xf32> to vector<1xf32>
    %685 = vector.shape_cast %684 : vector<1xf32> to vector<1x1x1xf32>
    %686 = vector.extract %685[0, 0, 0] : f32 from vector<1x1x1xf32>
    %687 = vector.shape_cast %677 : vector<8x1xf32> to vector<1x8x1xf32>
    %cst_229 = arith.constant dense<0.000000e+00> : vector<1xf32>
    %688 = vector.multi_reduction <add>, %687, %cst_229 [1, 2] : vector<1x8x1xf32> to vector<1xf32>
    %689 = vector.shape_cast %688 : vector<1xf32> to vector<1x1x1xf32>
    %690 = vector.extract %689[0, 0, 0] : f32 from vector<1x1x1xf32>
    %691 = vector.broadcast %686 : f32 to vector<1x1x1xf32>
    %692 = vector.shape_cast %691 : vector<1x1x1xf32> to vector<1x1x1xf32>
    %693 = vector.broadcast %692 : vector<1x1x1xf32> to vector<1x8x128xf32>
    %c0_230 = arith.constant 0 : index
    %c0_231 = arith.constant 0 : index
    %c0_232 = arith.constant 0 : index
    %694 = vector.load %arg43[%c0_230, %c0_231, %c0_232] : memref<1x8x128xf32, #tpu.memory_space<vmem>>, vector<1x8x128xf32>
    tpu.vector_store %arg43[%c0_230, %c0_231, %c0_232], %693 {strides = array<i32>} : memref<1x8x128xf32, #tpu.memory_space<vmem>>, vector<1x8x128xf32>,
    %695 = vector.broadcast %690 : f32 to vector<1x1x1xf32>
    %696 = vector.shape_cast %695 : vector<1x1x1xf32> to vector<1x1x1xf32>
    %697 = vector.broadcast %696 : vector<1x1x1xf32> to vector<1x8x128xf32>
    %c0_233 = arith.constant 0 : index
    %c0_234 = arith.constant 0 : index
    %c0_235 = arith.constant 0 : index
    %698 = vector.load %arg44[%c0_233, %c0_234, %c0_235] : memref<1x8x128xf32, #tpu.memory_space<vmem>>, vector<1x8x128xf32>
    tpu.vector_store %arg44[%c0_233, %c0_234, %c0_235], %697 {strides = array<i32>} : memref<1x8x128xf32, #tpu.memory_space<vmem>>, vector<1x8x128xf32>,
    return
  }
  func.func @transform_0(%arg0: i32) -> (i32, i32) {
    %c0_i32 = arith.constant 0 : i32
    %c0_i32_0 = arith.constant 0 : i32
    %c0_i32_1 = arith.constant 0 : i32
    return %c0_i32, %c0_i32_0 : i32, i32
  }
  func.func @transform_1(%arg0: i32) -> (i32, i32) {
    %c0_i32 = arith.constant 0 : i32
    %c0_i32_0 = arith.constant 0 : i32
    %c0_i32_1 = arith.constant 0 : i32
    return %c0_i32, %c0_i32_0 : i32, i32
  }
  func.func @transform_2(%arg0: i32) -> (i32, i32) {
    %c0_i32 = arith.constant 0 : i32
    %c0_i32_0 = arith.constant 0 : i32
    %c0_i32_1 = arith.constant 0 : i32
    return %c0_i32, %c0_i32_0 : i32, i32
  }
  func.func @transform_3(%arg0: i32) -> (i32, i32) {
    %c0_i32 = arith.constant 0 : i32
    %c0_i32_0 = arith.constant 0 : i32
    %c0_i32_1 = arith.constant 0 : i32
    return %c0_i32, %c0_i32_0 : i32, i32
  }
  func.func @transform_4(%arg0: i32) -> (i32, i32) {
    %c0_i32 = arith.constant 0 : i32
    %c0_i32_0 = arith.constant 0 : i32
    %c0_i32_1 = arith.constant 0 : i32
    return %c0_i32, %c0_i32_0 : i32, i32
  }
  func.func @transform_5(%arg0: i32) -> (i32, i32) {
    %c0_i32 = arith.constant 0 : i32
    %c0_i32_0 = arith.constant 0 : i32
    %c0_i32_1 = arith.constant 0 : i32
    return %c0_i32, %c0_i32_0 : i32, i32
  }
  func.func @transform_6(%arg0: i32) -> (i32, i32) {
    %c0_i32 = arith.constant 0 : i32
    %c0_i32_0 = arith.constant 0 : i32
    %c0_i32_1 = arith.constant 0 : i32
    return %c0_i32, %c0_i32_0 : i32, i32
  }
  func.func @transform_7(%arg0: i32) -> (i32, i32) {
    %c0_i32 = arith.constant 0 : i32
    %c0_i32_0 = arith.constant 0 : i32
    %c0_i32_1 = arith.constant 0 : i32
    return %c0_i32, %c0_i32_0 : i32, i32
  }
  func.func @transform_8(%arg0: i32) -> (i32, i32) {
    %c0_i32 = arith.constant 0 : i32
    %c0_i32_0 = arith.constant 0 : i32
    %c0_i32_1 = arith.constant 0 : i32
    return %c0_i32, %c0_i32_0 : i32, i32
  }
  func.func @transform_9(%arg0: i32) -> (i32, i32) {
    %c0_i32 = arith.constant 0 : i32
    %c0_i32_0 = arith.constant 0 : i32
    %c0_i32_1 = arith.constant 0 : i32
    return %c0_i32, %c0_i32_0 : i32, i32
  }
  func.func @transform_10(%arg0: i32) -> (i32, i32) {
    %c0_i32 = arith.constant 0 : i32
    %c0_i32_0 = arith.constant 0 : i32
    %c0_i32_1 = arith.constant 0 : i32
    return %c0_i32, %c0_i32_0 : i32, i32
  }
  func.func @transform_11(%arg0: i32) -> (i32, i32) {
    %c0_i32 = arith.constant 0 : i32
    %c0_i32_0 = arith.constant 0 : i32
    %c0_i32_1 = arith.constant 0 : i32
    return %c0_i32, %c0_i32_0 : i32, i32
  }
  func.func @transform_12(%arg0: i32) -> (i32, i32) {
    %c0_i32 = arith.constant 0 : i32
    %c0_i32_0 = arith.constant 0 : i32
    %c0_i32_1 = arith.constant 0 : i32
    return %c0_i32, %c0_i32_0 : i32, i32
  }
  func.func @transform_13(%arg0: i32) -> (i32, i32) {
    %c0_i32 = arith.constant 0 : i32
    %c0_i32_0 = arith.constant 0 : i32
    %c0_i32_1 = arith.constant 0 : i32
    return %c0_i32, %c0_i32_0 : i32, i32
  }
  func.func @transform_14(%arg0: i32) -> (i32, i32) {
    %c0_i32 = arith.constant 0 : i32
    %c0_i32_0 = arith.constant 0 : i32
    %c0_i32_1 = arith.constant 0 : i32
    return %c0_i32, %c0_i32_0 : i32, i32
  }
  func.func @transform_15(%arg0: i32) -> (i32, i32) {
    %c0_i32 = arith.constant 0 : i32
    %c0_i32_0 = arith.constant 0 : i32
    %c0_i32_1 = arith.constant 0 : i32
    return %c0_i32, %c0_i32_0 : i32, i32
  }
  func.func @transform_16(%arg0: i32) -> (i32, i32) {
    %c0_i32 = arith.constant 0 : i32
    %c0_i32_0 = arith.constant 0 : i32
    %c0_i32_1 = arith.constant 0 : i32
    return %c0_i32, %c0_i32_0 : i32, i32
  }
  func.func @transform_17(%arg0: i32) -> (i32, i32) {
    %c0_i32 = arith.constant 0 : i32
    %c0_i32_0 = arith.constant 0 : i32
    %c0_i32_1 = arith.constant 0 : i32
    return %c0_i32, %c0_i32_0 : i32, i32
  }
  func.func @transform_18(%arg0: i32) -> (i32, i32) {
    %c0_i32 = arith.constant 0 : i32
    %c0_i32_0 = arith.constant 0 : i32
    %c0_i32_1 = arith.constant 0 : i32
    return %c0_i32, %c0_i32_0 : i32, i32
  }
  func.func @transform_19(%arg0: i32) -> (i32, i32) {
    %c0_i32 = arith.constant 0 : i32
    %c0_i32_0 = arith.constant 0 : i32
    %c0_i32_1 = arith.constant 0 : i32
    return %c0_i32, %c0_i32_0 : i32, i32
  }
  func.func @transform_20(%arg0: i32) -> (i32, i32) {
    %c0_i32 = arith.constant 0 : i32
    %c0_i32_0 = arith.constant 0 : i32
    %c0_i32_1 = arith.constant 0 : i32
    return %c0_i32, %c0_i32_0 : i32, i32
  }
  func.func @transform_21(%arg0: i32) -> (i32, i32) {
    %c0_i32 = arith.constant 0 : i32
    %c0_i32_0 = arith.constant 0 : i32
    %c0_i32_1 = arith.constant 0 : i32
    return %c0_i32, %c0_i32_0 : i32, i32
  }
  func.func @transform_22(%arg0: i32) -> (i32, i32) {
    %c0_i32 = arith.constant 0 : i32
    %c0_i32_0 = arith.constant 0 : i32
    %c0_i32_1 = arith.constant 0 : i32
    return %c0_i32, %c0_i32_0 : i32, i32
  }
  func.func @transform_23(%arg0: i32) -> (i32, i32) {
    %c0_i32 = arith.constant 0 : i32
    %c0_i32_0 = arith.constant 0 : i32
    %c0_i32_1 = arith.constant 0 : i32
    return %c0_i32, %c0_i32_0 : i32, i32
  }
  func.func @transform_24(%arg0: i32) -> (i32, i32) {
    %c0_i32 = arith.constant 0 : i32
    %c0_i32_0 = arith.constant 0 : i32
    %c0_i32_1 = arith.constant 0 : i32
    return %c0_i32, %c0_i32_0 : i32, i32
  }
  func.func @transform_25(%arg0: i32) -> (i32, i32) {
    %c0_i32 = arith.constant 0 : i32
    %c0_i32_0 = arith.constant 0 : i32
    %c0_i32_1 = arith.constant 0 : i32
    return %c0_i32, %c0_i32_0 : i32, i32
  }
  func.func @transform_26(%arg0: i32) -> (i32, i32) {
    %c0_i32 = arith.constant 0 : i32
    %c0_i32_0 = arith.constant 0 : i32
    %c0_i32_1 = arith.constant 0 : i32
    return %c0_i32, %c0_i32_0 : i32, i32
  }
  func.func @transform_27(%arg0: i32) -> (i32, i32) {
    %c0_i32 = arith.constant 0 : i32
    %c0_i32_0 = arith.constant 0 : i32
    %c0_i32_1 = arith.constant 0 : i32
    return %c0_i32, %c0_i32_0 : i32, i32
  }
  func.func @transform_28(%arg0: i32) -> (i32, i32) {
    %c0_i32 = arith.constant 0 : i32
    %c0_i32_0 = arith.constant 0 : i32
    %c0_i32_1 = arith.constant 0 : i32
    return %c0_i32, %c0_i32_0 : i32, i32
  }
  func.func @transform_29(%arg0: i32) -> (i32, i32) {
    %c0_i32 = arith.constant 0 : i32
    %c0_i32_0 = arith.constant 0 : i32
    %c0_i32_1 = arith.constant 0 : i32
    return %c0_i32, %c0_i32_0 : i32, i32
  }
  func.func @transform_30(%arg0: i32) -> (i32, i32) {
    %c0_i32 = arith.constant 0 : i32
    %c0_i32_0 = arith.constant 0 : i32
    %c0_i32_1 = arith.constant 0 : i32
    return %c0_i32, %c0_i32_0 : i32, i32
  }
  func.func @transform_31(%arg0: i32) -> (i32, i32) {
    %c0_i32 = arith.constant 0 : i32
    %c0_i32_0 = arith.constant 0 : i32
    %c0_i32_1 = arith.constant 0 : i32
    return %c0_i32, %c0_i32_0 : i32, i32
  }
  func.func @transform_32(%arg0: i32) -> (i32, i32) {
    %c0_i32 = arith.constant 0 : i32
    %c0_i32_0 = arith.constant 0 : i32
    %c0_i32_1 = arith.constant 0 : i32
    return %c0_i32, %c0_i32_0 : i32, i32
  }
  func.func @transform_33(%arg0: i32) -> (i32, i32) {
    %c0_i32 = arith.constant 0 : i32
    %c0_i32_0 = arith.constant 0 : i32
    %c0_i32_1 = arith.constant 0 : i32
    return %c0_i32, %c0_i32_0 : i32, i32
  }
  func.func @transform_34(%arg0: i32) -> (i32, i32) {
    %c0_i32 = arith.constant 0 : i32
    %c0_i32_0 = arith.constant 0 : i32
    %c0_i32_1 = arith.constant 0 : i32
    return %c0_i32, %c0_i32_0 : i32, i32
  }
  func.func @transform_35(%arg0: i32) -> (i32, i32) {
    %c0_i32 = arith.constant 0 : i32
    %c0_i32_0 = arith.constant 0 : i32
    %c0_i32_1 = arith.constant 0 : i32
    return %c0_i32, %c0_i32_0 : i32, i32
  }
  func.func @transform_36(%arg0: i32) -> (i32, i32) {
    %c0_i32 = arith.constant 0 : i32
    %c0_i32_0 = arith.constant 0 : i32
    %c0_i32_1 = arith.constant 0 : i32
    return %c0_i32, %c0_i32_0 : i32, i32
  }
  func.func @transform_37(%arg0: i32) -> (i32, i32) {
    %c0_i32 = arith.constant 0 : i32
    %c0_i32_0 = arith.constant 0 : i32
    %c0_i32_1 = arith.constant 0 : i32
    return %c0_i32, %c0_i32_0 : i32, i32
  }
  func.func @transform_38(%arg0: i32) -> (i32, i32) {
    %c0_i32 = arith.constant 0 : i32
    %c0_i32_0 = arith.constant 0 : i32
    %c0_i32_1 = arith.constant 0 : i32
    return %c0_i32, %c0_i32_0 : i32, i32
  }
  func.func @transform_39(%arg0: i32) -> (i32, i32) {
    %c0_i32 = arith.constant 0 : i32
    %c0_i32_0 = arith.constant 0 : i32
    %c0_i32_1 = arith.constant 0 : i32
    return %c0_i32, %c0_i32_0 : i32, i32
  }
  func.func @transform_40(%arg0: i32) -> (i32, i32) {
    %c0_i32 = arith.constant 0 : i32
    %c0_i32_0 = arith.constant 0 : i32
    %c0_i32_1 = arith.constant 0 : i32
    return %c0_i32, %c0_i32_0 : i32, i32
  }
  func.func @transform_41(%arg0: i32) -> (i32, i32) {
    %c0_i32 = arith.constant 0 : i32
    %c0_i32_0 = arith.constant 0 : i32
    %c0_i32_1 = arith.constant 0 : i32
    return %c0_i32, %c0_i32_0 : i32, i32
  }
  func.func @transform_42(%arg0: i32) -> (i32, i32, i32) {
    %c0_i32 = arith.constant 0 : i32
    %c0_i32_0 = arith.constant 0 : i32
    %c0_i32_1 = arith.constant 0 : i32
    return %arg0, %c0_i32, %c0_i32_0 : i32, i32, i32
  }
  func.func @transform_43(%arg0: i32) -> (i32, i32, i32) {
    %c0_i32 = arith.constant 0 : i32
    %c0_i32_0 = arith.constant 0 : i32
    %c0_i32_1 = arith.constant 0 : i32
    return %arg0, %c0_i32, %c0_i32_0 : i32, i32, i32
  }
}

</mosaic_0001>

<bundles_post_ra>
// kernel: seq2seq_forward.1
= control target key start
LH: loop header
LB: loop body
LE: loop exit
PB: predicated region body
PF: predicated region fallthrough
CT: control target
= control target key end

     0   :  { %s4438_s6 = smov 1   ;;  %s4439_s10 = smov 2   ;;  %s5562_s0 = inlined_call_operand.smem [shape: u32[44], index: -1, kind: input, shape index: {}] }
   0x1   :  { %s4518_s5 = sld [smem:[%s5562_s0]]   ;;  %s4440_s14 = smov 3  }
   0x2   :  { %s4523_s9 = sld [smem:[%s5562_s0 + %s4438_s6]]   ;;  %s4441_s18 = smov 4  }
   0x3   :  { %s4528_s13 = sld [smem:[%s5562_s0 + %s4439_s10]]   ;;  %s4442_s22 = smov 5  }
   0x4   :  { %s4533_s17 = sld [smem:[%s5562_s0 + %s4440_s14]]   ;;  %s4443_s26 = smov 6  }
   0x5   :  { %s4538_s21 = sld [smem:[%s5562_s0 + %s4441_s18]]   ;;  %s4444_s30 = smov 7  }
   0x6   :  { %s4543_s25 = sld [smem:[%s5562_s0 + %s4442_s22]]   ;;  %s4445_s4 = smov 8  }
   0x7   :  { %5615 = sst [smem:[#allocation39_spill]] %s4518_s5  ;;  %s4446_s10 = smov 9  }
   0x8   :  { %5616 = sst [smem:[#allocation40_spill]] %s4523_s9  ;;  %s4447_s15 = smov 10  }
   0x9   :  { %5617 = sst [smem:[#allocation41_spill]] %s4528_s13  ;;  %s4448_s20 = smov 11  }
   0xa   :  { %5618 = sst [smem:[#allocation42_spill]] %s4533_s17  ;;  %s4450_s1 = smov 13  }
   0xb   :  { %5619 = sst [smem:[#allocation43_spill]] %s4538_s21  ;;  %s4451_s7 = smov 14  }
   0xc   :  { %5620 = sst [smem:[#allocation44_spill]] %s4543_s25  ;;  %s4453_s22 = smov 16  }
   0xd   :  { %s4548_s29 = sld [smem:[%s5562_s0 + %s4443_s26]]   ;;  %s4449_s26 = smov 12  }
   0xe   :  { %s4553_s3 = sld [smem:[%s5562_s0 + %s4444_s30]]   ;;  %s4454_s28 = smov 17  }
   0xf   :  { %s4558_s8 = sld [smem:[%s5562_s0 + %s4445_s4]]  }
  0x10   :  { %s4563_s14 = sld [smem:[%s5562_s0 + %s4446_s10]]  }
  0x11   :  { %s4568_s19 = sld [smem:[%s5562_s0 + %s4447_s15]]   ;;  %s4452_s15 = smov 15  }
  0x12   :  { %s4573_s24 = sld [smem:[%s5562_s0 + %s4448_s20]]  }
  0x13   :  { %5621 = sst [smem:[#allocation45_spill]] %s4548_s29 }
  0x14   :  { %5622 = sst [smem:[#allocation46_spill]] %s4553_s3 }
  0x15   :  { %5623 = sst [smem:[#allocation47_spill]] %s4558_s8 }
  0x16   :  { %5624 = sst [smem:[#allocation48_spill]] %s4563_s14 }
  0x17   :  { %5625 = sst [smem:[#allocation49_spill]] %s4568_s19 }
  0x18   :  { %5626 = sst [smem:[#allocation50_spill]] %s4573_s24 }
  0x19   :  { %s4578_s30 = sld [smem:[%s5562_s0 + %s4449_s26]]  }
  0x1a   :  { %s4583_s6 = sld [smem:[%s5562_s0 + %s4450_s1]]  }
  0x1b   :  { %s4588_s12 = sld [smem:[%s5562_s0 + %s4451_s7]]   ;;  %s4455_s7 = smov 18  }
  0x1c   :  { %s4593_s20 = sld [smem:[%s5562_s0 + %s4452_s15]]   ;;  %s4456_s15 = smov 19  }
  0x1d   :  { %s4598_s27 = sld [smem:[%s5562_s0 + %s4453_s22]]   ;;  %s4457_s22 = smov 20  }
  0x1e   :  { %s4603_s4 = sld [smem:[%s5562_s0 + %s4454_s28]]   ;;  %s4458_s28 = smov 21  }
  0x1f   :  { %5627 = sst [smem:[#allocation51_spill]] %s4578_s30 }
  0x20   :  { %5628 = sst [smem:[#allocation52_spill]] %s4583_s6 }
  0x21   :  { %5629 = sst [smem:[#allocation53_spill]] %s4588_s12 }
  0x22   :  { %5630 = sst [smem:[#allocation54_spill]] %s4593_s20 }
  0x23   :  { %5631 = sst [smem:[#allocation55_spill]] %s4598_s27 }
  0x24   :  { %5632 = sst [smem:[#allocation56_spill]] %s4603_s4 }
  0x25   :  { %s4608_s6 = sld [smem:[%s5562_s0 + %s4455_s7]]   ;;  %s4459_s7 = smov 22  }
  0x26   :  { %s4613_s20 = sld [smem:[%s5562_s0 + %s4456_s15]]   ;;  %s4460_s15 = smov 23  }
  0x27   :  { %s4618_s27 = sld [smem:[%s5562_s0 + %s4457_s22]]   ;;  %s4461_s22 = smov 24  }
  0x28   :  { %s4623_s4 = sld [smem:[%s5562_s0 + %s4458_s28]]   ;;  %s4462_s28 = smov 25  }
  0x29   :  { %s4638_s30 = sld [smem:[%s5562_s0 + %s4461_s22]]   ;;  %s4465_s22 = smov 28  }
  0x2a   :  { %s4643_s12 = sld [smem:[%s5562_s0 + %s4462_s28]]   ;;  %s4466_s28 = smov 29  }
  0x2b   :  { %5633 = sst [smem:[#allocation57_spill]] %s4608_s6 }
  0x2c   :  { %5634 = sst [smem:[#allocation58_spill]] %s4613_s20 }
  0x2d   :  { %5635 = sst [smem:[#allocation59_spill]] %s4618_s27 }
  0x2e   :  { %5636 = sst [smem:[#allocation60_spill]] %s4623_s4 }
  0x2f   :  { %s4628_s6 = sld [smem:[%s5562_s0 + %s4459_s7]]   ;;  %s4463_s7 = smov 26  }
  0x30   :  { %s4633_s20 = sld [smem:[%s5562_s0 + %s4460_s15]]   ;;  %s4464_s15 = smov 27  }
  0x31   :  { %5638 = sst [smem:[#allocation62_spill]] %s4643_s12 }
  0x32   :  { %s4653_s4 = sld [smem:[%s5562_s0 + %s4464_s15]]   ;;  %s4468_s15 = smov 31  }
  0x33   :  { %s4658_s27 = sld [smem:[%s5562_s0 + %s4465_s22]]   ;;  %s4469_s22 = smov 32  }
  0x34   :  { %s4663_s24 = sld [smem:[%s5562_s0 + %s4466_s28]]   ;;  %s4470_s28 = smov 33  }
  0x35   :  { %5637 = sst [smem:[#allocation61_spill]] %s4628_s6 }
  0x36   :  { %s4648_s6 = sld [smem:[%s5562_s0 + %s4463_s7]]   ;;  %s4467_s7 = smov 30  }
  0x37   :  { %s4673_s19 = sld [smem:[%s5562_s0 + %s4468_s15]]   ;;  %s4472_s15 = smov 35  }
  0x38   :  { %5640 = sst [smem:[#allocation64_spill]] %s4653_s4 }
  0x39   :  { %5641 = sst [smem:[#allocation65_spill]] %s4658_s27 }
  0x3a   :  { %s4678_s27 = sld [smem:[%s5562_s0 + %s4469_s22]]   ;;  %s4473_s22 = smov 36  }
  0x3b   :  { %s4683_s17 = sld [smem:[%s5562_s0 + %s4470_s28]]   ;;  %s4474_s28 = smov 37  }
  0x3c   :  { %5639 = sst [smem:[#allocation63_spill]] %s4648_s6 }
  0x3d   :  { %s4668_s6 = sld [smem:[%s5562_s0 + %s4467_s7]]   ;;  %s4471_s7 = smov 34  }
  0x3e   :  { %s4693_s14 = sld [smem:[%s5562_s0 + %s4472_s15]]   ;;  %s4476_s15 = smov 39  }
  0x3f   :  { %s4698_s3 = sld [smem:[%s5562_s0 + %s4473_s22]]   ;;  %s4477_s22 = smov 40  }
  0x40   :  { %s4703_s29 = sld [smem:[%s5562_s0 + %s4474_s28]]   ;;  %s4478_s28 = smov 41  }
  0x41   :  { %s4713_s8 = sld [smem:[%s5562_s0 + %s4476_s15]]   ;;  %s4480_s15 = smov 43  }
  0x42   :  { %s4723_s25 = sld [smem:[%s5562_s0 + %s4478_s28]]  }
  0x43   :  { %5642 = sst [smem:[#allocation66_spill]] %s4668_s6 }
  0x44   :  { %s4688_s6 = sld [smem:[%s5562_s0 + %s4471_s7]]   ;;  %s4475_s7 = smov 38  }
  0x45   :  { %5644 = sst [smem:[#allocation68_spill]] %s4693_s14 }
  0x46   :  { %5645 = sst [smem:[#allocation69_spill]] %s4698_s3 }
  0x47   :  { %5647 = sst [smem:[#allocation71_spill]] %s4713_s8 }
  0x48   :  { %s4718_s3 = sld [smem:[%s5562_s0 + %s4477_s22]]  }
  0x4a   :  { %5643 = sst [smem:[#allocation67_spill]] %s4688_s6 }
  0x4b   :  { %s4708_s6 = sld [smem:[%s5562_s0 + %s4475_s7]]   ;;  %s4479_s7 = smov 42  }
  0x4c   :  { %s4728_s21 = sld [smem:[%s5562_s0 + %s4479_s7]]  }
  0x4e   :  { %5648 = sst [smem:[#allocation72_spill]] %s4718_s3 }
  0x51   :  { %5646 = sst [smem:[#allocation70_spill]] %s4708_s6 }
  0x52   :  { %s4733_s6 = sld [smem:[%s5562_s0 + %s4480_s15]]  }
  0x58   :  { %5649 = sst [smem:[#allocation73_spill]] %s4733_s6 }
  0x59   :  { %93 = vsyncpa [#allocation4], 0 }
  0x5a   :  { %94 = vsyncpa [#allocation6], 0 }
  0x5b   :  { %95 = vsyncpa [#allocation3], 0 }
  0x5c   :  { %96 = vsyncpa [#allocation10], 0 }
  0x5d   :  { %97 = vsyncpa [#allocation13], 0 }
  0x5e   :  { %98 = vsyncpa [#allocation16], 0 }
  0x5f   :  { %99 = vsyncpa [#allocation19], 0 }
  0x60   :  { %100 = vsyncpa [#allocation22], 0 }
  0x61   :  { %101 = vsyncpa [#allocation25], 0 }
  0x62   :  { %102 = vsyncpa [#allocation28], 0  ;;  %s4735_s22 = smov 0  }
  0x63 LB: > { %s5650_s14 = sld [smem:[#allocation68_spill]]  ;;  %s4744_s23 = sadd.s32 4294967295, %s4436_s22   ;;  %s4436_s22 = sphi %s4735_s22, %s108_s22  }
  0x64   : > { %s5651_s13 = sld [smem:[#allocation41_spill]]  ;;  %p3505_p0 = scmp.ge.s32.totalorder %s4436_s22, 1 }
  0x65   : > { %s5652_s12 = sld [smem:[#allocation62_spill]]  ;;  %p1047_p1 = scmp.lt.s32.totalorder %s4436_s22, 3 }
  0x66   : > { %s5653_s9 = sld [smem:[#allocation40_spill]]  ;;  %p3709_p2 = scmp.eq.s32.totalorder %s4744_s23, 0 }
  0x67   : > { %s5654_s8 = sld [smem:[#allocation71_spill]]  ;;  %p4749_p3 = pnand %p3505_p0, %p1047_p1 }
  0x68   : > { %s5655_s3 = sld [smem:[#allocation72_spill]]  ;;  %s1161_s28 = sshll.u32 %s4638_s30, 4  ;;  %s4754_s28 = int_to_ptr.hbm [resolvable:$true] %s1161_s28 }
  0x69   : > { %s5656_s5 = sld [smem:[#allocation39_spill]]  ;;  %p3657_p4 = pneg %p4749_p3 }
  0x6a   : > { %s5657_s4 = sld [smem:[#allocation64_spill]]  ;;  %s4481_s1 = smov [#allocation9]  }
  0x6b   : > { %5658 = sst [smem:[#allocation74_spill]] %s4436_s22  ;;  %s4758_s2 = sshll.u32 %s4481_s1, 4 }
  0x6c   : > { %s1069_s0 = sshll.u32 %s5653_s9, 4  ;;  %5660 = sst [smem:[#allocation75_spill]] %s4758_s2  ;;  %s4741_s0 = int_to_ptr.vmem [resolvable:$true] %s1069_s0 }
  0x6d   : > { %p4764_p5 = pnand %p3709_p2, %p3657_p4  ;;  %s4482_s15 = smov [#allocation12]  }
  0x6e   : > { %s4771_s16 = sshll.u32 %s4482_s15, 4  ;;  %s3925_s18 = sshra.s32 %s4741_s0, 4  ;;  %s3926_s18 = int_to_ptr.vmem [resolvable:$true] %s3925_s18  ;;  %s1191_s16 = int_to_ptr.vmem [resolvable:$true] %s4771_s16 }
  0x6f   : > { %s3927_s1 = scalar_lea.vmem %s3926_s18, 2  ;;  %p4776_p7 = pneg %p4764_p5 }
  0x70   : > { %s1188_s7 = sshll.u32 %s5657_s4, 4  ;;  %p3928_p6 = scmp.ne.s32.totalorder %s3926_s18, %s3927_s1  ;;  %s4768_s7 = int_to_ptr.hbm [resolvable:$true] %s1188_s7 }
  0x71   : > { %s3932_s22 = scalar_lea.vmem %s5653_s9, 2  ;;  %p3933_p10 = scmp.lt.s32.totalorder %s3926_s18, %s5653_s9 }
  0x72   : > { %p3930_p8 = pnand %p4776_p7, %p3928_p6  ;;  %p3934_p11 = scmp.lt.s32.totalorder %s3932_s22, %s3927_s1 }
  0x74   : > { %p3931_p9 = pneg %p3930_p8  ;;  %p3935_p12 = por %p3934_p11, %p3933_p10 }
  0x76   : > { %p3936_p13 = pnand %p3935_p12, %p3931_p9 }
  0x78   : > { %3939 = shalt.err (!%p3936_p13)
}
  0x79   : > { %s4483_s15 = smov [#allocation5]   ;;  %s3940_s11 = sshra.s32 %s4754_s28, 4  ;;  %s3941_s11 = int_to_ptr.hbm [resolvable:$true] %s3940_s11 }
  0x7a   : > { %3663 = dma.vmem_to_smem (!%p4764_p5), %s4741_s0, 32, %s4483_s15, [#allocation6]  }
  0x7b   : > { %s3942_s6 = scalar_lea.hbm %s3941_s11, 1  ;;  %s3947_s22 = scalar_lea.hbm %s4638_s30, 1 }
  0x7c   : > { %p3943_p0 = scmp.ne.s32.totalorder %s3941_s11, %s3942_s6  ;;  %p3948_p6 = scmp.lt.s32.totalorder %s3941_s11, %s4638_s30 }
  0x7d   : > { %p3949_p8 = scmp.lt.s32.totalorder %s3947_s22, %s3942_s6 }
  0x7e   : > { %p3945_p1 = pnand %p3943_p0, %p4776_p7 }
  0x7f   : > { %p3950_p9 = por %p3949_p8, %p3948_p6 }
  0x80   : > { %p3946_p4 = pneg %p3945_p1 }
  0x82   : > { %p3951_p10 = pnand %p3950_p9, %p3946_p4 }
  0x84   : > { %3954 = shalt.err (!%p3951_p10)
}
  0x85   : > { %s5663_s18 = sld [smem:[#allocation75_spill]]  ;;  %s5665_s0 = sshll.u32 %s4673_s19, 4  ;;  %s4800_s0 = int_to_ptr.hbm [resolvable:$true] %s5665_s0 }
  0x86   : > { %s3970_s6 = sshra.s32 %s4768_s7, 4  ;;  %s3977_s15 = scalar_lea.hbm %s5657_s4, 1  ;;  %s3971_s6 = int_to_ptr.hbm [resolvable:$true] %s3970_s6 }
  0x87   : > { %s3972_s11 = scalar_lea.hbm %s3971_s6, 1  ;;  %p3978_p0 = scmp.lt.s32.totalorder %s3971_s6, %s5657_s4 }
  0x88   : > { %p3973_p11 = scmp.ne.s32.totalorder %s3971_s6, %s3972_s11  ;;  %p3979_p1 = scmp.lt.s32.totalorder %s3977_s15, %s3972_s11 }
  0x8a   : > { %p3975_p12 = pnand %p3973_p11, %p4776_p7  ;;  %p3980_p4 = por %p3979_p1, %p3978_p0 }
  0x8b   : > { %s5664_s1 = int_to_ptr.vmem [resolvable:$true] %s5663_s18 }
  0x8c   : > { %3672 = dma.hbm_to_vmem [thread:$0]  (!%p4764_p5), %s4754_s28, 16, %s5664_s1, [#allocation10]  }
  0x8d   : > { %p3976_p13 = pneg %p3975_p12 }
  0x8f   : > { %p3981_p6 = pnand %p3980_p4, %p3976_p13 }
  0x91   : > { %3984 = shalt.err (!%p3981_p6)
}
  0x92   : > { %3678 = dma.hbm_to_vmem [thread:$0]  (!%p4764_p5), %s4768_s7, 16, %s1191_s16, [#allocation13]  }
  0x93   : > { %s1242_s28 = sshll.u32 %s4683_s17, 4  ;;  %s4484_s22 = smov [#allocation15]   ;;  %s4811_s28 = int_to_ptr.hbm [resolvable:$true] %s1242_s28 }
  0x94   : > { %s1220_s18 = sshll.u32 %s4484_s22, 4  ;;  %s4000_s1 = sshra.s32 %s4800_s0, 4  ;;  %s1221_s18 = int_to_ptr.vmem [resolvable:$true] %s1220_s18  ;;  %s4001_s1 = int_to_ptr.hbm [resolvable:$true] %s4000_s1 }
  0x95   : > { %s4002_s6 = scalar_lea.hbm %s4001_s1, 1  ;;  %s4007_s11 = scalar_lea.hbm %s4673_s19, 1 }
  0x96   : > { %p4003_p8 = scmp.ne.s32.totalorder %s4001_s1, %s4002_s6  ;;  %p4008_p11 = scmp.lt.s32.totalorder %s4001_s1, %s4673_s19 }
  0x97   : > { %p4009_p12 = scmp.lt.s32.totalorder %s4007_s11, %s4002_s6 }
  0x98   : > { %p4005_p9 = pnand %p4003_p8, %p4776_p7 }
  0x99   : > { %p4010_p13 = por %p4009_p12, %p4008_p11 }
  0x9a   : > { %p4006_p10 = pneg %p4005_p9 }
  0x9c   : > { %p4011_p0 = pnand %p4010_p13, %p4006_p10 }
  0x9e   : > { %4014 = shalt.err (!%p4011_p0)
}
  0x9f   : > { %3684 = dma.hbm_to_vmem [thread:$0]  (!%p4764_p5), %s4800_s0, 16, %s1221_s18, [#allocation16]  }
  0xa0   : > { %s4485_s7 = smov [#allocation18]   ;;  %s1272_s15 = sshll.u32 %s4703_s29, 4  ;;  %s4822_s15 = int_to_ptr.hbm [resolvable:$true] %s1272_s15 }
  0xa1   : > { %s1244_s16 = sshll.u32 %s4485_s7, 4  ;;  %s4030_s22 = sshra.s32 %s4811_s28, 4  ;;  %s1245_s16 = int_to_ptr.vmem [resolvable:$true] %s1244_s16  ;;  %s4031_s22 = int_to_ptr.hbm [resolvable:$true] %s4030_s22 }
  0xa2   : > { %s4032_s1 = scalar_lea.hbm %s4031_s22, 1  ;;  %s4037_s6 = scalar_lea.hbm %s4683_s17, 1 }
  0xa3   : > { %p4033_p1 = scmp.ne.s32.totalorder %s4031_s22, %s4032_s1  ;;  %p4038_p8 = scmp.lt.s32.totalorder %s4031_s22, %s4683_s17 }
  0xa4   : > { %p4039_p9 = scmp.lt.s32.totalorder %s4037_s6, %s4032_s1 }
  0xa5   : > { %p4035_p4 = pnand %p4033_p1, %p4776_p7 }
  0xa6   : > { %p4040_p10 = por %p4039_p9, %p4038_p8 }
  0xa7   : > { %p4036_p6 = pneg %p4035_p4 }
  0xa9   : > { %p4041_p11 = pnand %p4040_p10, %p4036_p6 }
  0xab   : > { %4044 = shalt.err (!%p4041_p11)
}
  0xac   : > { %3690 = dma.hbm_to_vmem [thread:$0]  (!%p4764_p5), %s4811_s28, 16, %s1245_s16, [#allocation19]  }
  0xad   : > { %s1296_s0 = sshll.u32 %s5654_s8, 4  ;;  %s4486_s18 = smov [#allocation21]   ;;  %s4833_s0 = int_to_ptr.hbm [resolvable:$true] %s1296_s0 }
  0xae   : > { %s1274_s11 = sshll.u32 %s4486_s18, 4  ;;  %s4060_s7 = sshra.s32 %s4822_s15, 4  ;;  %s1275_s11 = int_to_ptr.vmem [resolvable:$true] %s1274_s11  ;;  %s4061_s7 = int_to_ptr.hbm [resolvable:$true] %s4060_s7 }
  0xaf   : > { %s4062_s22 = scalar_lea.hbm %s4061_s7, 1  ;;  %s4067_s1 = scalar_lea.hbm %s4703_s29, 1 }
  0xb0   : > { %p4063_p12 = scmp.ne.s32.totalorder %s4061_s7, %s4062_s22  ;;  %p4068_p1 = scmp.lt.s32.totalorder %s4061_s7, %s4703_s29 }
  0xb1   : > { %p4069_p4 = scmp.lt.s32.totalorder %s4067_s1, %s4062_s22 }
  0xb2   : > { %p4065_p13 = pnand %p4063_p12, %p4776_p7 }
  0xb3   : > { %p4070_p6 = por %p4069_p4, %p4068_p1 }
  0xb4   : > { %p4066_p0 = pneg %p4065_p13 }
  0xb6   : > { %p4071_p8 = pnand %p4070_p6, %p4066_p0 }
  0xb8   : > { %4074 = shalt.err (!%p4071_p8)
}
  0xb9   : > { %3696 = dma.hbm_to_vmem [thread:$0]  (!%p4764_p5), %s4822_s15, 16, %s1275_s11, [#allocation22]  }
  0xba   : > { %s4487_s28 = smov [#allocation24]   ;;  %s1059_s6 = sshll.u32 %s5656_s5, 4  ;;  %s1060_s6 = int_to_ptr.vmem [resolvable:$true] %s1059_s6 }
  0xbb   : > { %s1298_s16 = sshll.u32 %s4487_s28, 4  ;;  %s4090_s18 = sshra.s32 %s4833_s0, 4  ;;  %s1299_s16 = int_to_ptr.vmem [resolvable:$true] %s1298_s16  ;;  %s4091_s18 = int_to_ptr.hbm [resolvable:$true] %s4090_s18 }
  0xbc   : > { %s4092_s7 = scalar_lea.hbm %s4091_s18, 1  ;;  %s4097_s22 = scalar_lea.hbm %s5654_s8, 1 }
  0xbd   : > { %p4093_p9 = scmp.ne.s32.totalorder %s4091_s18, %s4092_s7  ;;  %p4098_p12 = scmp.lt.s32.totalorder %s4091_s18, %s5654_s8 }
  0xbe   : > { %p4099_p13 = scmp.lt.s32.totalorder %s4097_s22, %s4092_s7 }
  0xbf   : > { %p4095_p10 = pnand %p4093_p9, %p4776_p7 }
  0xc0   : > { %p4100_p0 = por %p4099_p13, %p4098_p12 }
  0xc1   : > { %p4096_p11 = pneg %p4095_p10 }
  0xc3   : > { %p4101_p1 = pnand %p4100_p0, %p4096_p11 }
  0xc5   : > { %4104 = shalt.err (!%p4101_p1)
}
  0xc6   : > { %3702 = dma.hbm_to_vmem [thread:$0]  (!%p4764_p5), %s4833_s0, 16, %s1299_s16, [#allocation25]  }
  0xc7   : > { %s1079_s15 = sshll.u32 %s5651_s13, 4  ;;  %s4120_s11 = sshra.s32 %s1060_s6, 4  ;;  %s4121_s11 = int_to_ptr.vmem [resolvable:$true] %s4120_s11  ;;  %s1080_s15 = int_to_ptr.vmem [resolvable:$true] %s1079_s15 }
  0xc8   : > { %s4122_s1 = scalar_lea.vmem %s4121_s11, 2  ;;  %s4127_s28 = scalar_lea.vmem %s5656_s5, 2 }
  0xc9   : > { %p4123_p4 = scmp.ne.s32.totalorder %s4121_s11, %s4122_s1  ;;  %p4128_p9 = scmp.lt.s32.totalorder %s4121_s11, %s5656_s5 }
  0xca   : > { %p4129_p10 = scmp.lt.s32.totalorder %s4127_s28, %s4122_s1 }
  0xcb   : > { %p4125_p6 = pnand %p4123_p4, %p4776_p7 }
  0xcc   : > { %p4130_p11 = por %p4129_p10, %p4128_p9 }
  0xcd   : > { %p4126_p8 = pneg %p4125_p6 }
  0xcf   : > { %p4131_p12 = pnand %p4130_p11, %p4126_p8 }
  0xd1   : > { %4134 = shalt.err (!%p4131_p12)
}
  0xd2   : > { %s4488_s18 = smov [#allocation2]   ;;  %s4135_s0 = sshra.s32 %s1080_s15, 4  ;;  %s4136_s0 = int_to_ptr.vmem [resolvable:$true] %s4135_s0 }
  0xd3   : > { %3660 = dma.vmem_to_smem (!%p4764_p5), %s1060_s6, 32, %s4488_s18, [#allocation4]  }
  0xd4   : > { %s4137_s16 = scalar_lea.vmem %s4136_s0, 2  ;;  %s4142_s7 = scalar_lea.vmem %s5651_s13, 2 }
  0xd5   : > { %p4138_p13 = scmp.ne.s32.totalorder %s4136_s0, %s4137_s16  ;;  %p4143_p4 = scmp.lt.s32.totalorder %s4136_s0, %s5651_s13 }
  0xd6   : > { %p4144_p6 = scmp.lt.s32.totalorder %s4142_s7, %s4137_s16 }
  0xd7   : > { %p4140_p0 = pnand %p4138_p13, %p4776_p7 }
  0xd8   : > { %p4145_p8 = por %p4144_p6, %p4143_p4 }
  0xd9   : > { %p4141_p1 = pneg %p4140_p0 }
  0xdb   : > { %p4146_p9 = pnand %p4145_p8, %p4141_p1 }
  0xdd   : > { %4149 = shalt.err (!%p4146_p9)
}
  0xde   : > { %s4489_s22 = smov [#allocation7]   ;;  %s1149_s6 = sshll.u32 %s4633_s20, 4  ;;  %s1150_s6 = int_to_ptr.hbm [resolvable:$true] %s1149_s6 }
  0xdf   : > { %3666 = dma.vmem_to_smem (!%p4764_p5), %s1080_s15, 32, %s4489_s22, [#allocation6]  }
  0xe0   : > { %s4490_s11 = smov [#allocation8]   ;;  %s1173_s28 = sshll.u32 %s5652_s12, 4  ;;  %s1174_s28 = int_to_ptr.hbm [resolvable:$true] %s1173_s28 }
  0xe1   : > { %s1151_s1 = sshll.u32 %s4490_s11, 4  ;;  %s4150_s18 = sshra.s32 %s1150_s6, 4  ;;  %s1152_s1 = int_to_ptr.vmem [resolvable:$true] %s1151_s1  ;;  %s4151_s18 = int_to_ptr.hbm [resolvable:$true] %s4150_s18 }
  0xe2   : > { %s4152_s0 = scalar_lea.hbm %s4151_s18, 1  ;;  %s4157_s16 = scalar_lea.hbm %s4633_s20, 1 }
  0xe3   : > { %p4153_p10 = scmp.ne.s32.totalorder %s4151_s18, %s4152_s0  ;;  %p4158_p13 = scmp.lt.s32.totalorder %s4151_s18, %s4633_s20 }
  0xe4   : > { %p4159_p0 = scmp.lt.s32.totalorder %s4157_s16, %s4152_s0 }
  0xe5   : > { %p4155_p11 = pnand %p4153_p10, %p4776_p7 }
  0xe6   : > { %p4160_p1 = por %p4159_p0, %p4158_p13 }
  0xe7   : > { %p4156_p12 = pneg %p4155_p11 }
  0xe9   : > { %p4161_p4 = pnand %p4160_p1, %p4156_p12 }
  0xeb   : > { %4164 = shalt.err (!%p4161_p4)
}
  0xec   : > { %3669 = dma.hbm_to_vmem [thread:$0]  (!%p4764_p5), %s1150_s6, 16, %s1152_s1, [#allocation3]  }
  0xed   : > { %s4491_s15 = smov [#allocation11]   ;;  %s1203_s22 = sshll.u32 %s4663_s24, 4  ;;  %s4874_s22 = int_to_ptr.hbm [resolvable:$true] %s1203_s22 }
  0xee   : > { %s1175_s7 = sshll.u32 %s4491_s15, 4  ;;  %s4180_s11 = sshra.s32 %s1174_s28, 4  ;;  %s1176_s7 = int_to_ptr.vmem [resolvable:$true] %s1175_s7  ;;  %s4181_s11 = int_to_ptr.hbm [resolvable:$true] %s4180_s11 }
  0xef   : > { %s4182_s18 = scalar_lea.hbm %s4181_s11, 1  ;;  %s4187_s0 = scalar_lea.hbm %s5652_s12, 1 }
  0xf0   : > { %p4183_p6 = scmp.ne.s32.totalorder %s4181_s11, %s4182_s18  ;;  %p4188_p10 = scmp.lt.s32.totalorder %s4181_s11, %s5652_s12 }
  0xf1   : > { %p4189_p11 = scmp.lt.s32.totalorder %s4187_s0, %s4182_s18 }
  0xf2   : > { %p4185_p8 = pnand %p4183_p6, %p4776_p7 }
  0xf3   : > { %p4190_p12 = por %p4189_p11, %p4188_p10 }
  0xf4   : > { %p4186_p9 = pneg %p4185_p8 }
  0xf6   : > { %p4191_p13 = pnand %p4190_p12, %p4186_p9 }
  0xf8   : > { %4194 = shalt.err (!%p4191_p13)
}
  0xf9   : > { %3675 = dma.hbm_to_vmem [thread:$0]  (!%p4764_p5), %s1174_s28, 16, %s1176_s7, [#allocation10]  }
  0xfa   : > { %s1230_s6 = sshll.u32 %s4678_s27, 4  ;;  %s4492_s1 = smov [#allocation14]   ;;  %s4883_s6 = int_to_ptr.hbm [resolvable:$true] %s1230_s6 }
  0xfb   : > { %s1205_s16 = sshll.u32 %s4492_s1, 4  ;;  %s4210_s15 = sshra.s32 %s4874_s22, 4  ;;  %s1206_s16 = int_to_ptr.vmem [resolvable:$true] %s1205_s16  ;;  %s4211_s15 = int_to_ptr.hbm [resolvable:$true] %s4210_s15 }
  0xfc   : > { %s4212_s11 = scalar_lea.hbm %s4211_s15, 1  ;;  %s4217_s18 = scalar_lea.hbm %s4663_s24, 1 }
  0xfd   : > { %p4213_p0 = scmp.ne.s32.totalorder %s4211_s15, %s4212_s11  ;;  %p4218_p6 = scmp.lt.s32.totalorder %s4211_s15, %s4663_s24 }
  0xfe   : > { %p4219_p8 = scmp.lt.s32.totalorder %s4217_s18, %s4212_s11 }
  0xff   : > { %p4215_p1 = pnand %p4213_p0, %p4776_p7 }
 0x100   : > { %p4220_p9 = por %p4219_p8, %p4218_p6 }
 0x101   : > { %p4216_p4 = pneg %p4215_p1 }
 0x103   : > { %p4221_p10 = pnand %p4220_p9, %p4216_p4 }
 0x105   : > { %4224 = shalt.err (!%p4221_p10)
}
 0x106   : > { %3681 = dma.hbm_to_vmem [thread:$0]  (!%p4764_p5), %s4874_s22, 16, %s1206_s16, [#allocation13]  }
 0x107   : > { %s4493_s28 = smov [#allocation17]   ;;  %s1257_s0 = sshll.u32 %s5650_s14, 4  ;;  %s4894_s0 = int_to_ptr.hbm [resolvable:$true] %s1257_s0 }
 0x108   : > { %s1232_s7 = sshll.u32 %s4493_s28, 4  ;;  %s4240_s1 = sshra.s32 %s4883_s6, 4  ;;  %s1233_s7 = int_to_ptr.vmem [resolvable:$true] %s1232_s7  ;;  %s4241_s1 = int_to_ptr.hbm [resolvable:$true] %s4240_s1 }
 0x109   : > { %s4242_s15 = scalar_lea.hbm %s4241_s1, 1  ;;  %s4247_s11 = scalar_lea.hbm %s4678_s27, 1 }
 0x10a   : > { %p4243_p11 = scmp.ne.s32.totalorder %s4241_s1, %s4242_s15  ;;  %p4248_p0 = scmp.lt.s32.totalorder %s4241_s1, %s4678_s27 }
 0x10b   : > { %p4249_p1 = scmp.lt.s32.totalorder %s4247_s11, %s4242_s15 }
 0x10c   : > { %p4245_p12 = pnand %p4243_p11, %p4776_p7 }
 0x10d   : > { %p4250_p4 = por %p4249_p1, %p4248_p0 }
 0x10e   : > { %p4246_p13 = pneg %p4245_p12 }
 0x110   : > { %p4251_p6 = pnand %p4250_p4, %p4246_p13 }
 0x112   : > { %4254 = shalt.err (!%p4251_p6)
}
 0x113   : > { %s5666_s22 = sld [smem:[#allocation70_spill]]  ;;  %s4494_s28 = smov [#allocation20]  }
 0x114   : > { %3687 = dma.hbm_to_vmem [thread:$0]  (!%p4764_p5), %s4883_s6, 16, %s1233_s7, [#allocation16]  }
 0x115   : > { %s1259_s4 = sshll.u32 %s4494_s28, 4  ;;  %s4270_s1 = sshra.s32 %s4894_s0, 4  ;;  %s1260_s4 = int_to_ptr.vmem [resolvable:$true] %s1259_s4  ;;  %s4271_s1 = int_to_ptr.hbm [resolvable:$true] %s4270_s1 }
 0x116   : > { %s4272_s15 = scalar_lea.hbm %s4271_s1, 1  ;;  %s4277_s11 = scalar_lea.hbm %s5650_s14, 1 }
 0x117   : > { %p4273_p8 = scmp.ne.s32.totalorder %s4271_s1, %s4272_s15  ;;  %p4278_p11 = scmp.lt.s32.totalorder %s4271_s1, %s5650_s14 }
 0x118   : > { %p4279_p12 = scmp.lt.s32.totalorder %s4277_s11, %s4272_s15 }
 0x119   : > { %s5667_s16 = smov %s5666_s22  ;;  %s1284_s18 = sshll.u32 %s5666_s22, 4  ;;  %s4905_s18 = int_to_ptr.hbm [resolvable:$true] %s1284_s18 }
 0x11a   : > { %p4275_p9 = pnand %p4273_p8, %p4776_p7  ;;  %p4280_p13 = por %p4279_p12, %p4278_p11 }
 0x11c   : > { %p4276_p10 = pneg %p4275_p9 }
 0x11e   : > { %p4281_p0 = pnand %p4280_p13, %p4276_p10 }
 0x120   : > { %4284 = shalt.err (!%p4281_p0)
}
 0x121   : > { %3693 = dma.hbm_to_vmem [thread:$0]  (!%p4764_p5), %s4894_s0, 16, %s1260_s4, [#allocation19]  }
 0x122   : > { %s4495_s6 = smov [#allocation23]   ;;  %s1307_s22 = sshll.u32 %s5655_s3, 4  ;;  %s4916_s22 = int_to_ptr.hbm [resolvable:$true] %s1307_s22 }
 0x123   : > { %s1286_s7 = sshll.u32 %s4495_s6, 4  ;;  %s4300_s28 = sshra.s32 %s4905_s18, 4  ;;  %s1287_s7 = int_to_ptr.vmem [resolvable:$true] %s1286_s7  ;;  %s4301_s28 = int_to_ptr.hbm [resolvable:$true] %s4300_s28 }
 0x124   : > { %s4302_s1 = scalar_lea.hbm %s4301_s28, 1  ;;  %s4307_s15 = scalar_lea.hbm %s5667_s16, 1 }
 0x125   : > { %p4303_p1 = scmp.ne.s32.totalorder %s4301_s28, %s4302_s1  ;;  %p4308_p8 = scmp.lt.s32.totalorder %s4301_s28, %s5667_s16 }
 0x126   : > { %p4309_p9 = scmp.lt.s32.totalorder %s4307_s15, %s4302_s1 }
 0x127   : > { %p4305_p4 = pnand %p4303_p1, %p4776_p7 }
 0x128   : > { %p4310_p10 = por %p4309_p9, %p4308_p8 }
 0x129   : > { %p4306_p6 = pneg %p4305_p4 }
 0x12b   : > { %p4311_p11 = pnand %p4310_p10, %p4306_p6 }
 0x12d   : > { %4314 = shalt.err (!%p4311_p11)
}
 0x12e   : > { %3699 = dma.hbm_to_vmem [thread:$0]  (!%p4764_p5), %s4905_s18, 16, %s1287_s7, [#allocation22]  }
 0x12f   : > { %s4496_s4 = smov [#allocation26]   ;;  %s1322_s11 = sshll.u32 %s4723_s25, 4  ;;  %s1323_s11 = int_to_ptr.hbm [resolvable:$true] %s1322_s11 }
 0x130   : > { %s1309_s0 = sshll.u32 %s4496_s4, 4  ;;  %s4330_s6 = sshra.s32 %s4916_s22, 4  ;;  %s1310_s0 = int_to_ptr.vmem [resolvable:$true] %s1309_s0  ;;  %s4331_s6 = int_to_ptr.hbm [resolvable:$true] %s4330_s6 }
 0x131   : > { %s4332_s28 = scalar_lea.hbm %s4331_s6, 32  ;;  %s4337_s1 = scalar_lea.hbm %s5655_s3, 32 }
 0x132   : > { %p4333_p12 = scmp.ne.s32.totalorder %s4331_s6, %s4332_s28  ;;  %p4338_p1 = scmp.lt.s32.totalorder %s4331_s6, %s5655_s3 }
 0x133   : > { %p4339_p4 = scmp.lt.s32.totalorder %s4337_s1, %s4332_s28 }
 0x134   : > { %p4335_p13 = pnand %p4333_p12, %p4776_p7 }
 0x135   : > { %p4340_p6 = por %p4339_p4, %p4338_p1 }
 0x136   : > { %p4336_p0 = pneg %p4335_p13 }
 0x138   : > { %p4341_p8 = pnand %p4340_p6, %p4336_p0 }
 0x13a   : > { %4344 = shalt.err (!%p4341_p8)
}
 0x13b   : > { %s4497_s15 = smov 128   ;;  %s4498_s18 = smov 8  }
 0x13c   : > { %3705 = dma.hbm_to_vmem [thread:$0]  (!%p4764_p5), %s4916_s22, 512, %s1310_s0, [#allocation25], %s4497_s15, %s4497_s15, %s4498_s18  }
 0x13d   : > { %s4499_s7 = smov [#allocation27]   ;;  %s4360_s5 = sshra.s32 %s1323_s11, 4  ;;  %s4361_s5 = int_to_ptr.hbm [resolvable:$true] %s4360_s5 }
 0x13e   : > { %s1324_s4 = sshll.u32 %s4499_s7, 4  ;;  %s4362_s6 = scalar_lea.hbm %s4361_s5, 1  ;;  %s1325_s4 = int_to_ptr.vmem [resolvable:$true] %s1324_s4 }
 0x13f   : > { %p4363_p9 = scmp.ne.s32.totalorder %s4361_s5, %s4362_s6  ;;  %s4367_s28 = scalar_lea.hbm %s4723_s25, 1 }
 0x140   : > { %p4368_p12 = scmp.lt.s32.totalorder %s4361_s5, %s4723_s25  ;;  %p4369_p13 = scmp.lt.s32.totalorder %s4367_s28, %s4362_s6 }
 0x141   : > { %p4365_p10 = pnand %p4363_p9, %p4776_p7 }
 0x142   : > { %p4370_p0 = por %p4369_p13, %p4368_p12 }
 0x143   : > { %p4366_p11 = pneg %p4365_p10 }
 0x145   : > { %p4371_p1 = pnand %p4370_p0, %p4366_p11 }
 0x147   : > { %4374 = shalt.err (!%p4371_p1)
}
 0x148   : > { %3708 = dma.hbm_to_vmem [thread:$0]  (!%p4764_p5), %s1323_s11, 16, %s1325_s4, [#allocation28]  }
 0x149   : > { %1337 = sbr.rel (%p4749_p3) target bundleno = 5968 (0x1750), region = 188 }
 0x14e   : > { %4395 = dma.done.wait (%p3709_p2), [#allocation4], 32  }
 0x14f   : > { %4397 = vsyncadd (%p3709_p2), [#allocation4], 4294967264 }
 0x150   : > { %4399 = dma.done.wait (%p3709_p2), [#allocation6], 64  }
 0x151   : > { %4401 = vsyncadd (%p3709_p2), [#allocation6], 4294967232 }
 0x152   : > { %4403 = dma.done.wait (%p3709_p2), [#allocation3], 16  }
 0x153   : > { %4405 = vsyncadd (%p3709_p2), [#allocation3], 4294967280 }
 0x154   : > { %4407 = dma.done.wait (%p3709_p2), [#allocation10], 32  }
 0x155   : > { %4409 = vsyncadd (%p3709_p2), [#allocation10], 4294967264 }
 0x156   : > { %4411 = dma.done.wait (%p3709_p2), [#allocation13], 32  }
 0x157   : > { %4413 = vsyncadd (%p3709_p2), [#allocation13], 4294967264 }
 0x158   : > { %4415 = dma.done.wait (%p3709_p2), [#allocation16], 32  }
 0x159   : > { %4417 = vsyncadd (%p3709_p2), [#allocation16], 4294967264 }
 0x15a   : > { %4419 = dma.done.wait (%p3709_p2), [#allocation19], 32  }
 0x15b   : > { %4421 = vsyncadd (%p3709_p2), [#allocation19], 4294967264 }
 0x15c   : > { %4423 = dma.done.wait (%p3709_p2), [#allocation22], 32  }
 0x15d   : > { %4425 = vsyncadd (%p3709_p2), [#allocation22], 4294967264 }
 0x15e   : > { %4427 = dma.done.wait (%p3709_p2), [#allocation25], 528  }
 0x15f   : > { %4429 = vsyncadd (%p3709_p2), [#allocation25], 4294966768 }
 0x160   : > { %4431 = dma.done.wait (%p3709_p2), [#allocation28], 16  }
 0x161   : > { %4433 = vsyncadd (%p3709_p2), [#allocation28], 4294967280 }
 0x162   : > { %1424 = sfence }
 0x163   : > { %s5668_s5 = sld [smem:[#allocation43_spill]]  ;;  %v1619_v2 = vlaneseq  ;;  %s4990_s26 = sshll.u32 %s4744_s23, 7  ;;  %vm1670_vm0 = vcmask 1040384   ;;  %vm1672_vm1 = vcmask 1041408   ;;  %vm1674_vm2 = vcmask 1042432  }
 0x164   : > { %s1631_s2 = sld [smem:[#allocation2 + %s4990_s26]]  ;;  %s4995_s10 = sadd.s32 1, %s4990_s26  ;;  %vm1676_vm3 = vcmask 1043456   ;;  %vm1678_vm5 = vcmask 1044480   ;;  %v4500_v11 = vmov 0.0   ;;  %vm1680_vm7 = vcmask 1045504  }
 0x165   : > { %s5001_s22 = sld [smem:[#allocation2 + %s4995_s10]]  ;;  %s5004_s0 = sadd.s32 2, %s4990_s26  ;;  %v5011_v5 = vand.u32 127, %v1619_v2  ;;  %vm5614_vm9 = vcmask 1046528   ;;  %vm1684_vm15 = vcmask 523264   ;;  %v4501_v38 = vmov 32.0  }
 0x166   : > { %s5014_s11 = sld [smem:[#allocation2 + %s5004_s0]]  ;;  %s5017_s1 = sadd.s32 3, %s4990_s26  ;;  %3847 = vrcp.f32 %v4501_v38 }
 0x167   : > { %s5023_s15 = sld [smem:[#allocation2 + %s5017_s1]]  ;;  %s5026_s18 = sadd.s32 4, %s4990_s26 }
 0x168   : > { %s5030_s7 = sld [smem:[#allocation2 + %s5026_s18]]  ;;  %s5033_s4 = sadd.s32 5, %s4990_s26 }
 0x169   : > { %v4984_v0 = vld [vmem:[%s5668_s5 + $0x38] sm:$0xff]  ;;  %v4987_v1 = vld [vmem:[%s5668_s5 + $0x30] sm:$0xff]  ;;  %v4998_v3 = vld [vmem:[%s5668_s5 + $0x28] sm:$0xff]  ;;  %s5039_s6 = sld [smem:[#allocation2 + %s5033_s4]]  ;;  %s5042_s28 = sadd.s32 6, %s4990_s26 }
 0x16a   : > { %1696 = vmatpush.msra.mxu0 %v4984_v0  ;;  %v5008_v4 = vld [vmem:[%s5668_s5 + $0x20] sm:$0xff]  ;;  %v5020_v6 = vld [vmem:[%s5668_s5 + $0x18] sm:$0xff]  ;;  %v5036_v7 = vld [vmem:[%s5668_s5 + $0x10] sm:$0xff]  ;;  %v1632_v8 = vstv %s1631_s2  ;;  %s5046_s3 = sld [smem:[#allocation2 + %s5042_s28]]  ;;  %s5049_s8 = sadd.s32 7, %s4990_s26 }
 0x16b   : > { %v5052_v9 = vld [vmem:[%s5668_s5 + $0x8] sm:$0xff]  ;;  %vm1633_vm4 = vcmp.eq.s32.totalorder %v5011_v5, %v1632_v8  ;;  %v1637_v10 = vstv %s5001_s22  ;;  %s5057_s9 = sld [smem:[#allocation2 + %s5049_s8]]  ;;  %v5072_v19 = vld [vmem:[%s5668_s5] sm:$0xff]  ;;  %p1521_p9 = scmp.lt.s32.totalorder %s4744_s23, 1 }
 0x16c   : > { %1697 = vmatpush.msra.mxu0 %v4987_v1  ;;  %v1634_v12 = vsel %vm1633_vm4, 1.0, %v4500_v11  ;;  %vm1638_vm6 = vcmp.eq.s32.totalorder %v5011_v5, %v1637_v10  ;;  %v1642_v13 = vstv %s5014_s11  ;;  %s5669_s2 = sld [smem:[#allocation44_spill]]  ;;  %vm1708_vm4 = vcmask 261120   ;;  %v3848_v39 = vpop.eup %3847 }
 0x16d   : > { %v1639_v14 = vsel %vm1638_vm6, 1.0, %v4500_v11  ;;  %vm1643_vm8 = vcmp.eq.s32.totalorder %v5011_v5, %v1642_v13  ;;  %v1647_v15 = vstv %s5023_s15  ;;  %v1713_v40 = vmul.f32 32.0, %v3848_v39  ;;  %s5672_s22 = sld [smem:[#allocation46_spill]]  ;;  %s5587_s15 = smov 104  }
 0x16e   : > { %1698 = vmatpush.msra.mxu0 %v4998_v3  ;;  %v1644_v16 = vsel %vm1643_vm8, 1.0, %v4500_v11  ;;  %vm1648_vm10 = vcmp.eq.s32.totalorder %v5011_v5, %v1647_v15  ;;  %v1652_v17 = vstv %s5030_s7  ;;  %v1671_v18 = vsel %vm1670_vm0, %v1634_v12, %v1639_v14  ;;  %s5673_s11 = sld [smem:[#allocation48_spill]]  ;;  %s5595_s7 = smov 120  }
 0x16f   : > { %v1649_v20 = vsel %vm1648_vm10, 1.0, %v4500_v11  ;;  %vm1653_vm11 = vcmp.eq.s32.totalorder %v5011_v5, %v1652_v17  ;;  %v1657_v21 = vstv %s5039_s6  ;;  %v1673_v22 = vsel %vm1672_vm1, %v1671_v18, %v1644_v16  ;;  %s5597_s6 = smov 112   ;;  %s3131_s12 = sld [smem:[#allocation5 + %s5017_s1]] }
 0x170   : > { %1699 = vmatpush.msra.mxu0 %v5008_v4  ;;  %v1654_v23 = vsel %vm1653_vm11, 1.0, %v4500_v11  ;;  %vm1658_vm12 = vcmp.eq.s32.totalorder %v5011_v5, %v1657_v21  ;;  %v1662_v24 = vstv %s5046_s3  ;;  %v1675_v25 = vsel %vm1674_vm2, %v1673_v22, %v1649_v20  ;;  %s5671_s3 = sld [smem:[#allocation45_spill]] }
 0x171   : > { %v1659_v26 = vsel %vm1658_vm12, 1.0, %v4500_v11  ;;  %vm1663_vm13 = vcmp.eq.s32.totalorder %v5011_v5, %v1662_v24  ;;  %v1667_v27 = vstv %s5057_s9  ;;  %v1677_v28 = vsel %vm1676_vm3, %v1675_v25, %v1654_v23  ;;  %s5670_s9 = sld [smem:[#allocation47_spill]] }
 0x172   : > { %1700 = vmatpush.msra.mxu0 %v5020_v6  ;;  %v1664_v29 = vsel %vm1663_vm13, 1.0, %v4500_v11  ;;  %vm1668_vm14 = vcmp.eq.s32.totalorder %v5011_v5, %v1667_v27  ;;  %v1679_v30 = vsel %vm1678_vm5, %v1677_v28, %v1659_v26  ;;  %v5096_v34 = vld [vmem:[%s5669_s2] sm:$0xff]  ;;  %v1714_v41 = vsub.f32 1.0, %v1713_v40  ;;  %s5583_s2 = smov 96   ;;  %s5476_s14 = sld [smem:[#allocation7 + %s5042_s28]] }
 0x173   : > { %v1669_v31 = vsel %vm1668_vm14, 1.0, %v4500_v11  ;;  %v1681_v32 = vsel %vm1680_vm7, %v1679_v30, %v1664_v29  ;;  %vm1717_vm6 = vweird.f32 %v3848_v39  ;;  %v5113_v14 = vld [vmem:[%s5672_s22] ss:$0 sm:$0xff]  ;;  %vm1787_vm12 = vcmask 64512  }
 0x174   : > { %1701 = vmatpush.msra.mxu0 %v5036_v7  ;;  %v1683_v33 = vsel %vm5614_vm9, %v1681_v32, %v1669_v31  ;;  %v1715_v42 = vmul.f32 %v3848_v39, %v1714_v41  ;;  %v3825_v18 = vld [vmem:[%s5673_s11] ss:$0 sm:$0xff]  ;;  %s5585_s11 = smov 64  }
 0x176   : > { %1702 = vmatpush.msra.mxu0 %v5052_v9  ;;  %v1716_v43 = vadd.f32 %v3848_v39, %v1715_v42  ;;  %v5110_v10 = vld [vmem:[%s5671_s3] ss:$0 sm:$0xff]  ;;  %s5674_s3 = sld [smem:[#allocation42_spill]] }
 0x177   : > { %v1543_v50 = vld [vmem:[%s5670_s9 + $0x10] sm:$0xff]  ;;  %v1544_v51 = vld [vmem:[%s5670_s9 + $0x18] sm:$0xff]  ;;  %v1541_v53 = vld [vmem:[%s5670_s9] sm:$0xff] }
 0x178   : > { %1703 = vmatpush.msra.mxu0 %v5072_v19  ;;  %v5100_v44 = vsel %vm1717_vm6, %v3848_v39, %v1716_v43  ;;  %v1748_v52 = vpack.c.bf16 %v1544_v51, %v1543_v50  ;;  %v1542_v54 = vld [vmem:[%s5670_s9 + $0x8] sm:$0xff]  ;;  %s5691_s9 = smov 24   ;;  %p3160_p6 = scmp.ne.s32.totalorder %s5476_s14, 0 }
 0x179   : > { %3544 = vmatmul.msk.f32.vlgmr.msra.gmra.mxu0 %vm1684_vm15, %v1683_v33  ;;  %v1747_v55 = vpack.c.bf16 %v1542_v54, %v1541_v53  ;;  %s3171_s14 = sld [smem:[#allocation5 + %s5049_s8]] }
 0x17a   : > { %1761 = vmatpush.bf16.msra.mxu1 %v1748_v52 }
 0x17c   : > { %s1621_s22 = scalar_lea.vmem %s5674_s3, %s4744_s23  ;;  %s2168_s3 = sld [smem:[#allocation5 + %s4990_s26]] }
 0x17d   : > { %v5142_v43 = vld [vmem:[%s1621_s22] sm:$0x1]  ;;  %s2172_s22 = sld [smem:[#allocation5 + %s4995_s10]]  ;;  %s5719_s23 = smov (!%p1521_p9, %s4744_s23), 1 }
 0x17e   : > { %1762 = vmatpush.bf16.msra.mxu1 %v1747_v55  ;;  %s2180_s26 = sld [smem:[#allocation5 + %s5017_s1]] }
 0x1f6   : > { %v1705_v35 = vpop.f32.mrf.mxu0 }
 0x1f7   : > { %v1706_v36 = vadd.f32 %v1705_v35, %v5096_v34 }
 0x1f9   : > { %v1709_v37 = vsel %vm1708_vm4, %v1706_v36, 0.0 }
 0x1fa   : > { %1710 = vadd.xlane.f32.xlu0 %v1709_v37 }
 0x26d   : > { %v1711_v45 = vpop.xlane.xlu0 %1710 }
 0x26e   : > { %v1719_v46 = vmul.f32 %v5100_v44, %v1711_v45  ;;  %v1623_v45 = vsub.f32 1.0, %v5142_v43 }
 0x270   : > { %v1720_v47 = vsub.f32 %v1706_v36, %v1719_v46  ;;  %v1624_v46 = vmul.f32 -10000.0, %v1623_v45 }
 0x272   : > { %v1721_v48 = vmul.f32 %v1720_v47, %v1720_v47 }
 0x274   : > { %v1722_v49 = vsel %vm1708_vm4, %v1721_v48, 0.0 }
 0x275   : > { %1723 = vadd.xlane.f32.xlu0 %v1722_v49  ;;  %v1883_v49 = vperm.slane %v1624_v46, 0 }
 0x2e8   : > { %v1724_v56 = vpop.xlane.xlu0 %1723 }
 0x2e9   : > { %v1725_v57 = vmul.f32 %v1724_v56, %v5100_v44 }
 0x2eb   : > { %v1726_v58 = vadd.f32 1e-05, %v1725_v57 }
 0x2ed   : > { %3849 = vrsqrt.f32 %v1726_v58  ;;  %vm1733_vm10 = vweird.f32 %v1726_v58 }
 0x2f3   : > { %v3850_v59 = vpop.eup %3849 }
 0x2f4   : > { %v1728_v60 = vmul.f32 %v3850_v59, %v1726_v58  ;;  %vm1734_vm8 = vweird.f32 %v3850_v59 }
 0x2f5   : > { %vm1735_vm11 = vmor %vm1733_vm10, %vm1734_vm8 }
 0x2f6   : > { %v1729_v61 = vmul.f32 %v3850_v59, %v1728_v60 }
 0x2f8   : > { %v1730_v62 = vmul.f32 0.5, %v1729_v61 }
 0x2fa   : > { %v1731_v63 = vsub.f32 1.5, %v1730_v62 }
 0x2fc   : > { %v1732_v8 = vmul.f32 %v3850_v59, %v1731_v63 }
 0x2fe   : > { %v1736_v12 = vsel %vm1735_vm11, %v3850_v59, %v1732_v8 }
 0x2ff   : > { %v1737_v13 = vmul.f32 %v1736_v12, %v1720_v47 }
 0x301   : > { %v1741_v15 = vmul.f32 %v5110_v10, %v1737_v13 }
 0x303   : > { %v5117_v16 = vadd.f32 %v5113_v14, %v1741_v15 }
 0x305   : > { %v1746_v17 = vpack.c.bf16 %v5117_v16, %v5117_v16 }
 0x307   : > { %3545 = vmatmul.msk.bf16.vlgmr.msra.gmra.mxu1 %vm1708_vm4, %v1746_v17 }
 0x384   : > { %v1764_v20 = vpop.f32.mrf.mxu1 }
 0x385   : > { %v1765_v21 = vadd.f32 %v3825_v18, %v1764_v20 }
 0x387   : > { %1775 = vrot.lane.b32.xlu2 %v1765_v21, %s5587_s15  ;;  %1769 = vrot.lane.b32.xlu1 %v1765_v21, %s5595_s7  ;;  %v1778_v22 = vpack.c.bf16 %v1765_v21, %v1765_v21  ;;  %s2188_s15 = sld [smem:[#allocation5 + %s5033_s4]] }
 0x389   : > { %v1783_v23 = vunpack.c.l.b16 %v1778_v22 }
 0x38b   : > { %v5125_v25 = vpack.c.b16 %v1783_v23, %v1783_v23 }
 0x38c   : > { %v1766_v24 = vpop.f32.mrf.mxu1 }
 0x38f   : > { %1772 = vrot.lane.b32.xlu1 %v1765_v21, %s5597_s6  ;;  %1785 = vrot.lane.b32.xlu2 %v5125_v25, %s5583_s2 }
 0x3e1   : > { %v1776_v26 = vpop.permute.xlu2 %1775 }
 0x3e2   : > { %v1781_v27 = vpack.c.bf16 %v1776_v26, %v1776_v26 }
 0x3e4   : > { %v1856_v28 = vunpack.c.l.b16 %v1781_v27 }
 0x3e6   : > { %v5130_v29 = vpack.c.b16 %v1856_v28, %v1856_v28 }
 0x3e8   : > { %1858 = vrot.lane.b32.xlu2 %v5130_v29, %s5583_s2 }
 0x3e9   : > { %v1786_v30 = vpop.permute.xlu2 %1785 }
 0x3ea   : > { %v1792_v31 = vsel %vm1787_vm12, %v1786_v30, 0 }
 0x3eb   : > { %1801 = vmatpush.bf16.xpose.msra.mxu3 %v1792_v31 }
 0x3f2   : > { %3546 = vmatmul.msk.bf16.vlgmr.msra.gmra.mxu3 %vm1787_vm12, %v1778_v22 }
 0x3f9   : > { %v1770_v32 = vpop.permute.xlu1 %1769 }
 0x3fa   : > { %v1779_v33 = vpack.c.bf16 %v1770_v32, %v1770_v32 }
 0x3fc   : > { %v1808_v35 = vunpack.c.l.b16 %v1779_v33 }
 0x3fe   : > { %v1809_v36 = vpack.c.b16 %v1808_v35, %v1808_v35 }
 0x400   : > { %1810 = vrot.lane.b32.xlu0 %v1809_v36, %s5583_s2 }
 0x401   : > { %v1773_v37 = vpop.permute.xlu1 %1772 }
 0x402   : > { %v1780_v38 = vpack.c.bf16 %v1773_v37, %v1773_v37 }
 0x404   : > { %v1832_v39 = vunpack.c.l.b16 %v1780_v38 }
 0x406   : > { %v1833_v40 = vpack.c.b16 %v1832_v39, %v1832_v39 }
 0x408   : > { %1834 = vrot.lane.b32.xlu1 %v1833_v40, %s5583_s2  ;;  %s2176_s2 = sld [smem:[#allocation5 + %s5004_s0]] }
 0x442   : > { %v1859_v41 = vpop.permute.xlu2 %1858 }
 0x443   : > { %v1864_v42 = vsel %vm1787_vm12, %v1859_v41, 0 }
 0x444   : > { %1873 = vmatpush.bf16.xpose.msrb.mxu1 %v1864_v42 }
 0x44b   : > { %3549 = vmatmul.msk.bf16.vlgmr.msrb.gmra.mxu1 %vm1787_vm12, %v1781_v27 }
 0x472   : > { %v1811_v47 = vpop.permute.xlu0 %1810 }
 0x473   : > { %v1816_v48 = vsel %vm1787_vm12, %v1811_v47, 0 }
 0x474   : > { %1825 = vmatpush.bf16.xpose.msrb.mxu3 %v1816_v48 }
 0x475   : > { %v1803_v50 = vpop.f32.mrf.mxu3 }
 0x476   : > { %v1879_v51 = vmul.f32 0.35355338, %v1803_v50 }
 0x478   : > { %v1884_v52 = vadd.f32 %v1883_v49, %v1879_v51 }
 0x47a   : > { %v1835_v53 = vpop.permute.xlu1 %1834  ;;  %v1888_v21 = vsel %vm1787_vm12, %v1884_v52, -inf }
 0x47b   : > { %3547 = vmatmul.msk.bf16.vlgmr.msrb.gmra.mxu3 %vm1787_vm12, %v1779_v33  ;;  %v1840_v54 = vsel %vm1787_vm12, %v1835_v53, 0 }
 0x47c   : > { %1849 = vmatpush.bf16.xpose.msrb.mxu0 %v1840_v54 }
 0x47d   : > { %v1805_v55 = vpop.f32.mrf.mxu3 }
 0x483   : > { %3548 = vmatmul.msk.bf16.vlgmr.msrb.gmra.mxu0 %vm1787_vm12, %v1780_v38 }
 0x4c8   : > { %v1875_v56 = vpop.f32.mrf.mxu1 }
 0x4c9   : > { %v1882_v57 = vmul.f32 0.35355338, %v1875_v56 }
 0x4cb   : > { %v1887_v58 = vadd.f32 %v1883_v49, %v1882_v57 }
 0x4cd   : > { %v1897_v59 = vsel %vm1787_vm12, %v1887_v58, -inf }
 0x4ce   : > { %1898 = vmax.xlane.f32.xlu0 %v1897_v59 }
 0x4d0   : > { %v1877_v60 = vpop.f32.mrf.mxu1 }
 0x4e2   : > { %1957 = vrot.lane.b32.xlu0 %v1809_v36, %s5585_s11 }
 0x4fe   : > { %v1827_v61 = vpop.f32.mrf.mxu3 }
 0x4ff   : > { %v1880_v62 = vmul.f32 0.35355338, %v1827_v61 }
 0x500   : > { %v1851_v63 = vpop.f32.mrf.mxu0 }
 0x501   : > { %v1881_v8 = vmul.f32 0.35355338, %v1851_v63  ;;  %v1885_v12 = vadd.f32 %v1883_v49, %v1880_v62  ;;  %v2169_v62 = vstv %s2168_s3  ;;  %v2173_v63 = vstv %s2172_s22  ;;  %s2192_s3 = sld [smem:[#allocation5 + %s5042_s28]]  ;;  %s5591_s22 = smov 8  }
 0x502   : > { %vm2170_vm13 = vcmp.eq.s32.totalorder %v5011_v5, %v2169_v62  ;;  %vm2174_vm14 = vcmp.eq.s32.totalorder %v5011_v5, %v2173_v63 }
 0x503   : > { %v1891_v13 = vsel %vm1787_vm12, %v1885_v12, -inf  ;;  %v1886_v15 = vadd.f32 %v1883_v49, %v1881_v8 }
 0x504   : > { %1892 = vmax.xlane.f32.xlu1 %v1891_v13  ;;  %v2177_v13 = vstv %s2176_s2  ;;  %s2196_s2 = sld [smem:[#allocation5 + %s5049_s8]] }
 0x505   : > { %v1894_v17 = vsel %vm1787_vm12, %v1886_v15, -inf  ;;  %vm2178_vm6 = vcmp.eq.s32.totalorder %v5011_v5, %v2177_v13 }
 0x506   : > { %1895 = vmax.xlane.f32.xlu2 %v1894_v17  ;;  %v1829_v18 = vpop.f32.mrf.mxu3 }
 0x507   : > { %v2171_v18 = vsel %vm2170_vm13, 1.0, %v4500_v11 }
 0x508   : > { %v1853_v20 = vpop.f32.mrf.mxu0 }
 0x509   : > { %v2175_v20 = vsel %vm2174_vm14, 1.0, %v4500_v11 }
 0x50e   : > { %1889 = vmax.xlane.f32.xlu2 %v1888_v21  ;;  %v2181_v21 = vstv %s2180_s26  ;;  %s5589_s26 = smov 24  }
 0x50f   : > { %vm2182_vm8 = vcmp.eq.s32.totalorder %v5011_v5, %v2181_v21 }
 0x526   : > { %1978 = vrot.lane.b32.xlu2 %v1833_v40, %s5585_s11 }
 0x541   : > { %v1899_v22 = vpop.xlane.xlu0 %1898 }
 0x542   : > { %v1903_v23 = vsub.f32 %v1887_v58, %v1899_v22 }
 0x544   : > { %v1910_v24 = vmul.f32 1.442695, %v1903_v23 }
 0x546   : > { %3851 = vpow2.f32 %v1910_v24  ;;  %v2179_v24 = vsel %vm2178_vm6, 1.0, %v4500_v11  ;;  %vm2033_vm6 = vcmask 130048  }
 0x54c   : > { %v5157_v26 = vpop.eup %3851 }
 0x54d   : > { %v1921_v27 = vsel %vm1787_vm12, %v5157_v26, 0.0 }
 0x54e   : > { %1922 = vadd.xlane.f32.xlu1 %v1921_v27 }
 0x554   : > { %v1958_v28 = vpop.permute.xlu0 %1957 }
 0x555   : > { %v1963_v30 = vsel %vm1676_vm3, %v1958_v28, 0  ;;  %v2200_v28 = vsel %vm1670_vm0, %v2171_v18, %v2175_v20 }
 0x556   : > { %1972 = vmatpush.bf16.msra.mxu3 %v1963_v30 }
 0x577   : > { %v1893_v31 = vpop.xlane.xlu1 %1892 }
 0x578   : > { %v1901_v32 = vsub.f32 %v1885_v12, %v1893_v31 }
 0x579   : > { %v1896_v33 = vpop.xlane.xlu2 %1895 }
 0x57a   : > { %v1906_v35 = vmul.f32 1.442695, %v1901_v32  ;;  %v1902_v36 = vsub.f32 %v1886_v15, %v1896_v33  ;;  %v2189_v32 = vstv %s2188_s15  ;;  %v2201_v33 = vsel %vm1672_vm1, %v2200_v28, %v2179_v24  ;;  %s5593_s15 = smov 16  }
 0x57b   : > { %vm2190_vm11 = vcmp.eq.s32.totalorder %v5011_v5, %v2189_v32 }
 0x57c   : > { %3853 = vpow2.f32 %v1906_v35  ;;  %v1908_v37 = vmul.f32 1.442695, %v1902_v36  ;;  %v2193_v36 = vstv %s2192_s3  ;;  %s5676_s3 = sld [smem:[#allocation50_spill]] }
 0x57d   : > { %vm2194_vm13 = vcmp.eq.s32.totalorder %v5011_v5, %v2193_v36 }
 0x57e   : > { %3855 = vpow2.f32 %v1908_v37 }
 0x581   : > { %v1890_v38 = vpop.xlane.xlu2 %1889 }
 0x582   : > { %v3854_v39 = vpop.eup %3853  ;;  %v1900_v40 = vsub.f32 %v1884_v52, %v1890_v38  ;;  %v2197_v38 = vstv %s2196_s2  ;;  %s5677_s2 = sld [smem:[#allocation59_spill]] }
 0x583   : > { %v1915_v41 = vsel %vm1787_vm12, %v3854_v39, 0.0  ;;  %vm2198_vm14 = vcmp.eq.s32.totalorder %v5011_v5, %v2197_v38 }
 0x584   : > { %v3856_v42 = vpop.eup %3855  ;;  %v1904_v46 = vmul.f32 1.442695, %v1900_v40  ;;  %1916 = vadd.xlane.f32.xlu1 %v1915_v41 }
 0x585   : > { %v1918_v47 = vsel %vm1787_vm12, %v3856_v42, 0.0 }
 0x586   : > { %3857 = vpow2.f32 %v1904_v46  ;;  %1919 = vadd.xlane.f32.xlu2 %v1918_v47 }
 0x588   : > { %v1571_v21 = vld [vmem:[%s5677_s2 + $0x10] sm:$0xff]  ;;  %v1569_v28 = vld [vmem:[%s5677_s2] sm:$0xff] }
 0x589   : > { %v1979_v48 = vpop.permute.xlu2 %1978 }
 0x58a   : > { %v1984_v49 = vsel %vm1676_vm3, %v1979_v48, 0 }
 0x58b   : > { %1993 = vmatpush.bf16.msra.mxu0 %v1984_v49 }
 0x58c   : > { %v3858_v50 = vpop.eup %3857 }
 0x58d   : > { %v1912_v51 = vsel %vm1787_vm12, %v3858_v50, 0.0 }
 0x58e   : > { %1913 = vadd.xlane.f32.xlu0 %v1912_v51 }
 0x59d   : > { %1999 = vrot.lane.b32.xlu1 %v5130_v29, %s5585_s11 }
 0x59e   : > { %1936 = vrot.lane.b32.xlu2 %v5125_v25, %s5585_s11  ;;  %s2184_s11 = sld [smem:[#allocation5 + %s5026_s18]] }
 0x5a4   : > { %v2185_v27 = vstv %s2184_s11  ;;  %s5675_s11 = sld [smem:[#allocation49_spill]] }
 0x5a5   : > { %vm2186_vm10 = vcmp.eq.s32.totalorder %v5011_v5, %v2185_v27 }
 0x5a6   : > { %v2187_v35 = vsel %vm2186_vm10, 1.0, %v4500_v11 }
 0x5c1   : > { %v1923_v52 = vpop.xlane.xlu1 %1922 }
 0x5f7   : > { %v1917_v53 = vpop.xlane.xlu1 %1916 }
 0x5f8   : > { %3859 = vrcp.f32 %v1917_v53  ;;  %v1549_v53 = vld [vmem:[%s5675_s11 + $0x18] sm:$0xff] }
 0x5f9   : > { %v1920_v54 = vpop.xlane.xlu2 %1919 }
 0x5fa   : > { %3861 = vrcp.f32 %v1920_v54 }
 0x5fe   : > { %v3860_v55 = vpop.eup %3859 }
 0x5ff   : > { %v1929_v56 = vmul.f32 %v3860_v55, %v3854_v39  ;;  %v1546_v55 = vld [vmem:[%s5675_s11] sm:$0xff] }
 0x600   : > { %v3862_v57 = vpop.eup %3861 }
 0x601   : > { %v1933_v58 = vpack.c.bf16 %v1929_v56, %v1929_v56  ;;  %v1930_v59 = vmul.f32 %v3862_v57, %v3856_v42  ;;  %v1914_v60 = vpop.xlane.xlu0 %1913  ;;  %v1937_v29 = vpop.permute.xlu2 %1936  ;;  %v1547_v56 = vld [vmem:[%s5675_s11 + $0x8] sm:$0xff] }
 0x602   : > { %3863 = vrcp.f32 %v1914_v60  ;;  %v1942_v25 = vsel %vm1676_vm3, %v1937_v29, 0  ;;  %v2038_v57 = vpack.c.bf16 %v1547_v56, %v1546_v55 }
 0x603   : > { %v1934_v61 = vpack.c.bf16 %v1930_v59, %v1930_v59  ;;  %1951 = vmatpush.bf16.msra.mxu2 %v1942_v25  ;;  %3551 = vmatmul.msk.bf16.vlgmr.msra.gmra.mxu3 %vm1787_vm12, %v1933_v58  ;;  %3865 = vrcp.f32 %v1923_v52  ;;  %v1548_v52 = vld [vmem:[%s5675_s11 + $0x10] sm:$0xff]  ;;  %s5692_s11 = sld [smem:[#allocation65_spill]] }
 0x604   : > { %v2039_v54 = vpack.c.bf16 %v1549_v53, %v1548_v52 }
 0x605   : > { %3552 = vmatmul.msk.bf16.vlgmr.msra.gmra.mxu0 %vm1787_vm12, %v1934_v61 }
 0x607   : > { %2052 = vmatpush.bf16.msrb.mxu2 %v2039_v54 }
 0x608   : > { %v3864_v8 = vpop.eup %3863 }
 0x609   : > { %v1928_v12 = vmul.f32 %v3864_v8, %v3858_v50  ;;  %v3866_v15 = vpop.eup %3865 }
 0x60a   : > { %v1931_v22 = vmul.f32 %v3866_v15, %v5157_v26  ;;  %v2183_v26 = vsel %vm2182_vm8, 1.0, %v4500_v11  ;;  %vm2035_vm8 = vcmask 195584   ;;  %v3826_v15 = vld [vmem:[%s5676_s3] ss:$0 sm:$0xff]  ;;  %s5678_s3 = sld [smem:[#allocation60_spill]] }
 0x60b   : > { %v1932_v17 = vpack.c.bf16 %v1928_v12, %v1928_v12  ;;  %v2202_v37 = vsel %vm1674_vm2, %v2201_v33, %v2183_v26  ;;  %2053 = vmatpush.bf16.msrb.mxu2 %v2038_v57 }
 0x60c   : > { %v1935_v31 = vpack.c.bf16 %v1931_v22, %v1931_v22  ;;  %v2203_v39 = vsel %vm1676_vm3, %v2202_v37, %v2187_v35  ;;  %v1572_v22 = vld [vmem:[%s5677_s2 + $0x18] sm:$0xff] }
 0x60d   : > { %3550 = vmatmul.msk.bf16.vlgmr.msra.gmra.mxu2 %vm1787_vm12, %v1932_v17  ;;  %v2256_v24 = vpack.c.bf16 %v1572_v22, %v1571_v21 }
 0x60f   : > { %v2000_v23 = vpop.permute.xlu1 %1999  ;;  %2269 = vmatpush.bf16.msra.mxu2 %v2256_v24 }
 0x610   : > { %v2005_v30 = vsel %vm1676_vm3, %v2000_v23, 0 }
 0x611   : > { %2014 = vmatpush.bf16.msra.mxu1 %v2005_v30  ;;  %v1570_v30 = vld [vmem:[%s5677_s2 + $0x8] sm:$0xff]  ;;  %s5689_s2 = sld [smem:[#allocation61_spill]] }
 0x614   : > { %3553 = vmatmul.msk.bf16.vlgmr.msra.gmra.mxu1 %vm1787_vm12, %v1935_v31  ;;  %v2255_v31 = vpack.c.bf16 %v1570_v30, %v1569_v28 }
 0x615   : > { %2218 = vmatpush.msrb.mxu1 %v4984_v0  ;;  %v2191_v0 = vsel %vm2190_vm11, 1.0, %v4500_v11 }
 0x616   : > { %v2204_v40 = vsel %vm1678_vm5, %v2203_v39, %v2191_v0  ;;  %2270 = vmatpush.bf16.msra.mxu2 %v2255_v31 }
 0x617   : > { %2219 = vmatpush.msrb.mxu1 %v4987_v1  ;;  %v2195_v1 = vsel %vm2194_vm13, 1.0, %v4500_v11 }
 0x618   : > { %v2205_v41 = vsel %vm1680_vm7, %v2204_v40, %v2195_v1 }
 0x619   : > { %2220 = vmatpush.msrb.mxu1 %v4998_v3  ;;  %v2199_v3 = vsel %vm2198_vm14, 1.0, %v4500_v11 }
 0x61b   : > { %2221 = vmatpush.msrb.mxu1 %v5008_v4  ;;  %v2206_v4 = vsel %vm5614_vm9, %v2205_v41, %v2199_v3 }
 0x61d   : > { %2222 = vmatpush.msrb.mxu1 %v5020_v6 }
 0x61f   : > { %2223 = vmatpush.msrb.mxu1 %v5036_v7 }
 0x621   : > { %2224 = vmatpush.msrb.mxu1 %v5052_v9 }
 0x623   : > { %2225 = vmatpush.msrb.mxu1 %v5072_v19 }
 0x624   : > { %3557 = vmatmul.msk.f32.vlgmr.msrb.gmra.mxu1 %vm1684_vm15, %v2206_v4 }
 0x682   : > { %v1995_v6 = vpop.f32.mrf.mxu0 }
 0x683   : > { %2025 = vrot.lane.b32.xlu2 %v1995_v6, %s5593_s15  ;;  %s5681_s15 = smov 96  }
 0x686   : > { %v1974_v42 = vpop.f32.mrf.mxu3 }
 0x687   : > { %2021 = vrot.lane.b32.xlu1 %v1974_v42, %s5591_s22  ;;  %s5680_s22 = smov 104  }
 0x68a   : > { %v1997_v7 = vpop.f32.mrf.mxu0 }
 0x68e   : > { %v1976_v46 = vpop.f32.mrf.mxu3 }
 0x690   : > { %v1953_v9 = vpop.f32.mrf.mxu2 }
 0x691   : > { %v2016_v19 = vpop.f32.mrf.mxu1 }
 0x692   : > { %2029 = vrot.lane.b32.xlu1 %v2016_v19, %s5589_s26  ;;  %s5679_s26 = sld [smem:[#allocation53_spill]] }
 0x698   : > { %v1955_v47 = vpop.f32.mrf.mxu2  ;;  %v1553_v53 = vld [vmem:[%s5679_s26] sm:$0xff]  ;;  %v1554_v54 = vld [vmem:[%s5679_s26 + $0x8] sm:$0xff] }
 0x699   : > { %v2018_v48 = vpop.f32.mrf.mxu1  ;;  %v2091_v55 = vpack.c.bf16 %v1554_v54, %v1553_v53 }
 0x6a1   : > { %v2227_v49 = vpop.f32.mrf.mxu1 }
 0x6a2   : > { %v2228_v50 = vadd.f32 %v2227_v49, %v5096_v34 }
 0x6a4   : > { %v2230_v51 = vsel %vm1708_vm4, %v2228_v50, 0.0 }
 0x6ac   : > { %2231 = vadd.xlane.f32.xlu2 %v2230_v51  ;;  %v1556_v51 = vld [vmem:[%s5679_s26 + $0x18] sm:$0xff] }
 0x6dd   : > { %v2026_v60 = vpop.permute.xlu2 %2025 }
 0x6f9   : > { %v2022_v58 = vpop.permute.xlu1 %2021 }
 0x6fa   : > { %v2032_v59 = vsel %vm1787_vm12, %v1953_v9, %v2022_v58 }
 0x6fb   : > { %v2034_v29 = vsel %vm2033_vm6, %v2032_v59, %v2026_v60 }
 0x704   : > { %v2030_v34 = vpop.permute.xlu1 %2029 }
 0x705   : > { %v2036_v25 = vsel %vm2035_vm8, %v2034_v29, %v2030_v34 }
 0x706   : > { %v2037_v61 = vpack.c.bf16 %v2036_v25, %v2036_v25 }
 0x708   : > { %3554 = vmatmul.msk.bf16.vlgmr.msrb.gmra.mxu2 %vm1708_vm4, %v2037_v61 }
 0x71f   : > { %v2232_v62 = vpop.xlane.xlu2 %2231 }
 0x720   : > { %v2233_v63 = vmul.f32 %v2232_v62, %v5100_v44 }
 0x722   : > { %v2234_v8 = vsub.f32 %v2228_v50, %v2233_v63  ;;  %v1555_v50 = vld [vmem:[%s5679_s26 + $0x10] sm:$0xff] }
 0x723   : > { %v2092_v52 = vpack.c.bf16 %v1556_v51, %v1555_v50 }
 0x724   : > { %v2235_v12 = vmul.f32 %v2234_v8, %v2234_v8 }
 0x725   : > { %2105 = vmatpush.bf16.msrb.mxu3 %v2092_v52 }
 0x726   : > { %v2236_v13 = vsel %vm1708_vm4, %v2235_v12, 0.0 }
 0x727   : > { %2237 = vadd.xlane.f32.xlu1 %v2236_v13 }
 0x729   : > { %2106 = vmatpush.bf16.msrb.mxu3 %v2091_v55 }
 0x78b   : > { %v2055_v17 = vpop.f32.mrf.mxu2 }
 0x78c   : > { %v2056_v18 = vadd.f32 %v3826_v15, %v2055_v17 }
 0x78e   : > { %v2059_v20 = vadd.f32 %v2056_v18, %v5117_v16 }
 0x790   : > { %v2060_v23 = vsel %vm1708_vm4, %v2059_v20, 0.0 }
 0x791   : > { %2061 = vadd.xlane.f32.xlu0 %v2060_v23 }
 0x793   : > { %v2057_v27 = vpop.f32.mrf.mxu2 }
 0x79a   : > { %v2238_v26 = vpop.xlane.xlu1 %2237 }
 0x79b   : > { %v2239_v32 = vmul.f32 %v2238_v26, %v5100_v44 }
 0x79d   : > { %v2240_v33 = vadd.f32 1e-05, %v2239_v32 }
 0x79f   : > { %3867 = vrsqrt.f32 %v2240_v33  ;;  %vm2247_vm11 = vweird.f32 %v2240_v33 }
 0x7a5   : > { %v3868_v35 = vpop.eup %3867 }
 0x7a6   : > { %v2242_v36 = vmul.f32 %v3868_v35, %v2240_v33  ;;  %vm2248_vm10 = vweird.f32 %v3868_v35 }
 0x7a7   : > { %vm2249_vm13 = vmor %vm2247_vm11, %vm2248_vm10 }
 0x7a8   : > { %v2243_v16 = vmul.f32 %v3868_v35, %v2242_v36 }
 0x7aa   : > { %v2244_v37 = vmul.f32 0.5, %v2243_v16 }
 0x7ac   : > { %v2245_v0 = vsub.f32 1.5, %v2244_v37 }
 0x7ae   : > { %v2246_v38 = vmul.f32 %v3868_v35, %v2245_v0 }
 0x7b0   : > { %v2250_v39 = vsel %vm2249_vm13, %v3868_v35, %v2246_v38 }
 0x7b1   : > { %v2251_v1 = vmul.f32 %v2250_v39, %v2234_v8 }
 0x7b3   : > { %v2252_v40 = vmul.f32 %v5110_v10, %v2251_v1  ;;  %v3827_v10 = vld [vmem:[%s5678_s3] ss:$0 sm:$0xff]  ;;  %s5682_s3 = sld [smem:[#allocation51_spill]] }
 0x7b5   : > { %v5242_v3 = vadd.f32 %v5113_v14, %v2252_v40 }
 0x7b7   : > { %v2254_v41 = vpack.c.bf16 %v5242_v3, %v5242_v3 }
 0x7b9   : > { %3558 = vmatmul.msk.bf16.vlgmr.msra.gmra.mxu2 %vm1708_vm4, %v2254_v41  ;;  %v3828_v62 = vld [vmem:[%s5682_s3] ss:$0 sm:$0xff]  ;;  %s5686_s3 = smov 64  }
 0x804   : > { %v2062_v4 = vpop.xlane.xlu0 %2061 }
 0x805   : > { %v2063_v6 = vmul.f32 %v2062_v4, %v5100_v44 }
 0x807   : > { %v2064_v42 = vsub.f32 %v2059_v20, %v2063_v6 }
 0x809   : > { %v2065_v7 = vmul.f32 %v2064_v42, %v2064_v42 }
 0x80b   : > { %v2066_v46 = vsel %vm1708_vm4, %v2065_v7, 0.0 }
 0x80c   : > { %2067 = vadd.xlane.f32.xlu0 %v2066_v46 }
 0x83c   : > { %v2272_v14 = vpop.f32.mrf.mxu2 }
 0x83d   : > { %v2273_v9 = vadd.f32 %v3827_v10, %v2272_v14 }
 0x83f   : > { %2280 = vrot.lane.b32.xlu1 %v2273_v9, %s5597_s6  ;;  %2277 = vrot.lane.b32.xlu2 %v2273_v9, %s5595_s7  ;;  %v5252_v19 = vpack.c.bf16 %v2273_v9, %v2273_v9  ;;  %s5683_s7 = sld [smem:[#allocation52_spill]] }
 0x840   : > { %2283 = vrot.lane.b32.xlu0 %v2273_v9, %s5680_s22  ;;  %s5684_s6 = sld [smem:[#allocation55_spill]] }
 0x841   : > { %v2291_v47 = vunpack.c.l.b16 %v5252_v19 }
 0x843   : > { %v5256_v49 = vpack.c.b16 %v2291_v47, %v2291_v47 }
 0x844   : > { %v2274_v48 = vpop.f32.mrf.mxu2 }
 0x845   : > { %v3829_v8 = vld [vmem:[%s5683_s7] ss:$0 sm:$0xff]  ;;  %s5685_s7 = sld [smem:[#allocation54_spill]] }
 0x846   : > { %v1564_v18 = vld [vmem:[%s5684_s6 + $0x30] sm:$0xff]  ;;  %v1565_v20 = vld [vmem:[%s5684_s6 + $0x38] sm:$0xff]  ;;  %v1562_v21 = vld [vmem:[%s5684_s6 + $0x20] sm:$0xff] }
 0x847   : > { %2293 = vrot.lane.b32.xlu1 %v5256_v49, %s5681_s15  ;;  %v2117_v22 = vpack.c.bf16 %v1565_v20, %v1564_v18  ;;  %v1563_v23 = vld [vmem:[%s5684_s6 + $0x28] sm:$0xff]  ;;  %v1560_v27 = vld [vmem:[%s5684_s6 + $0x10] sm:$0xff]  ;;  %v1561_v28 = vld [vmem:[%s5684_s6 + $0x18] sm:$0xff] }
 0x848   : > { %v2116_v24 = vpack.c.bf16 %v1563_v23, %v1562_v21  ;;  %v2115_v30 = vpack.c.bf16 %v1561_v28, %v1560_v27  ;;  %v1558_v4 = vld [vmem:[%s5684_s6] sm:$0xff]  ;;  %v1559_v6 = vld [vmem:[%s5684_s6 + $0x8] sm:$0xff]  ;;  %s5690_s6 = smov 8  }
 0x849   : > { %2128 = vmatpush.bf16.msrb.mxu0 %v2117_v22 }
 0x84b   : > { %v3830_v10 = vld [vmem:[%s5685_s7] ss:$0 sm:$0xff]  ;;  %s5687_s7 = sld [smem:[#allocation56_spill]] }
 0x84d   : > { %2129 = vmatpush.bf16.msrb.mxu0 %v2116_v24 }
 0x851   : > { %2130 = vmatpush.bf16.msrb.mxu0 %v2115_v30 }
 0x87f   : > { %v2068_v56 = vpop.xlane.xlu0 %2067 }
 0x880   : > { %v2069_v57 = vmul.f32 %v2068_v56, %v5100_v44 }
 0x882   : > { %v2070_v58 = vadd.f32 1e-05, %v2069_v57 }
 0x884   : > { %3869 = vrsqrt.f32 %v2070_v58  ;;  %vm2077_vm10 = vweird.f32 %v2070_v58 }
 0x88a   : > { %v3870_v59 = vpop.eup %3869 }
 0x88b   : > { %v2072_v60 = vmul.f32 %v3870_v59, %v2070_v58  ;;  %vm2078_vm14 = vweird.f32 %v3870_v59  ;;  %v1627_v58 = vshrl.u32 %v1619_v2, 7 }
 0x88c   : > { %vm2079_vm11 = vmor %vm2077_vm10, %vm2078_vm14 }
 0x88d   : > { %v2073_v34 = vmul.f32 %v3870_v59, %v2072_v60  ;;  %vm1628_vm13 = vcmp.gt.s32.totalorder %v5011_v5, %v1627_v58 }
 0x88f   : > { %v2074_v29 = vmul.f32 0.5, %v2073_v34 }
 0x891   : > { %v2075_v25 = vsub.f32 1.5, %v2074_v29  ;;  %v1629_v29 = vsel %vm1628_vm13, -10000.0, %v4500_v11 }
 0x893   : > { %v2076_v61 = vmul.f32 %v3870_v59, %v2075_v25 }
 0x895   : > { %v2080_v63 = vsel %vm2079_vm11, %v3870_v59, %v2076_v61 }
 0x896   : > { %v2081_v12 = vmul.f32 %v2080_v63, %v2064_v42  ;;  %v2114_v42 = vpack.c.bf16 %v1559_v6, %v1558_v4 }
 0x898   : > { %v2085_v13 = vmul.f32 %v3828_v62, %v2081_v12  ;;  %2131 = vmatpush.bf16.msrb.mxu0 %v2114_v42 }
 0x899   : > { %v2278_v35 = vpop.permute.xlu2 %2277 }
 0x89a   : > { %v5267_v15 = vadd.f32 %v3829_v8, %v2085_v13  ;;  %v2287_v0 = vpack.c.bf16 %v2278_v35, %v2278_v35 }
 0x89c   : > { %v2090_v17 = vpack.c.bf16 %v5267_v15, %v5267_v15  ;;  %v2315_v40 = vunpack.c.l.b16 %v2287_v0 }
 0x89e   : > { %3555 = vmatmul.msk.bf16.vlgmr.msrb.gmra.mxu3 %vm1708_vm4, %v2090_v17  ;;  %v5287_v41 = vpack.c.b16 %v2315_v40, %v2315_v40 }
 0x8b1   : > { %v2281_v31 = vpop.permute.xlu1 %2280 }
 0x8b2   : > { %v2288_v26 = vpack.c.bf16 %v2281_v31, %v2281_v31  ;;  %v2284_v32 = vpop.permute.xlu0 %2283 }
 0x8b3   : > { %v2289_v33 = vpack.c.bf16 %v2284_v32, %v2284_v32 }
 0x8b4   : > { %v2339_v36 = vunpack.c.l.b16 %v2288_v26 }
 0x8b5   : > { %v2363_v16 = vunpack.c.l.b16 %v2289_v33 }
 0x8b6   : > { %v5278_v37 = vpack.c.b16 %v2339_v36, %v2339_v36 }
 0x8b7   : > { %v5280_v38 = vpack.c.b16 %v2363_v16, %v2363_v16 }
 0x8b8   : > { %2341 = vrot.lane.b32.xlu2 %v5278_v37, %s5681_s15 }
 0x8b9   : > { %2365 = vrot.lane.b32.xlu0 %v5280_v38, %s5681_s15  ;;  %v2294_v39 = vpop.permute.xlu1 %2293 }
 0x8ba   : > { %v2299_v1 = vsel %vm1787_vm12, %v2294_v39, 0 }
 0x8bb   : > { %2308 = vmatpush.bf16.xpose.msra.mxu3 %v2299_v1 }
 0x8c1   : > { %2317 = vrot.lane.b32.xlu0 %v5287_v41, %s5681_s15 }
 0x8c2   : > { %3559 = vmatmul.msk.bf16.vlgmr.msra.gmra.mxu3 %vm1787_vm12, %v5252_v19 }
 0x912   : > { %v2342_v7 = vpop.permute.xlu2 %2341 }
 0x913   : > { %v2347_v46 = vsel %vm1787_vm12, %v2342_v7, 0 }
 0x914   : > { %2356 = vmatpush.bf16.xpose.msra.mxu0 %v2347_v46 }
 0x921   : > { %v2108_v14 = vpop.f32.mrf.mxu3 }
 0x922   : > { %v2109_v9 = vadd.f32 %v3830_v10, %v2108_v14 }
 0x924   : > { %v2112_v47 = vmax.f32 %v2109_v9, 0.0 }
 0x926   : > { %v2113_v48 = vpack.c.bf16 %v2112_v47, %v2112_v47 }
 0x928   : > { %3556 = vmatmul.msk.bf16.vlgmr.msrb.gmra.mxu0 %vm1684_vm15, %v2113_v48 }
 0x929   : > { %v2110_v50 = vpop.f32.mrf.mxu3 }
 0x92b   : > { %v2366_v51 = vpop.permute.xlu0 %2365 }
 0x92c   : > { %v2371_v52 = vsel %vm1787_vm12, %v2366_v51, 0 }
 0x92d   : > { %2380 = vmatpush.bf16.xpose.msrb.mxu2 %v2371_v52 }
 0x933   : > { %v2318_v19 = vpop.permute.xlu0 %2317 }
 0x934   : > { %v2323_v53 = vsel %vm1787_vm12, %v2318_v19, 0  ;;  %3562 = vmatmul.msk.bf16.vlgmr.msrb.gmra.mxu2 %vm1787_vm12, %v2289_v33 }
 0x935   : > { %2332 = vmatpush.bf16.xpose.msra.mxu1 %v2323_v53 }
 0x938   : > { %3561 = vmatmul.msk.bf16.vlgmr.msra.gmra.mxu0 %vm1787_vm12, %v2288_v26 }
 0x93c   : > { %3560 = vmatmul.msk.bf16.vlgmr.msra.gmra.mxu1 %vm1787_vm12, %v2287_v0 }
 0x945   : > { %v2310_v54 = vpop.f32.mrf.mxu3 }
 0x946   : > { %v2386_v13 = vmul.f32 0.35355338, %v2310_v54 }
 0x948   : > { %v2390_v22 = vadd.f32 %v2386_v13, %v1629_v29 }
 0x94a   : > { %v2394_v24 = vsel %vm1787_vm12, %v2390_v22, -inf }
 0x94d   : > { %v2312_v55 = vpop.f32.mrf.mxu3 }
 0x9a5   : > { %v5303_v56 = vpop.f32.mrf.mxu0 }
 0x9ad   : > { %v2135_v57 = vpop.f32.mrf.mxu0 }
 0x9b5   : > { %v2358_v59 = vpop.f32.mrf.mxu0 }
 0x9b6   : > { %v2388_v60 = vmul.f32 0.35355338, %v2358_v59 }
 0x9b7   : > { %v2382_v34 = vpop.f32.mrf.mxu2 }
 0x9b8   : > { %v2389_v25 = vmul.f32 0.35355338, %v2382_v34  ;;  %v2392_v61 = vadd.f32 %v2388_v60, %v1629_v29 }
 0x9b9   : > { %v2334_v62 = vpop.f32.mrf.mxu1 }
 0x9ba   : > { %v2387_v63 = vmul.f32 0.35355338, %v2334_v62  ;;  %v2400_v8 = vsel %vm1787_vm12, %v2392_v61, -inf  ;;  %v2393_v12 = vadd.f32 %v2389_v25, %v1629_v29 }
 0x9bb   : > { %2401 = vmax.xlane.f32.xlu1 %v2400_v8 }
 0x9bc   : > { %v2403_v17 = vsel %vm1787_vm12, %v2393_v12, -inf  ;;  %v2391_v18 = vadd.f32 %v2387_v63, %v1629_v29 }
 0x9bd   : > { %2404 = vmax.xlane.f32.xlu0 %v2403_v17  ;;  %v2360_v2 = vpop.f32.mrf.mxu0 }
 0x9be   : > { %v2397_v20 = vsel %vm1787_vm12, %v2391_v18, -inf  ;;  %v3831_v2 = vld [vmem:[%s5687_s7] ss:$0 sm:$0xff]  ;;  %s5693_s7 = sld [smem:[#allocation57_spill]] }
 0x9bf   : > { %v2384_v21 = vpop.f32.mrf.mxu2  ;;  %2398 = vmax.xlane.f32.xlu2 %v2397_v20  ;;  %v2134_v20 = vadd.f32 %v3831_v2, %v5303_v56 }
 0x9c1   : > { %v2336_v23 = vpop.f32.mrf.mxu1  ;;  %v2137_v21 = vadd.f32 %v2134_v20, %v5267_v15 }
 0x9c5   : > { %2395 = vmax.xlane.f32.xlu0 %v2394_v24 }
 0x9d9   : > { %2484 = vrot.lane.b32.xlu0 %v5278_v37, %s5686_s3 }
 0xa2e   : > { %v2402_v27 = vpop.xlane.xlu1 %2401 }
 0xa2f   : > { %v2408_v28 = vsub.f32 %v2392_v61, %v2402_v27  ;;  %v1576_v27 = vld [vmem:[%s5689_s2 + $0x10] sm:$0xff] }
 0xa30   : > { %v2405_v30 = vpop.xlane.xlu0 %2404 }
 0xa31   : > { %v2414_v31 = vmul.f32 1.442695, %v2408_v28  ;;  %v2409_v26 = vsub.f32 %v2393_v12, %v2405_v30  ;;  %v1577_v28 = vld [vmem:[%s5689_s2 + $0x18] sm:$0xff] }
 0xa32   : > { %v2399_v32 = vpop.xlane.xlu2 %2398  ;;  %v2543_v30 = vpack.c.bf16 %v1577_v28, %v1576_v27 }
 0xa33   : > { %3871 = vpow2.f32 %v2414_v31  ;;  %v2416_v33 = vmul.f32 1.442695, %v2409_v26  ;;  %v2407_v35 = vsub.f32 %v2391_v18, %v2399_v32  ;;  %v1574_v31 = vld [vmem:[%s5689_s2] sm:$0xff]  ;;  %v1575_v26 = vld [vmem:[%s5689_s2 + $0x8] sm:$0xff]  ;;  %s5694_s2 = sld [smem:[#allocation58_spill]] }
 0xa34   : > { %v2542_v32 = vpack.c.bf16 %v1575_v26, %v1574_v31 }
 0xa35   : > { %3873 = vpow2.f32 %v2416_v33  ;;  %v2412_v36 = vmul.f32 1.442695, %v2407_v35 }
 0xa37   : > { %3875 = vpow2.f32 %v2412_v36 }
 0xa38   : > { %v2396_v4 = vpop.xlane.xlu0 %2395 }
 0xa39   : > { %v3872_v16 = vpop.eup %3871  ;;  %v2406_v7 = vsub.f32 %v2390_v22, %v2396_v4  ;;  %v2138_v22 = vsel %vm1708_vm4, %v2137_v21, 0.0 }
 0xa3a   : > { %v2424_v0 = vsel %vm1787_vm12, %v3872_v16, 0.0 }
 0xa3b   : > { %v3874_v39 = vpop.eup %3873  ;;  %2425 = vadd.xlane.f32.xlu0 %v2424_v0  ;;  %v2410_v46 = vmul.f32 1.442695, %v2406_v7 }
 0xa3c   : > { %v2427_v1 = vsel %vm1787_vm12, %v3874_v39, 0.0 }
 0xa3d   : > { %v3876_v37 = vpop.eup %3875  ;;  %2428 = vadd.xlane.f32.xlu2 %v2427_v1  ;;  %3877 = vpow2.f32 %v2410_v46  ;;  %v1586_v46 = vld [vmem:[%s5692_s11] sm:$0xff] }
 0xa3e   : > { %v2421_v40 = vsel %vm1787_vm12, %v3876_v37, 0.0 }
 0xa3f   : > { %2422 = vadd.xlane.f32.xlu1 %v2421_v40 }
 0xa43   : > { %v3878_v10 = vpop.eup %3877 }
 0xa44   : > { %v2418_v14 = vsel %vm1787_vm12, %v3878_v10, 0.0 }
 0xa4b   : > { %v2485_v6 = vpop.permute.xlu0 %2484 }
 0xa4c   : > { %v2490_v42 = vsel %vm1676_vm3, %v2485_v6, 0  ;;  %v1588_v6 = vld [vmem:[%s5692_s11 + $0x10] sm:$0xff] }
 0xa4d   : > { %2499 = vmatpush.bf16.msrb.mxu0 %v2490_v42  ;;  %v1589_v42 = vld [vmem:[%s5692_s11 + $0x18] sm:$0xff] }
 0xa4e   : > { %v2618_v7 = vpack.c.bf16 %v1589_v42, %v1588_v6  ;;  %v3837_v6 = vld [vmem:[#allocation11] ss:$0 sm:$0xff] }
 0xa4f   : > { %2442 = vrot.lane.b32.xlu0 %v5256_v49, %s5686_s3 }
 0xa51   : > { %2631 = vmatpush.bf16.msra.mxu0 %v2618_v7 }
 0xa55   : > { %2505 = vrot.lane.b32.xlu2 %v5280_v38, %s5686_s3 }
 0xa58   : > { %2463 = vrot.lane.b32.xlu1 %v5287_v41, %s5686_s3  ;;  %s5688_s3 = smov 16  }
 0xa7e   : > { %2419 = vadd.xlane.f32.xlu2 %v2418_v14 }
 0xaae   : > { %v2426_v9 = vpop.xlane.xlu0 %2425 }
 0xaaf   : > { %3879 = vrcp.f32 %v2426_v9  ;;  %v3832_v9 = vld [vmem:[#allocation8] ss:$0 sm:$0xff] }
 0xab0   : > { %v2429_v47 = vpop.xlane.xlu2 %2428 }
 0xab1   : > { %3881 = vrcp.f32 %v2429_v47 }
 0xab2   : > { %v2423_v53 = vpop.xlane.xlu1 %2422 }
 0xab3   : > { %3883 = vrcp.f32 %v2423_v53 }
 0xab5   : > { %v3880_v48 = vpop.eup %3879 }
 0xab6   : > { %v2436_v50 = vmul.f32 %v3880_v48, %v3872_v16 }
 0xab7   : > { %v3882_v49 = vpop.eup %3881 }
 0xab8   : > { %v2440_v51 = vpack.c.bf16 %v2436_v50, %v2436_v50  ;;  %v2437_v52 = vmul.f32 %v3882_v49, %v3874_v39  ;;  %v2506_v38 = vpop.permute.xlu2 %2505 }
 0xab9   : > { %v2511_v19 = vsel %vm1676_vm3, %v2506_v38, 0  ;;  %v3884_v57 = vpop.eup %3883 }
 0xaba   : > { %v2441_v41 = vpack.c.bf16 %v2437_v52, %v2437_v52  ;;  %2520 = vmatpush.bf16.msra.mxu2 %v2511_v19  ;;  %3565 = vmatmul.msk.bf16.vlgmr.msrb.gmra.mxu0 %vm1787_vm12, %v2440_v51  ;;  %v2435_v58 = vmul.f32 %v3884_v57, %v3876_v37 }
 0xabc   : > { %v2439_v34 = vpack.c.bf16 %v2435_v58, %v2435_v58 }
 0xabd   : > { %3566 = vmatmul.msk.bf16.vlgmr.msra.gmra.mxu2 %vm1787_vm12, %v2441_v41 }
 0xac1   : > { %v2443_v54 = vpop.permute.xlu0 %2442 }
 0xac2   : > { %v2448_v55 = vsel %vm1676_vm3, %v2443_v54, 0 }
 0xac3   : > { %2457 = vmatpush.bf16.msrb.mxu3 %v2448_v55 }
 0xac7   : > { %2556 = vmatpush.bf16.msra.mxu3 %v2543_v30 }
 0xaca   : > { %v2464_v59 = vpop.permute.xlu1 %2463 }
 0xacb   : > { %v2469_v60 = vsel %vm1676_vm3, %v2464_v59, 0  ;;  %2557 = vmatpush.bf16.msra.mxu3 %v2542_v32  ;;  %v3833_v59 = vld [vmem:[%s5693_s7] ss:$0 sm:$0xff]  ;;  %s5697_s7 = smov 120  }
 0xacc   : > { %2478 = vmatpush.bf16.msrb.mxu1 %v2469_v60 }
 0xacf   : > { %3564 = vmatmul.msk.bf16.vlgmr.msrb.gmra.mxu1 %vm1787_vm12, %v2439_v34 }
 0xaf1   : > { %v2420_v29 = vpop.xlane.xlu2 %2419 }
 0xaf2   : > { %3885 = vrcp.f32 %v2420_v29 }
 0xaf8   : > { %v3886_v25 = vpop.eup %3885 }
 0xaf9   : > { %v2434_v61 = vmul.f32 %v3886_v25, %v3878_v10  ;;  %v1587_v10 = vld [vmem:[%s5692_s11 + $0x8] sm:$0xff]  ;;  %s5695_s11 = sld [smem:[#allocation63_spill]] }
 0xafa   : > { %v2617_v14 = vpack.c.bf16 %v1587_v10, %v1586_v46 }
 0xafb   : > { %v2438_v62 = vpack.c.bf16 %v2434_v61, %v2434_v61 }
 0xafc   : > { %2632 = vmatpush.bf16.msra.mxu0 %v2617_v14 }
 0xafd   : > { %3563 = vmatmul.msk.bf16.vlgmr.msrb.gmra.mxu3 %vm1787_vm12, %v2438_v62 }
 0xaff   : > { %v1581_v28 = vld [vmem:[%s5695_s11] sm:$0xff]  ;;  %v1582_v30 = vld [vmem:[%s5695_s11 + $0x8] sm:$0xff] }
 0xb00   : > { %v2595_v31 = vpack.c.bf16 %v1582_v30, %v1581_v28 }
 0xb37   : > { %v2501_v63 = vpop.f32.mrf.mxu0 }
 0xb38   : > { %2531 = vrot.lane.b32.xlu0 %v2501_v63, %s5688_s3 }
 0xb3f   : > { %v2503_v8 = vpop.f32.mrf.mxu0 }
 0xb40   : > { %v2522_v12 = vpop.f32.mrf.mxu2 }
 0xb48   : > { %v2524_v13 = vpop.f32.mrf.mxu2 }
 0xb4c   : > { %v2480_v17 = vpop.f32.mrf.mxu1 }
 0xb4d   : > { %2527 = vrot.lane.b32.xlu1 %v2480_v17, %s5690_s6  ;;  %v3835_v17 = vld [vmem:[#allocation14] ss:$0 sm:$0xff] }
 0xb54   : > { %v2482_v18 = vpop.f32.mrf.mxu1 }
 0xb55   : > { %2535 = vrot.lane.b32.xlu1 %v2522_v12, %s5691_s9 }
 0xb62   : > { %2139 = vadd.xlane.f32.xlu0 %v2138_v22 }
 0xb80   : > { %v2459_v23 = vpop.f32.mrf.mxu3 }
 0xb88   : > { %v2461_v24 = vpop.f32.mrf.mxu3 }
 0xb89   : > { %v1584_v24 = vld [vmem:[%s5695_s11 + $0x18] sm:$0xff] }
 0xbaa   : > { %v2532_v35 = vpop.permute.xlu0 %2531 }
 0xbbf   : > { %v2528_v33 = vpop.permute.xlu1 %2527 }
 0xbc0   : > { %v2538_v56 = vsel %vm1787_vm12, %v2459_v23, %v2528_v33  ;;  %v1583_v23 = vld [vmem:[%s5695_s11 + $0x10] sm:$0xff]  ;;  %s3149_s11 = sld [smem:[#allocation7 + %s5033_s4]] }
 0xbc1   : > { %v2539_v15 = vsel %vm2033_vm6, %v2538_v56, %v2532_v35  ;;  %v2596_v27 = vpack.c.bf16 %v1584_v24, %v1583_v23 }
 0xbc3   : > { %2609 = vmatpush.bf16.msra.mxu1 %v2596_v27 }
 0xbc6   : > { %p3150_p4 = scmp.ne.s32.totalorder %s3149_s11, 0 }
 0xbc7   : > { %v2536_v36 = vpop.permute.xlu1 %2535  ;;  %2610 = vmatpush.bf16.msra.mxu1 %v2595_v31 }
 0xbc8   : > { %v2540_v16 = vsel %vm2035_vm8, %v2539_v15, %v2536_v36 }
 0xbc9   : > { %v2541_v0 = vpack.c.bf16 %v2540_v16, %v2540_v16 }
 0xbcb   : > { %3567 = vmatmul.msk.bf16.vlgmr.msra.gmra.mxu3 %vm1708_vm4, %v2541_v0 }
 0xbd5   : > { %v2140_v39 = vpop.xlane.xlu0 %2139 }
 0xbd6   : > { %v2141_v1 = vmul.f32 %v2140_v39, %v5100_v44 }
 0xbd8   : > { %v2142_v37 = vsub.f32 %v2137_v21, %v2141_v1 }
 0xbda   : > { %v2143_v40 = vmul.f32 %v2142_v37, %v2142_v37 }
 0xbdc   : > { %v2144_v4 = vsel %vm1708_vm4, %v2143_v40, 0.0  ;;  %v3836_v40 = vld [vmem:[#allocation9] ss:$0 sm:$0xff] }
 0xbdd   : > { %2145 = vadd.xlane.f32.xlu2 %v2144_v4 }
 0xc4e   : > { %v2559_v47 = vpop.f32.mrf.mxu3 }
 0xc4f   : > { %v2560_v48 = vadd.f32 %v3832_v9, %v2559_v47 }
 0xc50   : > { %v2146_v50 = vpop.xlane.xlu2 %2145 }
 0xc51   : > { %v2147_v49 = vmul.f32 %v2146_v50, %v5100_v44  ;;  %v2563_v51 = vadd.f32 %v2560_v48, %v5242_v3  ;;  %v3834_v3 = vld [vmem:[%s5694_s2] ss:$0 sm:$0xff]  ;;  %s5696_s2 = smov 112   ;;  %v3838_v48 = vld [vmem:[#allocation12] ss:$0 sm:$0xff] }
 0xc53   : > { %v2148_v52 = vadd.f32 1e-05, %v2147_v49  ;;  %v2564_v38 = vsel %vm1708_vm4, %v2563_v51, 0.0 }
 0xc54   : > { %2565 = vadd.xlane.f32.xlu1 %v2564_v38 }
 0xc55   : > { %3887 = vrsqrt.f32 %v2148_v52  ;;  %vm2155_vm10 = vweird.f32 %v2148_v52 }
 0xc56   : > { %v2561_v19 = vpop.f32.mrf.mxu3 }
 0xc5b   : > { %v3888_v41 = vpop.eup %3887 }
 0xc5c   : > { %v2150_v53 = vmul.f32 %v3888_v41, %v2148_v52  ;;  %vm2156_vm14 = vweird.f32 %v3888_v41 }
 0xc5d   : > { %vm2157_vm11 = vmor %vm2155_vm10, %vm2156_vm14 }
 0xc5e   : > { %v2151_v54 = vmul.f32 %v3888_v41, %v2150_v53 }
 0xc60   : > { %v2152_v55 = vmul.f32 0.5, %v2151_v54 }
 0xc62   : > { %v2153_v57 = vsub.f32 1.5, %v2152_v55 }
 0xc64   : > { %v2154_v58 = vmul.f32 %v3888_v41, %v2153_v57 }
 0xc66   : > { %v2158_v60 = vsel %vm2157_vm11, %v3888_v41, %v2154_v58 }
 0xc67   : > { %v2159_v34 = vmul.f32 %v2158_v60, %v2142_v37 }
 0xc69   : > { %v2163_v29 = vmul.f32 %v3833_v59, %v2159_v34 }
 0xc6b   : > { %v2167_v25 = vadd.f32 %v3834_v3, %v2163_v29  ;;  %v1625_v3 = vmul.f32 -1e+09, %v1623_v45 }
 0xc6d   : > { %v2616_v61 = vpack.c.bf16 %v2167_v25, %v2167_v25 }
 0xc6f   : > { %3569 = vmatmul.msk.bf16.vlgmr.msra.gmra.mxu0 %vm1708_vm4, %v2616_v61  ;;  %v2746_v61 = vperm.slane %v1625_v3, 0 }
 0xcc7   : > { %v2566_v62 = vpop.xlane.xlu1 %2565 }
 0xcc8   : > { %v2567_v63 = vmul.f32 %v2566_v62, %v5100_v44 }
 0xcca   : > { %v2568_v8 = vsub.f32 %v2563_v51, %v2567_v63 }
 0xccc   : > { %v2569_v12 = vmul.f32 %v2568_v8, %v2568_v8 }
 0xcce   : > { %v2570_v13 = vsel %vm1708_vm4, %v2569_v12, 0.0 }
 0xccf   : > { %2571 = vadd.xlane.f32.xlu2 %v2570_v13 }
 0xcec   : > { %v2634_v18 = vpop.f32.mrf.mxu0 }
 0xced   : > { %v2635_v2 = vadd.f32 %v3835_v17, %v2634_v18 }
 0xcef   : > { %2656 = vrot.lane.b32.xlu1 %v2635_v2, %s5696_s2  ;;  %2653 = vrot.lane.b32.xlu2 %v2635_v2, %s5697_s7  ;;  %v5363_v20 = vpack.c.bf16 %v2635_v2, %v2635_v2 }
 0xcf1   : > { %v2670_v21 = vsel %vm1787_vm12, %v5363_v20, 0 }
 0xcf2   : > { %2679 = vmatpush.bf16.xpose.msrb.mxu2 %v2670_v21 }
 0xcf4   : > { %v2636_v22 = vpop.f32.mrf.mxu0 }
 0xd42   : > { %v2572_v26 = vpop.xlane.xlu2 %2571 }
 0xd43   : > { %v2573_v32 = vmul.f32 %v2572_v26, %v5100_v44 }
 0xd45   : > { %v2574_v33 = vadd.f32 1e-05, %v2573_v32 }
 0xd47   : > { %3889 = vrsqrt.f32 %v2574_v33  ;;  %vm2581_vm14 = vweird.f32 %v2574_v33 }
 0xd4a   : > { %v2654_v56 = vpop.permute.xlu2 %2653 }
 0xd4b   : > { %v5372_v35 = vpack.c.bf16 %v2654_v56, %v2654_v56 }
 0xd4d   : > { %v3890_v15 = vpop.eup %3889  ;;  %v2689_v36 = vsel %vm1787_vm12, %v5372_v35, 0 }
 0xd4e   : > { %v2576_v16 = vmul.f32 %v3890_v15, %v2574_v33  ;;  %2698 = vmatpush.bf16.xpose.msrb.mxu3 %v2689_v36  ;;  %vm2582_vm13 = vweird.f32 %v3890_v15 }
 0xd4f   : > { %vm2583_vm10 = vmor %vm2581_vm14, %vm2582_vm13 }
 0xd50   : > { %v2577_v0 = vmul.f32 %v3890_v15, %v2576_v16 }
 0xd52   : > { %v2578_v39 = vmul.f32 0.5, %v2577_v0 }
 0xd54   : > { %v2579_v1 = vsub.f32 1.5, %v2578_v39 }
 0xd56   : > { %v2580_v37 = vmul.f32 %v3890_v15, %v2579_v1 }
 0xd58   : > { %v2584_v4 = vsel %vm2583_vm10, %v3890_v15, %v2580_v37 }
 0xd59   : > { %v2585_v42 = vmul.f32 %v2584_v4, %v2568_v8 }
 0xd5b   : > { %v2589_v7 = vmul.f32 %v3836_v40, %v2585_v42 }
 0xd5d   : > { %v5376_v46 = vadd.f32 %v3837_v6, %v2589_v7  ;;  %v2824_v7 = vunpack.c.l.b16 %v5372_v35 }
 0xd5f   : > { %v2594_v10 = vpack.c.bf16 %v5376_v46, %v5376_v46 }
 0xd61   : > { %3568 = vmatmul.msk.bf16.vlgmr.msra.gmra.mxu1 %vm1708_vm4, %v2594_v10  ;;  %v2657_v14 = vpop.permute.xlu1 %2656  ;;  %v2825_v10 = vpack.c.b16 %v2824_v7, %v2824_v7 }
 0xd62   : > { %v5381_v9 = vpack.c.bf16 %v2657_v14, %v2657_v14 }
 0xd64   : > { %v2708_v47 = vsel %vm1787_vm12, %v5381_v9, 0  ;;  %v2848_v15 = vunpack.c.l.b16 %v5381_v9 }
 0xd65   : > { %2717 = vmatpush.bf16.xpose.msrb.mxu1 %v2708_v47  ;;  %v2800_v47 = vunpack.c.l.b16 %v5363_v20 }
 0xd66   : > { %v2849_v0 = vpack.c.b16 %v2848_v15, %v2848_v15 }
 0xdde   : > { %v2612_v50 = vpop.f32.mrf.mxu1 }
 0xddf   : > { %v2613_v49 = vadd.f32 %v3838_v48, %v2612_v50  ;;  %v2801_v48 = vpack.c.b16 %v2800_v47, %v2800_v47 }
 0xde1   : > { %v2648_v51 = vpack.c.bf16 %v2613_v49, %v2613_v49  ;;  %2642 = vrot.lane.b32.xlu2 %v2613_v49, %s5696_s2  ;;  %2639 = vrot.lane.b32.xlu0 %v2613_v49, %s5697_s7  ;;  %s3129_s2 = sld [smem:[#allocation7 + %s5017_s1]]  ;;  %s3541_s1 = sshll.u32 %s5719_s23, 3 }
 0xde2   : > { %s3139_s7 = sld [smem:[#allocation7 + %s5026_s18]] }
 0xde3   : > { %3570 = vmatmul.msk.bf16.vlgmr.msrb.gmra.mxu2 %vm1787_vm12, %v2648_v51 }
 0xde6   : > { %v2614_v52 = vpop.f32.mrf.mxu1 }
 0xde7   : > { %p3130_p5 = scmp.ne.s32.totalorder %s3129_s2, 0 }
 0xde8   : > { %p3140_p7 = scmp.ne.s32.totalorder %s3139_s7, 0 }
 0xde9   : > { %2659 = vrot.lane.b32.xlu0 %v2635_v2, %s5680_s22  ;;  %s3134_s16 = scalar_select %p3130_p5, 1, 0 }
 0xdf1   : > { %2645 = vrot.lane.b32.xlu0 %v2613_v49, %s5680_s22  ;;  %s3109_s22 = sld [smem:[#allocation7 + %s4995_s10]] }
 0xdf7   : > { %p3110_p2 = scmp.ne.s32.totalorder %s3109_s22, 0  ;;  %s5480_s22 = sld [smem:[#allocation7 + %s5049_s8]] }
 0xdfd   : > { %p3170_p8 = scmp.ne.s32.totalorder %s5480_s22, 0 }
 0xdff   : > { %s3174_s8 = scalar_select %p3170_p8, 1, 0 }
 0xe3b   : > { %v2643_v38 = vpop.permute.xlu2 %2642 }
 0xe3c   : > { %v2650_v19 = vpack.c.bf16 %v2643_v38, %v2643_v38 }
 0xe3e   : > { %3572 = vmatmul.msk.bf16.vlgmr.msrb.gmra.mxu1 %vm1787_vm12, %v2650_v19 }
 0xe53   : > { %v2640_v41 = vpop.permute.xlu0 %2639 }
 0xe54   : > { %v2649_v53 = vpack.c.bf16 %v2640_v41, %v2640_v41 }
 0xe56   : > { %3571 = vmatmul.msk.bf16.vlgmr.msrb.gmra.mxu3 %vm1787_vm12, %v2649_v53 }
 0xe5b   : > { %v2660_v54 = vpop.permute.xlu0 %2659 }
 0xe5c   : > { %v2665_v55 = vpack.c.bf16 %v2660_v54, %v2660_v54 }
 0xe5e   : > { %v2727_v57 = vsel %vm1787_vm12, %v2665_v55, 0  ;;  %v2872_v14 = vunpack.c.l.b16 %v2665_v55 }
 0xe5f   : > { %2736 = vmatpush.bf16.xpose.msrb.mxu0 %v2727_v57 }
 0xe60   : > { %v2873_v9 = vpack.c.b16 %v2872_v14, %v2872_v14 }
 0xe63   : > { %v2646_v58 = vpop.permute.xlu0 %2645 }
 0xe64   : > { %v2651_v59 = vpack.c.bf16 %v2646_v58, %v2646_v58 }
 0xe66   : > { %v2681_v60 = vpop.f32.mrf.mxu2  ;;  %3573 = vmatmul.msk.bf16.vlgmr.msrb.gmra.mxu0 %vm1787_vm12, %v2651_v59 }
 0xe67   : > { %v2742_v63 = vmul.f32 0.35355338, %v2681_v60 }
 0xe69   : > { %v2747_v13 = vadd.f32 %v2746_v61, %v2742_v63 }
 0xe6b   : > { %v2751_v17 = vsel %vm1787_vm12, %v2747_v13, -inf }
 0xe6e   : > { %v2683_v34 = vpop.f32.mrf.mxu2 }
 0xebb   : > { %v2719_v29 = vpop.f32.mrf.mxu1 }
 0xebc   : > { %v2744_v25 = vmul.f32 0.35355338, %v2719_v29 }
 0xebe   : > { %v2749_v62 = vadd.f32 %v2746_v61, %v2744_v25 }
 0xec0   : > { %v2757_v8 = vsel %vm1787_vm12, %v2749_v62, -inf }
 0xec1   : > { %2758 = vmax.xlane.f32.xlu2 %v2757_v8 }
 0xec3   : > { %v2721_v12 = vpop.f32.mrf.mxu1 }
 0xec9   : > { %2752 = vmax.xlane.f32.xlu2 %v2751_v17 }
 0xed9   : > { %v2700_v18 = vpop.f32.mrf.mxu3 }
 0xeda   : > { %v2743_v2 = vmul.f32 0.35355338, %v2700_v18 }
 0xedc   : > { %v2748_v21 = vadd.f32 %v2746_v61, %v2743_v2 }
 0xede   : > { %v2754_v22 = vsel %vm1787_vm12, %v2748_v21, -inf }
 0xedf   : > { %2755 = vmax.xlane.f32.xlu1 %v2754_v22 }
 0xee1   : > { %v2702_v43 = vpop.f32.mrf.mxu3 }
 0xee3   : > { %v2738_v45 = vpop.f32.mrf.mxu0 }
 0xee4   : > { %v2745_v23 = vmul.f32 0.35355338, %v2738_v45 }
 0xee6   : > { %v2750_v24 = vadd.f32 %v2746_v61, %v2745_v23 }
 0xee8   : > { %v2760_v27 = vsel %vm1787_vm12, %v2750_v24, -inf }
 0xee9   : > { %2761 = vmax.xlane.f32.xlu0 %v2760_v27 }
 0xeeb   : > { %v2740_v28 = vpop.f32.mrf.mxu0 }
 0xf34   : > { %v2759_v30 = vpop.xlane.xlu2 %2758 }
 0xf35   : > { %v2765_v31 = vsub.f32 %v2749_v62, %v2759_v30 }
 0xf37   : > { %v2771_v26 = vmul.f32 1.442695, %v2765_v31 }
 0xf39   : > { %3891 = vpow2.f32 %v2771_v26 }
 0xf3c   : > { %v2753_v50 = vpop.xlane.xlu2 %2752 }
 0xf3d   : > { %v2763_v49 = vsub.f32 %v2747_v13, %v2753_v50 }
 0xf3f   : > { %v3892_v32 = vpop.eup %3891  ;;  %v2767_v51 = vmul.f32 1.442695, %v2763_v49 }
 0xf40   : > { %v2781_v33 = vsel %vm1787_vm12, %v3892_v32, 0.0 }
 0xf41   : > { %2782 = vadd.xlane.f32.xlu2 %v2781_v33 }
 0xf52   : > { %v2756_v56 = vpop.xlane.xlu1 %2755 }
 0xf53   : > { %v2764_v36 = vsub.f32 %v2748_v21, %v2756_v56 }
 0xf55   : > { %v2769_v16 = vmul.f32 1.442695, %v2764_v36 }
 0xf57   : > { %3893 = vpow2.f32 %v2769_v16 }
 0xf59   : > { %2850 = vrot.lane.b32.xlu2 %v2849_v0, %s5681_s15 }
 0xf5c   : > { %v2762_v39 = vpop.xlane.xlu0 %2761 }
 0xf5d   : > { %v3894_v1 = vpop.eup %3893  ;;  %v2766_v37 = vsub.f32 %v2750_v24, %v2762_v39 }
 0xf5e   : > { %v2778_v40 = vsel %vm1787_vm12, %v3894_v1, 0.0 }
 0xf5f   : > { %v2773_v4 = vmul.f32 1.442695, %v2766_v37  ;;  %2779 = vadd.xlane.f32.xlu1 %v2778_v40  ;;  %v3839_v40 = vld [vmem:[#allocation15] ss:$0 sm:$0xff] }
 0xf61   : > { %3895 = vpow2.f32 %v2773_v4 }
 0xf62   : > { %3897 = vpow2.f32 %v2767_v51 }
 0xf67   : > { %v3896_v6 = vpop.eup %3895 }
 0xf68   : > { %v2784_v42 = vsel %vm1787_vm12, %v3896_v6, 0.0  ;;  %v3898_v52 = vpop.eup %3897 }
 0xf69   : > { %2785 = vadd.xlane.f32.xlu0 %v2784_v42  ;;  %v2775_v38 = vsel %vm1787_vm12, %v3898_v52, 0.0 }
 0xf78   : > { %2826 = vrot.lane.b32.xlu1 %v2825_v10, %s5681_s15 }
 0xf7d   : > { %2874 = vrot.lane.b32.xlu0 %v2873_v9, %s5681_s15 }
 0xf85   : > { %2802 = vrot.lane.b32.xlu0 %v2801_v48, %s5681_s15  ;;  %s5698_s15 = sld [smem:[#allocation66_spill]] }
 0xf8b   : > { %v1593_v30 = vld [vmem:[%s5698_s15 + $0x10] sm:$0xff]  ;;  %v1594_v31 = vld [vmem:[%s5698_s15 + $0x18] sm:$0xff]  ;;  %v1592_v33 = vld [vmem:[%s5698_s15 + $0x8] sm:$0xff] }
 0xf8c   : > { %v2912_v26 = vpack.c.bf16 %v1594_v31, %v1593_v30 }
 0xfa2   : > { %2776 = vadd.xlane.f32.xlu1 %v2775_v38 }
 0xfb4   : > { %v2783_v35 = vpop.xlane.xlu2 %2782 }
 0xfb5   : > { %3899 = vrcp.f32 %v2783_v35 }
 0xfbb   : > { %v3900_v19 = vpop.eup %3899 }
 0xfbc   : > { %v2793_v41 = vmul.f32 %v3900_v19, %v3892_v32  ;;  %v2851_v53 = vpop.permute.xlu2 %2850  ;;  %v1591_v32 = vld [vmem:[%s5698_s15] sm:$0xff]  ;;  %s3141_s15 = sld [smem:[#allocation5 + %s5026_s18]]  ;;  %s1524_s18 = scalar_lea.vmem %s4728_s21, %s3541_s1 }
 0xfbd   : > { %v2856_v54 = vsel %vm1676_vm3, %v2851_v53, 0  ;;  %v2911_v56 = vpack.c.bf16 %v1592_v33, %v1591_v32  ;;  %v3843_v32 = vld [vmem:[#allocation21] ss:$0 sm:$0xff] }
 0xfbe   : > { %v2797_v55 = vpack.c.bf16 %v2793_v41, %v2793_v41  ;;  %2865 = vmatpush.bf16.msra.mxu1 %v2856_v54 }
 0xfc1   : > { %3576 = vmatmul.msk.bf16.vlgmr.msra.gmra.mxu1 %vm1787_vm12, %v2797_v55 }
 0xfd2   : > { %v2780_v20 = vpop.xlane.xlu1 %2779 }
 0xfd3   : > { %3901 = vrcp.f32 %v2780_v20 }
 0xfd9   : > { %v3902_v58 = vpop.eup %3901 }
 0xfda   : > { %v2792_v59 = vmul.f32 %v3902_v58, %v3894_v1 }
 0xfdc   : > { %v2786_v57 = vpop.xlane.xlu0 %2785  ;;  %v2796_v29 = vpack.c.bf16 %v2792_v59, %v2792_v59 }
 0xfdd   : > { %3903 = vrcp.f32 %v2786_v57 }
 0xfe3   : > { %v3904_v34 = vpop.eup %3903 }
 0xfe4   : > { %v2794_v25 = vmul.f32 %v3904_v34, %v3896_v6 }
 0xfe6   : > { %v2798_v63 = vpack.c.bf16 %v2794_v25, %v2794_v25 }
 0xfea   : > { %v2827_v60 = vpop.permute.xlu1 %2826 }
 0xfeb   : > { %v2832_v3 = vsel %vm1676_vm3, %v2827_v60, 0 }
 0xfec   : > { %2841 = vmatpush.bf16.msra.mxu3 %v2832_v3 }
 0xfef   : > { %3575 = vmatmul.msk.bf16.vlgmr.msra.gmra.mxu3 %vm1787_vm12, %v2796_v29  ;;  %v2875_v61 = vpop.permute.xlu0 %2874 }
 0xff0   : > { %v2880_v62 = vsel %vm1676_vm3, %v2875_v61, 0 }
 0xff1   : > { %2889 = vmatpush.bf16.msra.mxu0 %v2880_v62  ;;  %v3840_v62 = vld [vmem:[#allocation17] ss:$0 sm:$0xff] }
 0xff4   : > { %3577 = vmatmul.msk.bf16.vlgmr.msra.gmra.mxu0 %vm1787_vm12, %v2798_v63 }
 0xff7   : > { %v2803_v8 = vpop.permute.xlu0 %2802 }
 0xff8   : > { %v2808_v12 = vsel %vm1676_vm3, %v2803_v8, 0  ;;  %v3841_v8 = vld [vmem:[#allocation18] ss:$0 sm:$0xff] }
 0xff9   : > { %2817 = vmatpush.bf16.msra.mxu2 %v2808_v12 }
 0xffd   : > { %2925 = vmatpush.bf16.msrb.mxu2 %v2912_v26 }
0x1001   : > { %2926 = vmatpush.bf16.msrb.mxu2 %v2911_v56 }
0x1015   : > { %v2777_v13 = vpop.xlane.xlu1 %2776 }
0x1016   : > { %3905 = vrcp.f32 %v2777_v13 }
0x101c   : > { %v3906_v17 = vpop.eup %3905 }
0x101d   : > { %v2791_v18 = vmul.f32 %v3906_v17, %v3898_v52 }
0x101f   : > { %v2795_v2 = vpack.c.bf16 %v2791_v18, %v2791_v18 }
0x1021   : > { %3574 = vmatmul.msk.bf16.vlgmr.msra.gmra.mxu2 %vm1787_vm12, %v2795_v2 }
0x103e   : > { %v2867_v21 = vpop.f32.mrf.mxu1 }
0x103f   : > { %2900 = vrot.lane.b32.xlu0 %v2867_v21, %s5688_s3  ;;  %s3119_s3 = sld [smem:[#allocation7 + %s5004_s0]] }
0x1045   : > { %p3120_p3 = scmp.ne.s32.totalorder %s3119_s3, 0 }
0x1046   : > { %v2869_v22 = vpop.f32.mrf.mxu1 }
0x1047   : > { %s3124_s13 = scalar_select %p3120_p3, 1, 0 }
0x1071   : > { %v2891_v43 = vpop.f32.mrf.mxu0 }
0x1072   : > { %v2843_v45 = vpop.f32.mrf.mxu3 }
0x1073   : > { %2896 = vrot.lane.b32.xlu2 %v2843_v45, %s5690_s6  ;;  %s5700_s6 = sld [smem:[#allocation69_spill]] }
0x1079   : > { %v2893_v23 = vpop.f32.mrf.mxu0  ;;  %v1609_v19 = vld [vmem:[%s5700_s6 + $0x30] sm:$0xff]  ;;  %v1610_v41 = vld [vmem:[%s5700_s6 + $0x38] sm:$0xff]  ;;  %v1607_v53 = vld [vmem:[%s5700_s6 + $0x20] sm:$0xff] }
0x107a   : > { %v2845_v24 = vpop.f32.mrf.mxu3  ;;  %v2990_v55 = vpack.c.bf16 %v1610_v41, %v1609_v19  ;;  %v1608_v20 = vld [vmem:[%s5700_s6 + $0x28] sm:$0xff]  ;;  %v1605_v2 = vld [vmem:[%s5700_s6 + $0x10] sm:$0xff]  ;;  %v1606_v21 = vld [vmem:[%s5700_s6 + $0x18] sm:$0xff] }
0x107b   : > { %2904 = vrot.lane.b32.xlu2 %v2891_v43, %s5691_s9  ;;  %s5699_s9 = sld [smem:[#allocation67_spill]]  ;;  %v2989_v58 = vpack.c.bf16 %v1608_v20, %v1607_v53  ;;  %v2988_v22 = vpack.c.bf16 %v1606_v21, %v1605_v2  ;;  %v1603_v43 = vld [vmem:[%s5700_s6] sm:$0xff]  ;;  %v1604_v45 = vld [vmem:[%s5700_s6 + $0x8] sm:$0xff]  ;;  %v3842_v24 = vld [vmem:[#allocation20] ss:$0 sm:$0xff] }
0x107c   : > { %3001 = vmatpush.bf16.msrb.mxu1 %v2990_v55  ;;  %v2987_v23 = vpack.c.bf16 %v1604_v45, %v1603_v43  ;;  %v3921_v41 = vld [vmem:[%s5668_s5 + $0x18] sm:$0xff]  ;;  %v3922_v53 = vld [vmem:[%s5668_s5 + $0x10] sm:$0xff]  ;;  %s3121_s6 = sld [smem:[#allocation5 + %s5004_s0]] }
0x107d   : > { %s3151_s0 = sld [smem:[#allocation5 + %s5033_s4]] }
0x1080   : > { %3002 = vmatpush.bf16.msrb.mxu1 %v2989_v58 }
0x1081   : > { %v1600_v49 = vld [vmem:[%s5699_s9 + $0x10] sm:$0xff]  ;;  %v1601_v51 = vld [vmem:[%s5699_s9 + $0x18] sm:$0xff]  ;;  %v1599_v38 = vld [vmem:[%s5699_s9 + $0x8] sm:$0xff] }
0x1082   : > { %v2965_v52 = vpack.c.bf16 %v1601_v51, %v1600_v49 }
0x1084   : > { %2978 = vmatpush.bf16.msrb.mxu3 %v2965_v52  ;;  %3003 = vmatpush.bf16.msrb.mxu1 %v2988_v22  ;;  %v3919_v52 = vld [vmem:[%s5668_s5 + $0x28] sm:$0xff] }
0x1088   : > { %3004 = vmatpush.bf16.msrb.mxu1 %v2987_v23 }
0x10a4   : > { %v2819_v27 = vpop.f32.mrf.mxu2 }
0x10ac   : > { %v2821_v28 = vpop.f32.mrf.mxu2 }
0x10b1   : > { %v2901_v16 = vpop.permute.xlu0 %2900 }
0x10cd   : > { %v2897_v15 = vpop.permute.xlu2 %2896 }
0x10ce   : > { %v2907_v36 = vsel %vm1787_vm12, %v2819_v27, %v2897_v15 }
0x10cf   : > { %v2908_v39 = vsel %vm2033_vm6, %v2907_v36, %v2901_v16 }
0x10d5   : > { %v2905_v0 = vpop.permute.xlu2 %2904 }
0x10d6   : > { %v2909_v1 = vsel %vm2035_vm8, %v2908_v39, %v2905_v0 }
0x10d7   : > { %v2910_v37 = vpack.c.bf16 %v2909_v1, %v2909_v1 }
0x10d9   : > { %3578 = vmatmul.msk.bf16.vlgmr.msrb.gmra.mxu2 %vm1708_vm4, %v2910_v37 }
0x115c   : > { %v2928_v4 = vpop.f32.mrf.mxu2 }
0x115d   : > { %v2929_v6 = vadd.f32 %v3839_v40, %v2928_v4  ;;  %v1616_v4 = vld [vmem:[#allocation26 + $0x10] sm:$0xff] }
0x115f   : > { %v2932_v42 = vadd.f32 %v2929_v6, %v5376_v46  ;;  %v1598_v46 = vld [vmem:[%s5699_s9] sm:$0xff]  ;;  %v1617_v6 = vld [vmem:[#allocation26 + $0x18] sm:$0xff]  ;;  %s3114_s9 = scalar_select %p3110_p2, 1, 0 }
0x1160   : > { %v2964_v35 = vpack.c.bf16 %v1599_v38, %v1598_v46  ;;  %v3920_v46 = vld [vmem:[%s5668_s5 + $0x20] sm:$0xff] }
0x1161   : > { %v2933_v7 = vsel %vm1708_vm4, %v2932_v42, 0.0  ;;  %v3067_v38 = vpack.c.bf16 %v3919_v52, %v3920_v46 }
0x1162   : > { %2934 = vadd.xlane.f32.xlu0 %v2933_v7  ;;  %2979 = vmatpush.bf16.msrb.mxu3 %v2964_v35  ;;  %v1614_v7 = vld [vmem:[#allocation26] sm:$0xff] }
0x1163   : > { %v3079_v19 = vsel %vm1708_vm4, %v3067_v38, 0 }
0x1164   : > { %v2930_v10 = vpop.f32.mrf.mxu2 }
0x1165   : > { %v1615_v10 = vld [vmem:[#allocation26 + $0x8] sm:$0xff] }
0x11d5   : > { %v2935_v14 = vpop.xlane.xlu0 %2934 }
0x11d6   : > { %v2936_v9 = vmul.f32 %v2935_v14, %v5100_v44  ;;  %v3042_v14 = vpack.c.bf16 %v1615_v10, %v1614_v7 }
0x11d8   : > { %v2937_v47 = vsub.f32 %v2932_v42, %v2936_v9  ;;  %v3043_v42 = vpack.c.bf16 %v1617_v6, %v1616_v4  ;;  %v3917_v9 = vld [vmem:[%s5668_s5 + $0x38] sm:$0xff] }
0x11da   : > { %v2938_v48 = vmul.f32 %v2937_v47, %v2937_v47  ;;  %3056 = vmatpush.bf16.msrb.mxu0 %v3043_v42 }
0x11dc   : > { %v2939_v50 = vsel %vm1708_vm4, %v2938_v48, 0.0 }
0x11dd   : > { %2940 = vadd.xlane.f32.xlu2 %v2939_v50 }
0x11de   : > { %3057 = vmatpush.bf16.msrb.mxu0 %v3042_v14 }
0x1250   : > { %v2941_v54 = vpop.xlane.xlu2 %2940 }
0x1251   : > { %v2942_v57 = vmul.f32 %v2941_v54, %v5100_v44  ;;  %v3066_v54 = vpack.c.bf16 %v3921_v41, %v3922_v53 }
0x1253   : > { %v2943_v59 = vadd.f32 1e-05, %v2942_v57  ;;  %v3076_v57 = vsel %vm1708_vm4, %v3066_v54, 0 }
0x1255   : > { %3907 = vrsqrt.f32 %v2943_v59  ;;  %vm2950_vm6 = vweird.f32 %v2943_v59 }
0x125b   : > { %v3908_v60 = vpop.eup %3907 }
0x125c   : > { %v2945_v34 = vmul.f32 %v3908_v60, %v2943_v59  ;;  %vm2951_vm12 = vweird.f32 %v3908_v60 }
0x125d   : > { %vm2952_vm8 = vmor %vm2950_vm6, %vm2951_vm12 }
0x125e   : > { %v2946_v3 = vmul.f32 %v3908_v60, %v2945_v34  ;;  %v3844_v34 = vld [vmem:[#allocation23] ss:$0 sm:$0xff] }
0x1260   : > { %v2947_v29 = vmul.f32 0.5, %v2946_v3 }
0x1262   : > { %v2948_v25 = vsub.f32 1.5, %v2947_v29 }
0x1264   : > { %v2949_v61 = vmul.f32 %v3908_v60, %v2948_v25  ;;  %v3845_v25 = vld [vmem:[#allocation24] ss:$0 sm:$0xff] }
0x1266   : > { %v2953_v63 = vsel %vm2952_vm8, %v3908_v60, %v2949_v61 }
0x1267   : > { %v2954_v12 = vmul.f32 %v2953_v63, %v2937_v47  ;;  %v3918_v47 = vld [vmem:[%s5668_s5 + $0x30] sm:$0xff] }
0x1268   : > { %v3068_v48 = vpack.c.bf16 %v3917_v9, %v3918_v47  ;;  %v3172_v9 = vstv %s3171_s14  ;;  %v3175_v47 = vstv %s3174_s8 }
0x1269   : > { %v2958_v13 = vmul.f32 %v3840_v62, %v2954_v12  ;;  %v3924_v12 = vld [vmem:[%s5668_s5] sm:$0xff] }
0x126a   : > { %v3082_v50 = vsel %vm1708_vm4, %v3068_v48, 0 }
0x126b   : > { %v2962_v17 = vadd.f32 %v3841_v8, %v2958_v13  ;;  %3088 = vmatpush.bf16.xpose.msra.mxu2 %v3082_v50  ;;  %v3923_v8 = vld [vmem:[%s5668_s5 + $0x8] sm:$0xff]  ;;  %s3111_s5 = sld [smem:[#allocation5 + %s4995_s10]] }
0x126c   : > { %v3065_v13 = vpack.c.bf16 %v3923_v8, %v3924_v12  ;;  %s3144_s10 = scalar_select %p3140_p7, 1, 0 }
0x126d   : > { %v2963_v18 = vpack.c.bf16 %v2962_v17, %v2962_v17 }
0x126f   : > { %3579 = vmatmul.msk.bf16.vlgmr.msrb.gmra.mxu3 %vm1708_vm4, %v2963_v18  ;;  %v3846_v18 = vld [vmem:[#allocation27] ss:$0 sm:$0xff] }
0x1271   : > { %v3112_v23 = vstv %s3111_s5  ;;  %s5716_s5 = sld [smem:[#allocation73_spill]] }
0x1273   : > { %3089 = vmatpush.bf16.xpose.msra.mxu2 %v3079_v19 }
0x127b   : > { %3090 = vmatpush.bf16.xpose.msra.mxu2 %v3076_v57 }
0x12f2   : > { %v2981_v27 = vpop.f32.mrf.mxu3 }
0x12f3   : > { %v2982_v28 = vadd.f32 %v3842_v24, %v2981_v27  ;;  %v3115_v24 = vstv %s3114_s9  ;;  %v3122_v27 = vstv %s3121_s6 }
0x12f4   : > { %vm5488_vm10 = vcmp.eq.s32.totalorder %v3115_v24, 1  ;;  %vm5493_vm12 = vcmp.eq.s32.totalorder %v5011_v5, %v3122_v27 }
0x12f5   : > { %v2985_v30 = vmax.f32 %v2982_v28, 0.0  ;;  %v3125_v28 = vstv %s3124_s13  ;;  %s3161_s13 = sld [smem:[#allocation5 + %s5042_s28]]  ;;  %s1528_s28 = scalar_lea.vmem %s5716_s5, %s3541_s1 }
0x12f6   : > { %vm5497_vm6 = vcmp.eq.s32.totalorder %v3125_v28, 1 }
0x12f7   : > { %v2986_v31 = vpack.c.bf16 %v2985_v30, %v2985_v30 }
0x12f9   : > { %3580 = vmatmul.msk.bf16.vlgmr.msrb.gmra.mxu1 %vm1684_vm15, %v2986_v31 }
0x12fa   : > { %v2983_v26 = vpop.f32.mrf.mxu3 }
0x12fb   : > { %v3132_v26 = vstv %s3131_s12  ;;  %s3154_s12 = scalar_select %p3150_p4, 1, 0  ;;  %v3162_v42 = vstv %s3161_s13 }
0x12fd   : > { %v3155_v4 = vstv %s3154_s12 }
0x1376   : > { %v3006_v33 = vpop.f32.mrf.mxu1 }
0x1377   : > { %v3007_v56 = vadd.f32 %v3843_v32, %v3006_v33  ;;  %v3135_v32 = vstv %s3134_s16  ;;  %s3164_s16 = scalar_select %p3160_p6, 1, 0 }
0x1379   : > { %v3010_v15 = vadd.f32 %v3007_v56, %v2962_v17  ;;  %v3073_v17 = vsel %vm1708_vm4, %v3065_v13, 0  ;;  %v3165_v7 = vstv %s3164_s16 }
0x137a   : > { %3091 = vmatpush.bf16.xpose.msra.mxu2 %v3073_v17 }
0x137b   : > { %v3011_v36 = vsel %vm1708_vm4, %v3010_v15, 0.0 }
0x137c   : > { %3012 = vadd.xlane.f32.xlu1 %v3011_v36 }
0x137e   : > { %v3008_v16 = vpop.f32.mrf.mxu1 }
0x137f   : > { %v3142_v16 = vstv %s3141_s15 }
0x13ef   : > { %v3013_v0 = vpop.xlane.xlu1 %3012 }
0x13f0   : > { %v3014_v39 = vmul.f32 %v3013_v0, %v5100_v44  ;;  %v3145_v0 = vstv %s3144_s10 }
0x13f1   : > { %vm3146_vm9 = vcmp.eq.s32.totalorder %v3145_v0, 1 }
0x13f2   : > { %v3015_v1 = vsub.f32 %v3010_v15, %v3014_v39 }
0x13f4   : > { %v3016_v37 = vmul.f32 %v3015_v1, %v3015_v1 }
0x13f6   : > { %v3017_v40 = vsel %vm1708_vm4, %v3016_v37, 0.0 }
0x13f7   : > { %3018 = vadd.xlane.f32.xlu1 %v3017_v40  ;;  %v3152_v40 = vstv %s3151_s0 }
0x146a   : > { %v3019_v49 = vpop.xlane.xlu1 %3018 }
0x146b   : > { %v3020_v51 = vmul.f32 %v3019_v49, %v5100_v44 }
0x146d   : > { %v3021_v35 = vadd.f32 1e-05, %v3020_v51 }
0x146f   : > { %3909 = vrsqrt.f32 %v3021_v35  ;;  %vm3028_vm13 = vweird.f32 %v3021_v35 }
0x1475   : > { %v3910_v55 = vpop.eup %3909 }
0x1476   : > { %v3023_v20 = vmul.f32 %v3910_v55, %v3021_v35  ;;  %vm3029_vm11 = vweird.f32 %v3910_v55 }
0x1477   : > { %vm3030_vm14 = vmor %vm3028_vm13, %vm3029_vm11  ;;  %vm5508_vm11 = vcmp.eq.s32.totalorder %v5011_v5, %v3132_v26  ;;  %vm5512_vm13 = vcmp.eq.s32.totalorder %v3135_v32, 1 }
0x1478   : > { %v3024_v58 = vmul.f32 %v3910_v55, %v3023_v20 }
0x147a   : > { %v3025_v59 = vmul.f32 0.5, %v3024_v58 }
0x147c   : > { %v3026_v44 = vsub.f32 1.5, %v3025_v59 }
0x147e   : > { %v3027_v60 = vmul.f32 %v3910_v55, %v3026_v44 }
0x1480   : > { %v3031_v3 = vsel %vm3030_vm14, %v3910_v55, %v3027_v60  ;;  %vm3127_vm14 = vmand %vm5493_vm12, %vm5497_vm6  ;;  %vm3153_vm6 = vcmp.eq.s32.totalorder %v5011_v5, %v3152_v40 }
0x1481   : > { %v3032_v29 = vmul.f32 %v3031_v3, %v3015_v1  ;;  %v3128_v37 = vsel %vm3127_vm14, 1.0, %v4500_v11  ;;  %vm3166_vm14 = vcmp.eq.s32.totalorder %v3165_v7, 1 }
0x1483   : > { %v3036_v61 = vmul.f32 %v3844_v34, %v3032_v29 }
0x1485   : > { %v3040_v62 = vadd.f32 %v3845_v25, %v3036_v61 }
0x1487   : > { %v3041_v63 = vpack.c.bf16 %v3040_v62, %v3040_v62 }
0x1489   : > { %3581 = vmatmul.msk.bf16.vlgmr.msrb.gmra.mxu0 %vm1708_vm4, %v3041_v63 }
0x1506   : > { %v3059_v2 = vpop.f32.mrf.mxu0 }
0x1507   : > { %v3060_v21 = vadd.f32 %v3846_v18, %v3059_v2 }
0x1509   : > { %3911 = vtanh.f32 %v3060_v21 }
0x150e   : > { %v3061_v22 = vpop.f32.mrf.mxu0 }
0x150f   : > { %v3912_v43 = vpop.eup %3911 }
0x1510   : > { %v3064_v45 = vpack.c.bf16 %v3912_v43, %v3912_v43 }
0x1512   : > { %3582 = vmatmul.msk.bf16.vlgmr.msra.gmra.mxu2 %vm1708_vm4, %v3064_v45  ;;  %vm5484_vm4 = vcmp.eq.s32.totalorder %v5011_v5, %v3112_v23 }
0x1513   : > { %vm3117_vm8 = vmand %vm5484_vm4, %vm5488_vm10  ;;  %vm5528_vm10 = vcmp.eq.s32.totalorder %v5011_v5, %v3142_v16 }
0x1514   : > { %vm3137_vm4 = vmand %vm5508_vm11, %vm5512_vm13  ;;  %v3118_v1 = vsel %vm3117_vm8, 1.0, %v4500_v11  ;;  %vm3156_vm11 = vcmp.eq.s32.totalorder %v3155_v4, 1  ;;  %vm3163_vm8 = vcmp.eq.s32.totalorder %v5011_v5, %v3162_v42 }
0x1515   : > { %v3138_v6 = vsel %vm3137_vm4, 1.0, %v4500_v11  ;;  %vm3147_vm12 = vmand %vm5528_vm10, %vm3146_vm9  ;;  %v3179_v10 = vsel %vm1670_vm0, %v3118_v1, %v3128_v37  ;;  %vm3173_vm4 = vcmp.eq.s32.totalorder %v5011_v5, %v3172_v9  ;;  %vm3176_vm10 = vcmp.eq.s32.totalorder %v3175_v47, 1 }
0x1516   : > { %v3148_v14 = vsel %vm3147_vm12, 1.0, %v4500_v11  ;;  %vm3157_vm13 = vmand %vm3153_vm6, %vm3156_vm11  ;;  %v3180_v48 = vsel %vm1672_vm1, %v3179_v10, %v3138_v6  ;;  %vm5715_vm1 = vcmask 1046528  }
0x1517   : > { %v3158_v50 = vsel %vm3157_vm13, 1.0, %v4500_v11  ;;  %vm3167_vm9 = vmand %vm3163_vm8, %vm3166_vm14  ;;  %v3181_v49 = vsel %vm1674_vm2, %v3180_v48, %v3148_v14  ;;  %vm3195_vm2 = vcmask 7168  }
0x1518   : > { %v3168_v51 = vsel %vm3167_vm9, 1.0, %v4500_v11  ;;  %vm3177_vm0 = vmand %vm3173_vm4, %vm3176_vm10  ;;  %v3182_v52 = vsel %vm1676_vm3, %v3181_v49, %v3158_v50 }
0x1519   : > { %v3178_v46 = vsel %vm3177_vm0, 1.0, %v4500_v11  ;;  %v3183_v38 = vsel %vm1678_vm5, %v3182_v52, %v3168_v51 }
0x151a   : > { %v3184_v35 = vsel %vm1680_vm7, %v3183_v38, %v3178_v46 }
0x151b   : > { %v3185_v5 = vsel %vm5715_vm1, %v3184_v35, 0.0 }
0x151c   : > { %v3186_v20 = vsel %vm1684_vm15, %v3185_v5, 0.0 }
0x151d   : > { %3187 = vadd.xlane.f32.xlu2 %v3186_v20 }
0x1590   : > { %v3188_v60 = vpop.xlane.xlu2 %3187 }
0x1591   : > { %v3206_v34 = vsel %vm3195_vm2, %v3188_v60, 0.0 }
0x1592   : > { %3207 = vadd.xlane.f32.xlu2 %v3206_v34 }
0x1595   : > { %v3093_v19 = vpop.f32.mrf.mxu2 }
0x1596   : > { %v3097_v41 = vsel %vm1684_vm15, %v3093_v19, -inf  ;;  %v3189_v53 = vmul.f32 %v3185_v5, %v3093_v19 }
0x1597   : > { %3098 = vmax.xlane.f32.xlu1 %v3097_v41 }
0x1598   : > { %v3190_v55 = vsel %vm1684_vm15, %v3189_v53, 0.0 }
0x159d   : > { %v3095_v54 = vpop.f32.mrf.mxu2 }
0x159f   : > { %3191 = vadd.xlane.f32.xlu1 %v3190_v55 }
0x1605   : > { %v3208_v13 = vpop.xlane.xlu2 %3207 }
0x1606   : > { %v3209_v17 = vrot.slane %v3208_v13, 4 }
0x1608   : > { %v3210_v18 = vadd.f32 %v3209_v17, %v3208_v13 }
0x160a   : > { %v3099_v57 = vpop.xlane.xlu1 %3098  ;;  %v3211_v21 = vrot.slane %v3210_v18, 2 }
0x160b   : > { %v3100_v11 = vsub.f32 %v3093_v19, %v3099_v57 }
0x160c   : > { %v3212_v45 = vadd.f32 %v3211_v21, %v3210_v18 }
0x160d   : > { %v3101_v58 = vmul.f32 1.442695, %v3100_v11 }
0x160e   : > { %v3213_v27 = vrot.slane %v3212_v45, 1 }
0x160f   : > { %3913 = vpow2.f32 %v3101_v58 }
0x1610   : > { %v3214_v31 = vadd.f32 %v3213_v27, %v3212_v45 }
0x1612   : > { %v3192_v63 = vpop.xlane.xlu1 %3191 }
0x1615   : > { %v3914_v59 = vpop.eup %3913 }
0x1616   : > { %v3103_v44 = vsel %vm1684_vm15, %v3914_v59, 0.0 }
0x1617   : > { %3104 = vadd.xlane.f32.xlu0 %v3103_v44 }
0x168a   : > { %v3105_v3 = vpop.xlane.xlu0 %3104 }
0x168b   : > { %3915 = vlog2.f32 %v3105_v3 }
0x1691   : > { %v3916_v29 = vpop.eup %3915 }
0x1692   : > { %v3107_v25 = vmul.f32 0.6931472, %v3916_v29 }
0x1694   : > { %v3108_v61 = vadd.f32 %v3107_v25, %v3099_v57 }
0x1696   : > { %v3193_v62 = vmul.f32 %v3188_v60, %v3108_v61 }
0x1698   : > { %v3194_v8 = vsub.f32 %v3193_v62, %v3192_v63 }
0x169a   : > { %v3196_v12 = vsel %vm3195_vm2, %v3194_v8, 0.0 }
0x169b   : > { %3197 = vadd.xlane.f32.xlu0 %v3196_v12 }
0x170e   : > { %v3198_v2 = vpop.xlane.xlu0 %3197 }
0x170f   : > { %v3199_v22 = vrot.slane %v3198_v2, 4 }
0x1711   : > { %v3200_v43 = vadd.f32 %v3199_v22, %v3198_v2 }
0x1713   : > { %v3201_v23 = vrot.slane %v3200_v43, 2 }
0x1715   : > { %v3202_v24 = vadd.f32 %v3201_v23, %v3200_v43 }
0x1717   : > { %v3203_v28 = vrot.slane %v3202_v24, 1 }
0x1719   : > { %v3204_v30 = vadd.f32 %v3203_v28, %v3202_v24 }
0x171b   : > { %3585 = vpush %v3204_v30 }
0x171c   : > { %3587 = vpush %v3214_v31 }
0x174c   : > { %s3586_s4 = spop %3585 }
0x174d   : > { %v3216_v26 = vstv %s3586_s4  ;;  %s3588_s11 = spop %3587 }
0x174e   : > { %3217 = vst [vmem:[%s1524_s18] sm:$0xff] %v3216_v26  ;;  %v3218_v32 = vstv %s3588_s11 }
0x174f   : > { %3219 = vst [vmem:[%s1528_s28] sm:$0xff] %v3218_v32 }
0x1750 PF: > { %s5717_s15 = sld [smem:[#allocation74_spill]] }
0x1756   : > { %s108_s22 = sadd.s32 1, %s5717_s15  }
0x1757   : > { %p105_p10 = scmp.ge.s32.totalorder %s108_s22, 4  }
0x1759   :  { %107 = sbr.rel (!%p105_p10) target bundleno = 99 (0x63), region = 341 }
0x175e   :  { %3253 = vsyncpa [#allocation3], 1 }
0x175f   :  { %3255 = vsyncpa [#allocation3 + $0x1], 1 }
0x1760   :  { %3256 = vsyncpa [#allocation10], 1 }
0x1761   :  { %3257 = vsyncpa [#allocation13], 1 }
0x1762   :  { %3258 = vsyncpa [#allocation16], 1 }
0x1763   :  { %3259 = vsyncpa [#allocation19], 1 }
0x1764   :  { %3260 = vsyncpa [#allocation22], 1 }
0x1765   :  { %3261 = vsyncpa [#allocation25], 1 }
0x1766   :  { %3262 = vsyncpa [#allocation28], 1 }
0x1767   :  { %3263 = vsyncpa [#allocation4], 1 }
0x1768   :  { %3265 = vsyncpa [#allocation4 + $0x1], 1 }
0x1769   :  { %3266 = vsyncpa [#allocation6], 1 }

</bundles_post_ra>
